<compile_context>
chip_gen: v7x
topology: tpu7x:2x2x1
jax: 0.10.0
libtpu: 0.0.40
codegen_flags: <defaults>
</compile_context>

<pallas_src>
import functools

import jax
import jax.numpy as jnp
from jax.experimental import pallas as pl
from jax.experimental.pallas import tpu as pltpu


# ------------------------------- the kernel --------------------------------

def mtp_sub_kernel(hs_ref, emb_ref,
                   norm_w_ref, lin_w1_ref, lin_w2_ref, lin_b_ref,
                   norm1_w_ref, qkv_w_ref, qkv_b_ref, o_w_ref, o_b_ref,
                   norm2_w_ref, gu_w_ref, gu_b_ref, down_w_ref, down_b_ref,
                   cos_ref, sin_ref,
                   out_ref, ctx_ref, *, n_heads, n_kv_heads, head_dim, eps):
    Bblk, S, H = hs_ref.shape
    M = Bblk * S
    hd = head_dim
    n_rep = n_heads // n_kv_heads
    QW = n_heads * hd           # q / q_rot widths
    KVW = n_kv_heads * hd       # k / k_rot / v widths
    f32, bf16 = jnp.float32, jnp.bfloat16

    def rms(x, w):
        var = jnp.mean(x * x, axis=-1, keepdims=True)
        return w * (x * jax.lax.rsqrt(var + eps))

    # Fold batch into the M dimension for the projection GEMMs only.
    hs = hs_ref[...].astype(f32).reshape(M, H)
    emb = emb_ref[...].astype(f32).reshape(M, H)
    norm_w = norm_w_ref[...]                     # (1, H) f32

    # ---- MTPSub: concat(RMSNorm(hs), RMSNorm(emb)) @ W == rms(hs)@W1 + rms(emb)@W2 ----
    proj = (jnp.dot(rms(hs, norm_w).astype(bf16), lin_w1_ref[...],
                    preferred_element_type=f32)
            + jnp.dot(rms(emb, norm_w).astype(bf16), lin_w2_ref[...],
                      preferred_element_type=f32)
            + lin_b_ref[...])                                        # (M, H) f32

    # ---- GPTBlock.attention(norm1(proj)) ----
    ai = rms(proj, norm1_w_ref[...]).astype(bf16)
    # One fused GEMM for [q*scale | rot(q)*scale | k | rot(k) | v].
    qkv = jnp.dot(ai, qkv_w_ref[...], preferred_element_type=f32) + qkv_b_ref[...]
    q = qkv[:, 0:QW]
    qr = qkv[:, QW:2 * QW]
    k = qkv[:, 2 * QW:2 * QW + KVW]
    kr = qkv[:, 2 * QW + KVW:2 * QW + 2 * KVW]
    v = qkv[:, 2 * QW + 2 * KVW:2 * QW + 3 * KVW]

    # Compact RoPE tables (S, hd) -> broadcast over the batch block (M, hd).
    cos_m = jnp.broadcast_to(cos_ref[...][None], (Bblk, S, hd)).reshape(M, hd)
    sin_m = jnp.broadcast_to(sin_ref[...][None], (Bblk, S, hd)).reshape(M, hd)

    # Single (S, S) causal mask, computed once.
    ridx = jax.lax.broadcasted_iota(jnp.int32, (S, S), 0)
    cidx = jax.lax.broadcasted_iota(jnp.int32, (S, S), 1)
    mask = jnp.where(ridx >= cidx, 0.0, -1e30).astype(f32)[None]     # (1, S, S)

    # Per-head attention; batch stays a dot_general batch dim (no cross-batch FLOPs).
    for g in range(n_kv_heads):
        ke_h = (k[:, g * hd:(g + 1) * hd] * cos_m
                + kr[:, g * hd:(g + 1) * hd] * sin_m).astype(bf16).reshape(Bblk, S, hd)
        v_h = v[:, g * hd:(g + 1) * hd].astype(bf16).reshape(Bblk, S, hd)
        for r in range(n_rep):
            h = g * n_rep + r
            qe_h = (q[:, h * hd:(h + 1) * hd] * cos_m
                    + qr[:, h * hd:(h + 1) * hd] * sin_m).astype(bf16).reshape(Bblk, S, hd)
            s = jnp.einsum('bqd,bkd->bqk', qe_h, ke_h,
                           preferred_element_type=f32) + mask          # (Bblk, S, S)
            s = s - jnp.max(s, axis=-1, keepdims=True)
            p = jnp.exp(s)
            p = p * pl.reciprocal(jnp.sum(p, axis=-1, keepdims=True), approx=True)
            o_h = jnp.einsum('bqk,bkd->bqd', p.astype(bf16), v_h,
                             preferred_element_type=f32)               # (Bblk, S, hd)
            # Head concat realized as a lane-offset store into the VMEM scratch.
            ctx_ref[:, h * hd:(h + 1) * hd] = o_h.reshape(M, hd).astype(bf16)

    # Single o-projection GEMM with full K = H contraction.
    attn_out = jnp.dot(ctx_ref[...], o_w_ref[...],
                       preferred_element_type=f32) + o_b_ref[...]
    resid1 = proj + attn_out

    # ---- GPTBlock.mlp(norm2(resid1)) :: down(silu(gate(x)) * up(x)) ----
    mi = rms(resid1, norm2_w_ref[...]).astype(bf16)
    gu = jnp.dot(mi, gu_w_ref[...], preferred_element_type=f32) + gu_b_ref[...]
    i_dim = gu.shape[-1] // 2
    gate = gu[:, :i_dim]
    up = gu[:, i_dim:]
    act = (gate * jax.nn.sigmoid(gate)) * up
    mlp_out = jnp.dot(act.astype(bf16), down_w_ref[...],
                      preferred_element_type=f32) + down_b_ref[...]

    out_ref[...] = (resid1 + mlp_out).reshape(Bblk, S, H).astype(out_ref.dtype)


# ------------------------------- wrapper ------------------------------------

_PARAM_ORDER = ("norm_w", "lin_w1", "lin_w2", "lin_b", "norm1_w",
                "qkv_w", "qkv_b", "o_w", "o_b", "norm2_w",
                "gu_w", "gu_b", "down_w", "down_b")


def _default_block_b(B):
    # v7x has 2 TensorCores: give the "parallel" grid >= 2 steps. Single-TC v5e/v6e:
    # one grid step (extra steps are pure pipeline overhead).
    try:
        kind = jax.devices()[0].device_kind.lower()
        if "v7" in kind and B % 2 == 0:
            return max(B // 2, 1)
    except Exception:
        pass
    return B


def mtp_sub_forward(params, hidden_states, inputs_embeds, cos, sin, *,
                    n_heads, n_kv_heads, head_dim, eps=1e-8, block_b=None):
    B, S, H = hidden_states.shape
    if block_b is None:
        block_b = _default_block_b(B)
    assert B % block_b == 0
    f32, bf16 = jnp.float32, jnp.bfloat16
    hd = head_dim
    scale = float(hd) ** -0.5

    def rot_cols(w, n_h):
        # Apply rotate_half to the per-head output columns of a weight / bias.
        w3 = w.reshape(w.shape[:-1] + (n_h, hd))
        w3 = jnp.concatenate([-w3[..., hd // 2:], w3[..., :hd // 2]], axis=-1)
        return w3.reshape(w.shape)

    lin_w = params["lin_w"]
    # Fold the 1/sqrt(head_dim) score scale into the Q columns.
    q_w_s = params["q_w"] * scale
    q_b_s = params["q_b"] * scale
    qkv_w = jnp.concatenate(
        [q_w_s, rot_cols(q_w_s, n_heads),
         params["k_w"], rot_cols(params["k_w"], n_kv_heads),
         params["v_w"]], axis=1).astype(bf16)
    qkv_b = jnp.concatenate(
        [q_b_s, rot_cols(q_b_s, n_heads),
         params["k_b"], rot_cols(params["k_b"], n_kv_heads),
         params["v_b"]], axis=1).astype(f32)
    gu_w = jnp.concatenate([params["gate_w"], params["up_w"]], axis=1).astype(bf16)
    gu_b = jnp.concatenate([params["gate_b"], params["up_b"]], axis=1).astype(f32)

    prepared = {
        "norm_w": params["norm_w"].astype(f32),
        "lin_w1": lin_w[:H].astype(bf16),
        "lin_w2": lin_w[H:].astype(bf16),
        "lin_b": params["lin_b"].astype(f32),
        "norm1_w": params["norm1_w"].astype(f32),
        "qkv_w": qkv_w, "qkv_b": qkv_b,
        "o_w": params["o_w"].astype(bf16),
        "o_b": params["o_b"].astype(f32),
        "norm2_w": params["norm2_w"].astype(f32),
        "gu_w": gu_w, "gu_b": gu_b,
        "down_w": params["down_w"].astype(bf16),
        "down_b": params["down_b"].astype(f32),
    }
    wlist = [prepared[name] for name in _PARAM_ORDER]

    # Compact RoPE tables: (S, hd); broadcast over batch/heads inside the kernel.
    cos_t = cos.astype(f32)
    sin_t = sin.astype(f32)
    consts = wlist + [cos_t, sin_t]

    act_spec = pl.BlockSpec((block_b, S, H), lambda i: (i, 0, 0))
    out_spec = pl.BlockSpec((block_b, S, H), lambda i: (i, 0, 0))

    kernel = functools.partial(mtp_sub_kernel, n_heads=n_heads,
                               n_kv_heads=n_kv_heads, head_dim=head_dim, eps=eps)

    def run(single_buffer_weights):
        def const_spec(a):
            if single_buffer_weights:
                # Grid-invariant operand: single-buffer it (halves its VMEM footprint).
                return pl.BlockSpec(a.shape, lambda i: (0, 0),
                                    pipeline_mode=pl.Buffered(1))
            return pl.BlockSpec(a.shape, lambda i: (0, 0))

        return pl.pallas_call(
            kernel,
            out_shape=jax.ShapeDtypeStruct((B, S, H), jnp.float32),
            grid=(B // block_b,),
            in_specs=[act_spec, act_spec] + [const_spec(a) for a in consts],
            out_specs=out_spec,
            scratch_shapes=[pltpu.VMEM((block_b * S, H), jnp.bfloat16)],
            compiler_params=pltpu.CompilerParams(
                dimension_semantics=("parallel",),
                vmem_limit_bytes=32 * 1024 * 1024),
        )(hidden_states.astype(bf16), inputs_embeds.astype(bf16), *consts)

    try:
        return run(True)
    except Exception:
        # Fallback for jax versions where BlockSpec(pipeline_mode=pl.Buffered(1)) is
        # unavailable / rejected: identical kernel, default double-buffered constants.
        return run(False)


# --------------------------- pure-JAX reference ------------------------------

def ref_forward(params, hs, emb, cos, sin, *, n_heads, n_kv_heads, head_dim, eps=1e-8):
    def rms(x, w):
        var = jnp.mean(x * x, axis=-1, keepdims=True)
        return w * (x * jax.lax.rsqrt(var + eps))

    def rot(x):
        d = x.shape[-1]
        return jnp.concatenate([-x[..., d // 2:], x[..., : d // 2]], axis=-1)

    concat = jnp.concatenate([rms(hs, params["norm_w"]), rms(emb, params["norm_w"])], -1)
    proj = concat @ params["lin_w"] + params["lin_b"]
    B, S, H = proj.shape

    x = rms(proj, params["norm1_w"])
    q = (x @ params["q_w"] + params["q_b"]).reshape(B, S, n_heads, head_dim).transpose(0, 2, 1, 3)
    k = (x @ params["k_w"] + params["k_b"]).reshape(B, S, n_kv_heads, head_dim).transpose(0, 2, 1, 3)
    v = (x @ params["v_w"] + params["v_b"]).reshape(B, S, n_kv_heads, head_dim).transpose(0, 2, 1, 3)
    cos4, sin4 = cos[None, None], sin[None, None]
    q = q * cos4 + rot(q) * sin4
    k = k * cos4 + rot(k) * sin4
    n_rep = n_heads // n_kv_heads
    k = jnp.repeat(k, n_rep, axis=1)
    v = jnp.repeat(v, n_rep, axis=1)
    scores = jnp.einsum("bhqd,bhkd->bhqk", q, k) * head_dim ** -0.5
    mask = jnp.where(jnp.arange(S)[:, None] >= jnp.arange(S)[None, :], 0.0, -1e30)
    attn = jax.nn.softmax(scores + mask, axis=-1)
    out = jnp.einsum("bhqk,bhkd->bhqd", attn, v).transpose(0, 2, 1, 3).reshape(B, S, H)
    attn_out = out @ params["o_w"] + params["o_b"]
    resid1 = proj + attn_out

    m = rms(resid1, params["norm2_w"])
    gate = m @ params["gate_w"] + params["gate_b"]
    up = m @ params["up_w"] + params["up_b"]
    mlp_out = (jax.nn.silu(gate) * up) @ params["down_w"] + params["down_b"]
    return resid1 + mlp_out


# --------------------------------- main --------------------------------------

if __name__ == "__main__":
    # small config
    B, S = 2, 8
    H = 64                      # hidden_size
    n_heads = 4
    n_kv_heads = 2
    head_dim = H // n_heads     # 16
    I = 128                     # intermediate_size
    rope_theta = 10000.0
    eps = 1e-8

    key = jax.random.PRNGKey(0)
    ks = jax.random.split(key, 16)
    scale = 0.05

    def lin(k, fan_in, fan_out):
        return scale * jax.random.normal(k, (fan_in, fan_out), jnp.float32)

    params = {
        "norm_w": jnp.ones((1, H), jnp.float32),
        "lin_w": lin(ks[0], 2 * H, H),
        "lin_b": jnp.zeros((1, H), jnp.float32),
        "norm1_w": jnp.ones((1, H), jnp.float32),
        "q_w": lin(ks[1], H, H),
        "q_b": scale * jax.random.normal(ks[2], (1, H), jnp.float32),
        "k_w": lin(ks[3], H, n_kv_heads * head_dim),
        "k_b": scale * jax.random.normal(ks[4], (1, n_kv_heads * head_dim), jnp.float32),
        "v_w": lin(ks[5], H, n_kv_heads * head_dim),
        "v_b": scale * jax.random.normal(ks[6], (1, n_kv_heads * head_dim), jnp.float32),
        "o_w": lin(ks[7], H, H),
        "o_b": jnp.zeros((1, H), jnp.float32),
        "norm2_w": jnp.ones((1, H), jnp.float32),
        "gate_w": lin(ks[8], H, I),
        "gate_b": scale * jax.random.normal(ks[9], (1, I), jnp.float32),
        "up_w": lin(ks[10], H, I),
        "up_b": scale * jax.random.normal(ks[11], (1, I), jnp.float32),
        "down_w": lin(ks[12], I, H),
        "down_b": jnp.zeros((1, H), jnp.float32),
    }

    hidden_states = jax.random.normal(ks[13], (B, S, H), jnp.float32)
    inputs_embeds = jax.random.normal(ks[14], (B, S, H), jnp.float32)

    # RoPE tables (position_ids = arange(S); no dynamic scaling since S << max_pos)
    inv_freq = 1.0 / (rope_theta ** (jnp.arange(0, head_dim, 2, dtype=jnp.float32) / head_dim))
    pos = jnp.arange(S, dtype=jnp.float32)
    freqs = pos[:, None] * inv_freq[None, :]
    cos = jnp.cos(jnp.concatenate([freqs, freqs], axis=-1))
    sin = jnp.sin(jnp.concatenate([freqs, freqs], axis=-1))

    out = mtp_sub_forward(params, hidden_states, inputs_embeds, cos, sin,
                          n_heads=n_heads, n_kv_heads=n_kv_heads,
                          head_dim=head_dim, eps=eps)
    out = jax.block_until_ready(out)

    ref = ref_forward(params, hidden_states, inputs_embeds, cos, sin,
                      n_heads=n_heads, n_kv_heads=n_kv_heads,
                      head_dim=head_dim, eps=eps)
    ref = jax.block_until_ready(ref)

    # bf16 activations + bf16 GEMM operands + approx reciprocal shift numerics slightly
    # vs. the f32 reference.
    if not jnp.allclose(out, ref, atol=3e-2, rtol=3e-2):
        raise AssertionError(
            f"mismatch: max abs err = {float(jnp.max(jnp.abs(out - ref)))}")
    print("KERNEL_OK")
</pallas_src>

<mosaic_0001>
module attributes {stable_mosaic.version = 11 : i64} {
  func.func @mtp_sub_kernel(%arg0: i32, %arg1: memref<2x8x64xbf16, #tpu.memory_space<vmem>>, %arg2: memref<2x8x64xbf16, #tpu.memory_space<vmem>>, %arg3: memref<1x64xf32, #tpu.memory_space<vmem>>, %arg4: memref<64x64xbf16, #tpu.memory_space<vmem>>, %arg5: memref<64x64xbf16, #tpu.memory_space<vmem>>, %arg6: memref<1x64xf32, #tpu.memory_space<vmem>>, %arg7: memref<1x64xf32, #tpu.memory_space<vmem>>, %arg8: memref<64x224xbf16, #tpu.memory_space<vmem>>, %arg9: memref<1x224xf32, #tpu.memory_space<vmem>>, %arg10: memref<64x64xbf16, #tpu.memory_space<vmem>>, %arg11: memref<1x64xf32, #tpu.memory_space<vmem>>, %arg12: memref<1x64xf32, #tpu.memory_space<vmem>>, %arg13: memref<64x256xbf16, #tpu.memory_space<vmem>>, %arg14: memref<1x256xf32, #tpu.memory_space<vmem>>, %arg15: memref<128x64xbf16, #tpu.memory_space<vmem>>, %arg16: memref<1x64xf32, #tpu.memory_space<vmem>>, %arg17: memref<8x16xf32, #tpu.memory_space<vmem>>, %arg18: memref<8x16xf32, #tpu.memory_space<vmem>>, %arg19: memref<2x8x64xf32, #tpu.memory_space<vmem>>, %arg20: memref<16x64xbf16, #tpu.memory_space<vmem>>) attributes {dimension_semantics = [#tpu.dimension_semantics<parallel>], iteration_bounds = array<i64: 1>, scalar_prefetch = 0 : i64, scratch_operands = 1 : i64, tpu.core_type = #tpu.core_type<tc>, window_params = [{transform_indices = @transform_0, window_bounds = array<i64: 2, 8, 64>}, {transform_indices = @transform_1, window_bounds = array<i64: 2, 8, 64>}, {pipeline_mode = #tpu.pipeline_mode<synchronous>, transform_indices = @transform_2, window_bounds = array<i64: 1, 64>}, {pipeline_mode = #tpu.pipeline_mode<synchronous>, transform_indices = @transform_3, window_bounds = array<i64: 64, 64>}, {pipeline_mode = #tpu.pipeline_mode<synchronous>, transform_indices = @transform_4, window_bounds = array<i64: 64, 64>}, {pipeline_mode = #tpu.pipeline_mode<synchronous>, transform_indices = @transform_5, window_bounds = array<i64: 1, 64>}, {pipeline_mode = #tpu.pipeline_mode<synchronous>, transform_indices = @transform_6, window_bounds = array<i64: 1, 64>}, {pipeline_mode = #tpu.pipeline_mode<synchronous>, transform_indices = @transform_7, window_bounds = array<i64: 64, 224>}, {pipeline_mode = #tpu.pipeline_mode<synchronous>, transform_indices = @transform_8, window_bounds = array<i64: 1, 224>}, {pipeline_mode = #tpu.pipeline_mode<synchronous>, transform_indices = @transform_9, window_bounds = array<i64: 64, 64>}, {pipeline_mode = #tpu.pipeline_mode<synchronous>, transform_indices = @transform_10, window_bounds = array<i64: 1, 64>}, {pipeline_mode = #tpu.pipeline_mode<synchronous>, transform_indices = @transform_11, window_bounds = array<i64: 1, 64>}, {pipeline_mode = #tpu.pipeline_mode<synchronous>, transform_indices = @transform_12, window_bounds = array<i64: 64, 256>}, {pipeline_mode = #tpu.pipeline_mode<synchronous>, transform_indices = @transform_13, window_bounds = array<i64: 1, 256>}, {pipeline_mode = #tpu.pipeline_mode<synchronous>, transform_indices = @transform_14, window_bounds = array<i64: 128, 64>}, {pipeline_mode = #tpu.pipeline_mode<synchronous>, transform_indices = @transform_15, window_bounds = array<i64: 1, 64>}, {pipeline_mode = #tpu.pipeline_mode<synchronous>, transform_indices = @transform_16, window_bounds = array<i64: 8, 16>}, {pipeline_mode = #tpu.pipeline_mode<synchronous>, transform_indices = @transform_17, window_bounds = array<i64: 8, 16>}, {transform_indices = @transform_18, window_bounds = array<i64: 2, 8, 64>}]} {
    %c0 = arith.constant 0 : index
    %c0_0 = arith.constant 0 : index
    %c0_1 = arith.constant 0 : index
    %0 = vector.load %arg1[%c0, %c0_0, %c0_1] : memref<2x8x64xbf16, #tpu.memory_space<vmem>>, vector<2x8x64xbf16>
    %1 = arith.extf %0 : vector<2x8x64xbf16> to vector<2x8x64xf32>
    %2 = vector.shape_cast %1 : vector<2x8x64xf32> to vector<16x64xf32>
    %c0_2 = arith.constant 0 : index
    %c0_3 = arith.constant 0 : index
    %c0_4 = arith.constant 0 : index
    %3 = vector.load %arg2[%c0_2, %c0_3, %c0_4] : memref<2x8x64xbf16, #tpu.memory_space<vmem>>, vector<2x8x64xbf16>
    %4 = arith.extf %3 : vector<2x8x64xbf16> to vector<2x8x64xf32>
    %5 = vector.shape_cast %4 : vector<2x8x64xf32> to vector<16x64xf32>
    %c0_5 = arith.constant 0 : index
    %c0_6 = arith.constant 0 : index
    %6 = vector.load %arg3[%c0_5, %c0_6] : memref<1x64xf32, #tpu.memory_space<vmem>>, vector<1x64xf32>
    %7 = arith.mulf %2, %2 : vector<16x64xf32>
    %cst = arith.constant dense<0.000000e+00> : vector<16xf32>
    %8 = vector.multi_reduction <add>, %7, %cst [1] : vector<16x64xf32> to vector<16xf32>
    %9 = vector.shape_cast %8 : vector<16xf32> to vector<16x1xf32>
    %cst_7 = arith.constant 6.400000e+01 : f32
    %10 = vector.broadcast %cst_7 : f32 to vector<16x1xf32>
    %11 = arith.divf %9, %10 : vector<16x1xf32>
    %cst_8 = arith.constant 9.99999993E-9 : f32
    %12 = vector.broadcast %cst_8 : f32 to vector<16x1xf32>
    %13 = arith.addf %11, %12 : vector<16x1xf32>
    %14 = math.rsqrt %13 : vector<16x1xf32>
    %15 = vector.broadcast %14 : vector<16x1xf32> to vector<16x64xf32>
    %16 = arith.mulf %2, %15 : vector<16x64xf32>
    %17 = vector.broadcast %6 : vector<1x64xf32> to vector<16x64xf32>
    %18 = arith.mulf %17, %16 : vector<16x64xf32>
    %19 = arith.truncf %18 : vector<16x64xf32> to vector<16x64xbf16>
    %c0_9 = arith.constant 0 : index
    %c0_10 = arith.constant 0 : index
    %20 = vector.load %arg4[%c0_9, %c0_10] : memref<64x64xbf16, #tpu.memory_space<vmem>>, vector<64x64xbf16>
    %cst_11 = arith.constant dense<0.000000e+00> : vector<16x64xf32>
    %21 = tpu.matmul %19, %20, %cst_11 {dimension_numbers = #tpu.dot_dimension_numbers<[1], [0], [0], [1], [0, 0, 1, 1], [], []>} : vector<16x64xbf16>, vector<64x64xbf16>, vector<16x64xf32> -> vector<16x64xf32>
    %22 = arith.mulf %5, %5 : vector<16x64xf32>
    %cst_12 = arith.constant dense<0.000000e+00> : vector<16xf32>
    %23 = vector.multi_reduction <add>, %22, %cst_12 [1] : vector<16x64xf32> to vector<16xf32>
    %24 = vector.shape_cast %23 : vector<16xf32> to vector<16x1xf32>
    %cst_13 = arith.constant 6.400000e+01 : f32
    %25 = vector.broadcast %cst_13 : f32 to vector<16x1xf32>
    %26 = arith.divf %24, %25 : vector<16x1xf32>
    %cst_14 = arith.constant 9.99999993E-9 : f32
    %27 = vector.broadcast %cst_14 : f32 to vector<16x1xf32>
    %28 = arith.addf %26, %27 : vector<16x1xf32>
    %29 = math.rsqrt %28 : vector<16x1xf32>
    %30 = vector.broadcast %29 : vector<16x1xf32> to vector<16x64xf32>
    %31 = arith.mulf %5, %30 : vector<16x64xf32>
    %32 = vector.broadcast %6 : vector<1x64xf32> to vector<16x64xf32>
    %33 = arith.mulf %32, %31 : vector<16x64xf32>
    %34 = arith.truncf %33 : vector<16x64xf32> to vector<16x64xbf16>
    %c0_15 = arith.constant 0 : index
    %c0_16 = arith.constant 0 : index
    %35 = vector.load %arg5[%c0_15, %c0_16] : memref<64x64xbf16, #tpu.memory_space<vmem>>, vector<64x64xbf16>
    %cst_17 = arith.constant dense<0.000000e+00> : vector<16x64xf32>
    %36 = tpu.matmul %34, %35, %cst_17 {dimension_numbers = #tpu.dot_dimension_numbers<[1], [0], [0], [1], [0, 0, 1, 1], [], []>} : vector<16x64xbf16>, vector<64x64xbf16>, vector<16x64xf32> -> vector<16x64xf32>
    %37 = arith.addf %21, %36 : vector<16x64xf32>
    %c0_18 = arith.constant 0 : index
    %c0_19 = arith.constant 0 : index
    %38 = vector.load %arg6[%c0_18, %c0_19] : memref<1x64xf32, #tpu.memory_space<vmem>>, vector<1x64xf32>
    %39 = vector.broadcast %38 : vector<1x64xf32> to vector<16x64xf32>
    %40 = arith.addf %37, %39 : vector<16x64xf32>
    %c0_20 = arith.constant 0 : index
    %c0_21 = arith.constant 0 : index
    %41 = vector.load %arg7[%c0_20, %c0_21] : memref<1x64xf32, #tpu.memory_space<vmem>>, vector<1x64xf32>
    %42 = arith.mulf %40, %40 : vector<16x64xf32>
    %cst_22 = arith.constant dense<0.000000e+00> : vector<16xf32>
    %43 = vector.multi_reduction <add>, %42, %cst_22 [1] : vector<16x64xf32> to vector<16xf32>
    %44 = vector.shape_cast %43 : vector<16xf32> to vector<16x1xf32>
    %cst_23 = arith.constant 6.400000e+01 : f32
    %45 = vector.broadcast %cst_23 : f32 to vector<16x1xf32>
    %46 = arith.divf %44, %45 : vector<16x1xf32>
    %cst_24 = arith.constant 9.99999993E-9 : f32
    %47 = vector.broadcast %cst_24 : f32 to vector<16x1xf32>
    %48 = arith.addf %46, %47 : vector<16x1xf32>
    %49 = math.rsqrt %48 : vector<16x1xf32>
    %50 = vector.broadcast %49 : vector<16x1xf32> to vector<16x64xf32>
    %51 = arith.mulf %40, %50 : vector<16x64xf32>
    %52 = vector.broadcast %41 : vector<1x64xf32> to vector<16x64xf32>
    %53 = arith.mulf %52, %51 : vector<16x64xf32>
    %54 = arith.truncf %53 : vector<16x64xf32> to vector<16x64xbf16>
    %c0_25 = arith.constant 0 : index
    %c0_26 = arith.constant 0 : index
    %55 = vector.load %arg8[%c0_25, %c0_26] : memref<64x224xbf16, #tpu.memory_space<vmem>>, vector<64x224xbf16>
    %cst_27 = arith.constant dense<0.000000e+00> : vector<16x224xf32>
    %56 = tpu.matmul %54, %55, %cst_27 {dimension_numbers = #tpu.dot_dimension_numbers<[1], [0], [0], [1], [0, 0, 1, 1], [], []>} : vector<16x64xbf16>, vector<64x224xbf16>, vector<16x224xf32> -> vector<16x224xf32>
    %c0_28 = arith.constant 0 : index
    %c0_29 = arith.constant 0 : index
    %57 = vector.load %arg9[%c0_28, %c0_29] : memref<1x224xf32, #tpu.memory_space<vmem>>, vector<1x224xf32>
    %58 = vector.broadcast %57 : vector<1x224xf32> to vector<16x224xf32>
    %59 = arith.addf %56, %58 : vector<16x224xf32>
    %60 = vector.extract_strided_slice %59 {offsets = [0, 0], sizes = [16, 64], strides = [1, 1]} : vector<16x224xf32> to vector<16x64xf32>
    %61 = vector.extract_strided_slice %59 {offsets = [0, 64], sizes = [16, 64], strides = [1, 1]} : vector<16x224xf32> to vector<16x64xf32>
    %62 = vector.extract_strided_slice %59 {offsets = [0, 128], sizes = [16, 32], strides = [1, 1]} : vector<16x224xf32> to vector<16x32xf32>
    %63 = vector.extract_strided_slice %59 {offsets = [0, 160], sizes = [16, 32], strides = [1, 1]} : vector<16x224xf32> to vector<16x32xf32>
    %64 = vector.extract_strided_slice %59 {offsets = [0, 192], sizes = [16, 32], strides = [1, 1]} : vector<16x224xf32> to vector<16x32xf32>
    %c0_30 = arith.constant 0 : index
    %c0_31 = arith.constant 0 : index
    %65 = vector.load %arg17[%c0_30, %c0_31] : memref<8x16xf32, #tpu.memory_space<vmem>>, vector<8x16xf32>
    %66 = vector.shape_cast %65 : vector<8x16xf32> to vector<1x8x16xf32>
    %67 = vector.shape_cast %66 : vector<1x8x16xf32> to vector<1x8x16xf32>
    %68 = vector.broadcast %67 : vector<1x8x16xf32> to vector<2x8x16xf32>
    %69 = vector.shape_cast %68 : vector<2x8x16xf32> to vector<16x16xf32>
    %c0_32 = arith.constant 0 : index
    %c0_33 = arith.constant 0 : index
    %70 = vector.load %arg18[%c0_32, %c0_33] : memref<8x16xf32, #tpu.memory_space<vmem>>, vector<8x16xf32>
    %71 = vector.shape_cast %70 : vector<8x16xf32> to vector<1x8x16xf32>
    %72 = vector.shape_cast %71 : vector<1x8x16xf32> to vector<1x8x16xf32>
    %73 = vector.broadcast %72 : vector<1x8x16xf32> to vector<2x8x16xf32>
    %74 = vector.shape_cast %73 : vector<2x8x16xf32> to vector<16x16xf32>
    %75 = tpu.iota {dimensions = array<i32: 0>} : vector<8x8xi32>
    %76 = tpu.iota {dimensions = array<i32: 1>} : vector<8x8xi32>
    %77 = arith.cmpi sge, %75, %76 : vector<8x8xi32>
    %cst_34 = arith.constant 0.000000e+00 : f32
    %cst_35 = arith.constant -1.000000e+30 : f32
    %78 = vector.broadcast %cst_34 : f32 to vector<8x8xf32>
    %79 = vector.broadcast %cst_35 : f32 to vector<8x8xf32>
    %80 = arith.select %77, %78, %79 : vector<8x8xi1>, vector<8x8xf32>
    %81 = vector.shape_cast %80 : vector<8x8xf32> to vector<1x8x8xf32>
    %82 = vector.extract_strided_slice %62 {offsets = [0, 0], sizes = [16, 16], strides = [1, 1]} : vector<16x32xf32> to vector<16x16xf32>
    %83 = arith.mulf %82, %69 : vector<16x16xf32>
    %84 = vector.extract_strided_slice %63 {offsets = [0, 0], sizes = [16, 16], strides = [1, 1]} : vector<16x32xf32> to vector<16x16xf32>
    %85 = arith.mulf %84, %74 : vector<16x16xf32>
    %86 = arith.addf %83, %85 : vector<16x16xf32>
    %87 = arith.truncf %86 : vector<16x16xf32> to vector<16x16xbf16>
    %88 = vector.shape_cast %87 : vector<16x16xbf16> to vector<2x8x16xbf16>
    %89 = vector.extract_strided_slice %64 {offsets = [0, 0], sizes = [16, 16], strides = [1, 1]} : vector<16x32xf32> to vector<16x16xf32>
    %90 = arith.truncf %89 : vector<16x16xf32> to vector<16x16xbf16>
    %91 = vector.shape_cast %90 : vector<16x16xbf16> to vector<2x8x16xbf16>
    %92 = vector.extract_strided_slice %60 {offsets = [0, 0], sizes = [16, 16], strides = [1, 1]} : vector<16x64xf32> to vector<16x16xf32>
    %93 = arith.mulf %92, %69 : vector<16x16xf32>
    %94 = vector.extract_strided_slice %61 {offsets = [0, 0], sizes = [16, 16], strides = [1, 1]} : vector<16x64xf32> to vector<16x16xf32>
    %95 = arith.mulf %94, %74 : vector<16x16xf32>
    %96 = arith.addf %93, %95 : vector<16x16xf32>
    %97 = arith.truncf %96 : vector<16x16xf32> to vector<16x16xbf16>
    %98 = vector.shape_cast %97 : vector<16x16xbf16> to vector<2x8x16xbf16>
    "tpu.trace_start"() <{level = 10 : i32, message = "bqd,bkd->bqk"}> : () -> ()
    %cst_36 = arith.constant dense<0.000000e+00> : vector<2x8x8xf32>
    %99 = tpu.matmul %98, %88, %cst_36 {dimension_numbers = #tpu.dot_dimension_numbers<[2], [2], [1], [1], [0, 0, 0, 1, 1, 1], [0], [0]>} : vector<2x8x16xbf16>, vector<2x8x16xbf16>, vector<2x8x8xf32> -> vector<2x8x8xf32>
    "tpu.trace_stop"() : () -> ()
    %100 = vector.broadcast %81 : vector<1x8x8xf32> to vector<2x8x8xf32>
    %101 = arith.addf %99, %100 : vector<2x8x8xf32>
    %cst_37 = arith.constant dense<0xFF800000> : vector<2x8xf32>
    %102 = vector.multi_reduction <maximumf>, %101, %cst_37 [2] : vector<2x8x8xf32> to vector<2x8xf32>
    %103 = vector.shape_cast %102 : vector<2x8xf32> to vector<2x8x1xf32>
    %104 = vector.broadcast %103 : vector<2x8x1xf32> to vector<2x8x8xf32>
    %105 = arith.subf %101, %104 : vector<2x8x8xf32>
    %106 = math.exp %105 : vector<2x8x8xf32>
    %cst_38 = arith.constant dense<0.000000e+00> : vector<2x8xf32>
    %107 = vector.multi_reduction <add>, %106, %cst_38 [2] : vector<2x8x8xf32> to vector<2x8xf32>
    %108 = vector.shape_cast %107 : vector<2x8xf32> to vector<2x8x1xf32>
    %109 = tpu.reciprocal %108 {approx = true} : vector<2x8x1xf32> -> vector<2x8x1xf32>
    %110 = vector.broadcast %109 : vector<2x8x1xf32> to vector<2x8x8xf32>
    %111 = arith.mulf %106, %110 : vector<2x8x8xf32>
    %112 = arith.truncf %111 : vector<2x8x8xf32> to vector<2x8x8xbf16>
    "tpu.trace_start"() <{level = 10 : i32, message = "bqk,bkd->bqd"}> : () -> ()
    %cst_39 = arith.constant dense<0.000000e+00> : vector<2x8x16xf32>
    %113 = tpu.matmul %112, %91, %cst_39 {dimension_numbers = #tpu.dot_dimension_numbers<[2], [1], [1], [2], [0, 0, 0, 1, 1, 2], [0], [0]>} : vector<2x8x8xbf16>, vector<2x8x16xbf16>, vector<2x8x16xf32> -> vector<2x8x16xf32>
    "tpu.trace_stop"() : () -> ()
    %114 = vector.shape_cast %113 : vector<2x8x16xf32> to vector<16x16xf32>
    %115 = arith.truncf %114 : vector<16x16xf32> to vector<16x16xbf16>
    %c0_40 = arith.constant 0 : index
    %c0_41 = arith.constant 0 : index
    %116 = vector.load %arg20[%c0_40, %c0_41] : memref<16x64xbf16, #tpu.memory_space<vmem>>, vector<16x16xbf16>
    tpu.vector_store %arg20[%c0_40, %c0_41], %115 {strides = array<i32>} : memref<16x64xbf16, #tpu.memory_space<vmem>>, vector<16x16xbf16>,
    %117 = vector.extract_strided_slice %60 {offsets = [0, 16], sizes = [16, 16], strides = [1, 1]} : vector<16x64xf32> to vector<16x16xf32>
    %118 = arith.mulf %117, %69 : vector<16x16xf32>
    %119 = vector.extract_strided_slice %61 {offsets = [0, 16], sizes = [16, 16], strides = [1, 1]} : vector<16x64xf32> to vector<16x16xf32>
    %120 = arith.mulf %119, %74 : vector<16x16xf32>
    %121 = arith.addf %118, %120 : vector<16x16xf32>
    %122 = arith.truncf %121 : vector<16x16xf32> to vector<16x16xbf16>
    %123 = vector.shape_cast %122 : vector<16x16xbf16> to vector<2x8x16xbf16>
    "tpu.trace_start"() <{level = 10 : i32, message = "bqd,bkd->bqk"}> : () -> ()
    %cst_42 = arith.constant dense<0.000000e+00> : vector<2x8x8xf32>
    %124 = tpu.matmul %123, %88, %cst_42 {dimension_numbers = #tpu.dot_dimension_numbers<[2], [2], [1], [1], [0, 0, 0, 1, 1, 1], [0], [0]>} : vector<2x8x16xbf16>, vector<2x8x16xbf16>, vector<2x8x8xf32> -> vector<2x8x8xf32>
    "tpu.trace_stop"() : () -> ()
    %125 = vector.broadcast %81 : vector<1x8x8xf32> to vector<2x8x8xf32>
    %126 = arith.addf %124, %125 : vector<2x8x8xf32>
    %cst_43 = arith.constant dense<0xFF800000> : vector<2x8xf32>
    %127 = vector.multi_reduction <maximumf>, %126, %cst_43 [2] : vector<2x8x8xf32> to vector<2x8xf32>
    %128 = vector.shape_cast %127 : vector<2x8xf32> to vector<2x8x1xf32>
    %129 = vector.broadcast %128 : vector<2x8x1xf32> to vector<2x8x8xf32>
    %130 = arith.subf %126, %129 : vector<2x8x8xf32>
    %131 = math.exp %130 : vector<2x8x8xf32>
    %cst_44 = arith.constant dense<0.000000e+00> : vector<2x8xf32>
    %132 = vector.multi_reduction <add>, %131, %cst_44 [2] : vector<2x8x8xf32> to vector<2x8xf32>
    %133 = vector.shape_cast %132 : vector<2x8xf32> to vector<2x8x1xf32>
    %134 = tpu.reciprocal %133 {approx = true} : vector<2x8x1xf32> -> vector<2x8x1xf32>
    %135 = vector.broadcast %134 : vector<2x8x1xf32> to vector<2x8x8xf32>
    %136 = arith.mulf %131, %135 : vector<2x8x8xf32>
    %137 = arith.truncf %136 : vector<2x8x8xf32> to vector<2x8x8xbf16>
    "tpu.trace_start"() <{level = 10 : i32, message = "bqk,bkd->bqd"}> : () -> ()
    %cst_45 = arith.constant dense<0.000000e+00> : vector<2x8x16xf32>
    %138 = tpu.matmul %137, %91, %cst_45 {dimension_numbers = #tpu.dot_dimension_numbers<[2], [1], [1], [2], [0, 0, 0, 1, 1, 2], [0], [0]>} : vector<2x8x8xbf16>, vector<2x8x16xbf16>, vector<2x8x16xf32> -> vector<2x8x16xf32>
    "tpu.trace_stop"() : () -> ()
    %139 = vector.shape_cast %138 : vector<2x8x16xf32> to vector<16x16xf32>
    %140 = arith.truncf %139 : vector<16x16xf32> to vector<16x16xbf16>
    %c0_46 = arith.constant 0 : index
    %c16 = arith.constant 16 : index
    %141 = vector.load %arg20[%c0_46, %c16] : memref<16x64xbf16, #tpu.memory_space<vmem>>, vector<16x16xbf16>
    tpu.vector_store %arg20[%c0_46, %c16], %140 {strides = array<i32>} : memref<16x64xbf16, #tpu.memory_space<vmem>>, vector<16x16xbf16>,
    %142 = vector.extract_strided_slice %62 {offsets = [0, 16], sizes = [16, 16], strides = [1, 1]} : vector<16x32xf32> to vector<16x16xf32>
    %143 = arith.mulf %142, %69 : vector<16x16xf32>
    %144 = vector.extract_strided_slice %63 {offsets = [0, 16], sizes = [16, 16], strides = [1, 1]} : vector<16x32xf32> to vector<16x16xf32>
    %145 = arith.mulf %144, %74 : vector<16x16xf32>
    %146 = arith.addf %143, %145 : vector<16x16xf32>
    %147 = arith.truncf %146 : vector<16x16xf32> to vector<16x16xbf16>
    %148 = vector.shape_cast %147 : vector<16x16xbf16> to vector<2x8x16xbf16>
    %149 = vector.extract_strided_slice %64 {offsets = [0, 16], sizes = [16, 16], strides = [1, 1]} : vector<16x32xf32> to vector<16x16xf32>
    %150 = arith.truncf %149 : vector<16x16xf32> to vector<16x16xbf16>
    %151 = vector.shape_cast %150 : vector<16x16xbf16> to vector<2x8x16xbf16>
    %152 = vector.extract_strided_slice %60 {offsets = [0, 32], sizes = [16, 16], strides = [1, 1]} : vector<16x64xf32> to vector<16x16xf32>
    %153 = arith.mulf %152, %69 : vector<16x16xf32>
    %154 = vector.extract_strided_slice %61 {offsets = [0, 32], sizes = [16, 16], strides = [1, 1]} : vector<16x64xf32> to vector<16x16xf32>
    %155 = arith.mulf %154, %74 : vector<16x16xf32>
    %156 = arith.addf %153, %155 : vector<16x16xf32>
    %157 = arith.truncf %156 : vector<16x16xf32> to vector<16x16xbf16>
    %158 = vector.shape_cast %157 : vector<16x16xbf16> to vector<2x8x16xbf16>
    "tpu.trace_start"() <{level = 10 : i32, message = "bqd,bkd->bqk"}> : () -> ()
    %cst_47 = arith.constant dense<0.000000e+00> : vector<2x8x8xf32>
    %159 = tpu.matmul %158, %148, %cst_47 {dimension_numbers = #tpu.dot_dimension_numbers<[2], [2], [1], [1], [0, 0, 0, 1, 1, 1], [0], [0]>} : vector<2x8x16xbf16>, vector<2x8x16xbf16>, vector<2x8x8xf32> -> vector<2x8x8xf32>
    "tpu.trace_stop"() : () -> ()
    %160 = vector.broadcast %81 : vector<1x8x8xf32> to vector<2x8x8xf32>
    %161 = arith.addf %159, %160 : vector<2x8x8xf32>
    %cst_48 = arith.constant dense<0xFF800000> : vector<2x8xf32>
    %162 = vector.multi_reduction <maximumf>, %161, %cst_48 [2] : vector<2x8x8xf32> to vector<2x8xf32>
    %163 = vector.shape_cast %162 : vector<2x8xf32> to vector<2x8x1xf32>
    %164 = vector.broadcast %163 : vector<2x8x1xf32> to vector<2x8x8xf32>
    %165 = arith.subf %161, %164 : vector<2x8x8xf32>
    %166 = math.exp %165 : vector<2x8x8xf32>
    %cst_49 = arith.constant dense<0.000000e+00> : vector<2x8xf32>
    %167 = vector.multi_reduction <add>, %166, %cst_49 [2] : vector<2x8x8xf32> to vector<2x8xf32>
    %168 = vector.shape_cast %167 : vector<2x8xf32> to vector<2x8x1xf32>
    %169 = tpu.reciprocal %168 {approx = true} : vector<2x8x1xf32> -> vector<2x8x1xf32>
    %170 = vector.broadcast %169 : vector<2x8x1xf32> to vector<2x8x8xf32>
    %171 = arith.mulf %166, %170 : vector<2x8x8xf32>
    %172 = arith.truncf %171 : vector<2x8x8xf32> to vector<2x8x8xbf16>
    "tpu.trace_start"() <{level = 10 : i32, message = "bqk,bkd->bqd"}> : () -> ()
    %cst_50 = arith.constant dense<0.000000e+00> : vector<2x8x16xf32>
    %173 = tpu.matmul %172, %151, %cst_50 {dimension_numbers = #tpu.dot_dimension_numbers<[2], [1], [1], [2], [0, 0, 0, 1, 1, 2], [0], [0]>} : vector<2x8x8xbf16>, vector<2x8x16xbf16>, vector<2x8x16xf32> -> vector<2x8x16xf32>
    "tpu.trace_stop"() : () -> ()
    %174 = vector.shape_cast %173 : vector<2x8x16xf32> to vector<16x16xf32>
    %175 = arith.truncf %174 : vector<16x16xf32> to vector<16x16xbf16>
    %c0_51 = arith.constant 0 : index
    %c32 = arith.constant 32 : index
    %176 = vector.load %arg20[%c0_51, %c32] : memref<16x64xbf16, #tpu.memory_space<vmem>>, vector<16x16xbf16>
    tpu.vector_store %arg20[%c0_51, %c32], %175 {strides = array<i32>} : memref<16x64xbf16, #tpu.memory_space<vmem>>, vector<16x16xbf16>,
    %177 = vector.extract_strided_slice %60 {offsets = [0, 48], sizes = [16, 16], strides = [1, 1]} : vector<16x64xf32> to vector<16x16xf32>
    %178 = arith.mulf %177, %69 : vector<16x16xf32>
    %179 = vector.extract_strided_slice %61 {offsets = [0, 48], sizes = [16, 16], strides = [1, 1]} : vector<16x64xf32> to vector<16x16xf32>
    %180 = arith.mulf %179, %74 : vector<16x16xf32>
    %181 = arith.addf %178, %180 : vector<16x16xf32>
    %182 = arith.truncf %181 : vector<16x16xf32> to vector<16x16xbf16>
    %183 = vector.shape_cast %182 : vector<16x16xbf16> to vector<2x8x16xbf16>
    "tpu.trace_start"() <{level = 10 : i32, message = "bqd,bkd->bqk"}> : () -> ()
    %cst_52 = arith.constant dense<0.000000e+00> : vector<2x8x8xf32>
    %184 = tpu.matmul %183, %148, %cst_52 {dimension_numbers = #tpu.dot_dimension_numbers<[2], [2], [1], [1], [0, 0, 0, 1, 1, 1], [0], [0]>} : vector<2x8x16xbf16>, vector<2x8x16xbf16>, vector<2x8x8xf32> -> vector<2x8x8xf32>
    "tpu.trace_stop"() : () -> ()
    %185 = vector.broadcast %81 : vector<1x8x8xf32> to vector<2x8x8xf32>
    %186 = arith.addf %184, %185 : vector<2x8x8xf32>
    %cst_53 = arith.constant dense<0xFF800000> : vector<2x8xf32>
    %187 = vector.multi_reduction <maximumf>, %186, %cst_53 [2] : vector<2x8x8xf32> to vector<2x8xf32>
    %188 = vector.shape_cast %187 : vector<2x8xf32> to vector<2x8x1xf32>
    %189 = vector.broadcast %188 : vector<2x8x1xf32> to vector<2x8x8xf32>
    %190 = arith.subf %186, %189 : vector<2x8x8xf32>
    %191 = math.exp %190 : vector<2x8x8xf32>
    %cst_54 = arith.constant dense<0.000000e+00> : vector<2x8xf32>
    %192 = vector.multi_reduction <add>, %191, %cst_54 [2] : vector<2x8x8xf32> to vector<2x8xf32>
    %193 = vector.shape_cast %192 : vector<2x8xf32> to vector<2x8x1xf32>
    %194 = tpu.reciprocal %193 {approx = true} : vector<2x8x1xf32> -> vector<2x8x1xf32>
    %195 = vector.broadcast %194 : vector<2x8x1xf32> to vector<2x8x8xf32>
    %196 = arith.mulf %191, %195 : vector<2x8x8xf32>
    %197 = arith.truncf %196 : vector<2x8x8xf32> to vector<2x8x8xbf16>
    "tpu.trace_start"() <{level = 10 : i32, message = "bqk,bkd->bqd"}> : () -> ()
    %cst_55 = arith.constant dense<0.000000e+00> : vector<2x8x16xf32>
    %198 = tpu.matmul %197, %151, %cst_55 {dimension_numbers = #tpu.dot_dimension_numbers<[2], [1], [1], [2], [0, 0, 0, 1, 1, 2], [0], [0]>} : vector<2x8x8xbf16>, vector<2x8x16xbf16>, vector<2x8x16xf32> -> vector<2x8x16xf32>
    "tpu.trace_stop"() : () -> ()
    %199 = vector.shape_cast %198 : vector<2x8x16xf32> to vector<16x16xf32>
    %200 = arith.truncf %199 : vector<16x16xf32> to vector<16x16xbf16>
    %c0_56 = arith.constant 0 : index
    %c48 = arith.constant 48 : index
    %201 = vector.load %arg20[%c0_56, %c48] : memref<16x64xbf16, #tpu.memory_space<vmem>>, vector<16x16xbf16>
    tpu.vector_store %arg20[%c0_56, %c48], %200 {strides = array<i32>} : memref<16x64xbf16, #tpu.memory_space<vmem>>, vector<16x16xbf16>,
    %c0_57 = arith.constant 0 : index
    %c0_58 = arith.constant 0 : index
    %202 = vector.load %arg20[%c0_57, %c0_58] : memref<16x64xbf16, #tpu.memory_space<vmem>>, vector<16x64xbf16>
    %c0_59 = arith.constant 0 : index
    %c0_60 = arith.constant 0 : index
    %203 = vector.load %arg10[%c0_59, %c0_60] : memref<64x64xbf16, #tpu.memory_space<vmem>>, vector<64x64xbf16>
    %cst_61 = arith.constant dense<0.000000e+00> : vector<16x64xf32>
    %204 = tpu.matmul %202, %203, %cst_61 {dimension_numbers = #tpu.dot_dimension_numbers<[1], [0], [0], [1], [0, 0, 1, 1], [], []>} : vector<16x64xbf16>, vector<64x64xbf16>, vector<16x64xf32> -> vector<16x64xf32>
    %c0_62 = arith.constant 0 : index
    %c0_63 = arith.constant 0 : index
    %205 = vector.load %arg11[%c0_62, %c0_63] : memref<1x64xf32, #tpu.memory_space<vmem>>, vector<1x64xf32>
    %206 = vector.broadcast %205 : vector<1x64xf32> to vector<16x64xf32>
    %207 = arith.addf %204, %206 : vector<16x64xf32>
    %208 = arith.addf %40, %207 : vector<16x64xf32>
    %c0_64 = arith.constant 0 : index
    %c0_65 = arith.constant 0 : index
    %209 = vector.load %arg12[%c0_64, %c0_65] : memref<1x64xf32, #tpu.memory_space<vmem>>, vector<1x64xf32>
    %210 = arith.mulf %208, %208 : vector<16x64xf32>
    %cst_66 = arith.constant dense<0.000000e+00> : vector<16xf32>
    %211 = vector.multi_reduction <add>, %210, %cst_66 [1] : vector<16x64xf32> to vector<16xf32>
    %212 = vector.shape_cast %211 : vector<16xf32> to vector<16x1xf32>
    %cst_67 = arith.constant 6.400000e+01 : f32
    %213 = vector.broadcast %cst_67 : f32 to vector<16x1xf32>
    %214 = arith.divf %212, %213 : vector<16x1xf32>
    %cst_68 = arith.constant 9.99999993E-9 : f32
    %215 = vector.broadcast %cst_68 : f32 to vector<16x1xf32>
    %216 = arith.addf %214, %215 : vector<16x1xf32>
    %217 = math.rsqrt %216 : vector<16x1xf32>
    %218 = vector.broadcast %217 : vector<16x1xf32> to vector<16x64xf32>
    %219 = arith.mulf %208, %218 : vector<16x64xf32>
    %220 = vector.broadcast %209 : vector<1x64xf32> to vector<16x64xf32>
    %221 = arith.mulf %220, %219 : vector<16x64xf32>
    %222 = arith.truncf %221 : vector<16x64xf32> to vector<16x64xbf16>
    %c0_69 = arith.constant 0 : index
    %c0_70 = arith.constant 0 : index
    %223 = vector.load %arg13[%c0_69, %c0_70] : memref<64x256xbf16, #tpu.memory_space<vmem>>, vector<64x256xbf16>
    %cst_71 = arith.constant dense<0.000000e+00> : vector<16x256xf32>
    %224 = tpu.matmul %222, %223, %cst_71 {dimension_numbers = #tpu.dot_dimension_numbers<[1], [0], [0], [1], [0, 0, 1, 1], [], []>} : vector<16x64xbf16>, vector<64x256xbf16>, vector<16x256xf32> -> vector<16x256xf32>
    %c0_72 = arith.constant 0 : index
    %c0_73 = arith.constant 0 : index
    %225 = vector.load %arg14[%c0_72, %c0_73] : memref<1x256xf32, #tpu.memory_space<vmem>>, vector<1x256xf32>
    %226 = vector.broadcast %225 : vector<1x256xf32> to vector<16x256xf32>
    %227 = arith.addf %224, %226 : vector<16x256xf32>
    %228 = vector.extract_strided_slice %227 {offsets = [0, 0], sizes = [16, 128], strides = [1, 1]} : vector<16x256xf32> to vector<16x128xf32>
    %229 = vector.extract_strided_slice %227 {offsets = [0, 128], sizes = [16, 128], strides = [1, 1]} : vector<16x256xf32> to vector<16x128xf32>
    %230 = arith.negf %228 : vector<16x128xf32>
    %231 = math.exp %230 : vector<16x128xf32>
    %cst_74 = arith.constant 1.000000e+00 : f32
    %232 = vector.broadcast %cst_74 : f32 to vector<16x128xf32>
    %233 = arith.addf %232, %231 : vector<16x128xf32>
    %234 = arith.divf %232, %233 : vector<16x128xf32>
    %235 = arith.mulf %228, %234 : vector<16x128xf32>
    %236 = arith.mulf %235, %229 : vector<16x128xf32>
    %237 = arith.truncf %236 : vector<16x128xf32> to vector<16x128xbf16>
    %c0_75 = arith.constant 0 : index
    %c0_76 = arith.constant 0 : index
    %238 = vector.load %arg15[%c0_75, %c0_76] : memref<128x64xbf16, #tpu.memory_space<vmem>>, vector<128x64xbf16>
    %cst_77 = arith.constant dense<0.000000e+00> : vector<16x64xf32>
    %239 = tpu.matmul %237, %238, %cst_77 {dimension_numbers = #tpu.dot_dimension_numbers<[1], [0], [0], [1], [0, 0, 1, 1], [], []>} : vector<16x128xbf16>, vector<128x64xbf16>, vector<16x64xf32> -> vector<16x64xf32>
    %c0_78 = arith.constant 0 : index
    %c0_79 = arith.constant 0 : index
    %240 = vector.load %arg16[%c0_78, %c0_79] : memref<1x64xf32, #tpu.memory_space<vmem>>, vector<1x64xf32>
    %241 = vector.broadcast %240 : vector<1x64xf32> to vector<16x64xf32>
    %242 = arith.addf %239, %241 : vector<16x64xf32>
    %243 = arith.addf %208, %242 : vector<16x64xf32>
    %244 = vector.shape_cast %243 : vector<16x64xf32> to vector<2x8x64xf32>
    %c0_80 = arith.constant 0 : index
    %c0_81 = arith.constant 0 : index
    %c0_82 = arith.constant 0 : index
    %245 = vector.load %arg19[%c0_80, %c0_81, %c0_82] : memref<2x8x64xf32, #tpu.memory_space<vmem>>, vector<2x8x64xf32>
    tpu.vector_store %arg19[%c0_80, %c0_81, %c0_82], %244 {strides = array<i32>} : memref<2x8x64xf32, #tpu.memory_space<vmem>>, vector<2x8x64xf32>,
    return
  }
  func.func @transform_0(%arg0: i32) -> (i32, i32, i32) {
    %c0_i32 = arith.constant 0 : i32
    %c0_i32_0 = arith.constant 0 : i32
    %c0_i32_1 = arith.constant 0 : i32
    return %arg0, %c0_i32, %c0_i32_0 : i32, i32, i32
  }
  func.func @transform_1(%arg0: i32) -> (i32, i32, i32) {
    %c0_i32 = arith.constant 0 : i32
    %c0_i32_0 = arith.constant 0 : i32
    %c0_i32_1 = arith.constant 0 : i32
    return %arg0, %c0_i32, %c0_i32_0 : i32, i32, i32
  }
  func.func @transform_2(%arg0: i32) -> (i32, i32) {
    %c0_i32 = arith.constant 0 : i32
    %c0_i32_0 = arith.constant 0 : i32
    %c0_i32_1 = arith.constant 0 : i32
    return %c0_i32, %c0_i32_0 : i32, i32
  }
  func.func @transform_3(%arg0: i32) -> (i32, i32) {
    %c0_i32 = arith.constant 0 : i32
    %c0_i32_0 = arith.constant 0 : i32
    %c0_i32_1 = arith.constant 0 : i32
    return %c0_i32, %c0_i32_0 : i32, i32
  }
  func.func @transform_4(%arg0: i32) -> (i32, i32) {
    %c0_i32 = arith.constant 0 : i32
    %c0_i32_0 = arith.constant 0 : i32
    %c0_i32_1 = arith.constant 0 : i32
    return %c0_i32, %c0_i32_0 : i32, i32
  }
  func.func @transform_5(%arg0: i32) -> (i32, i32) {
    %c0_i32 = arith.constant 0 : i32
    %c0_i32_0 = arith.constant 0 : i32
    %c0_i32_1 = arith.constant 0 : i32
    return %c0_i32, %c0_i32_0 : i32, i32
  }
  func.func @transform_6(%arg0: i32) -> (i32, i32) {
    %c0_i32 = arith.constant 0 : i32
    %c0_i32_0 = arith.constant 0 : i32
    %c0_i32_1 = arith.constant 0 : i32
    return %c0_i32, %c0_i32_0 : i32, i32
  }
  func.func @transform_7(%arg0: i32) -> (i32, i32) {
    %c0_i32 = arith.constant 0 : i32
    %c0_i32_0 = arith.constant 0 : i32
    %c0_i32_1 = arith.constant 0 : i32
    return %c0_i32, %c0_i32_0 : i32, i32
  }
  func.func @transform_8(%arg0: i32) -> (i32, i32) {
    %c0_i32 = arith.constant 0 : i32
    %c0_i32_0 = arith.constant 0 : i32
    %c0_i32_1 = arith.constant 0 : i32
    return %c0_i32, %c0_i32_0 : i32, i32
  }
  func.func @transform_9(%arg0: i32) -> (i32, i32) {
    %c0_i32 = arith.constant 0 : i32
    %c0_i32_0 = arith.constant 0 : i32
    %c0_i32_1 = arith.constant 0 : i32
    return %c0_i32, %c0_i32_0 : i32, i32
  }
  func.func @transform_10(%arg0: i32) -> (i32, i32) {
    %c0_i32 = arith.constant 0 : i32
    %c0_i32_0 = arith.constant 0 : i32
    %c0_i32_1 = arith.constant 0 : i32
    return %c0_i32, %c0_i32_0 : i32, i32
  }
  func.func @transform_11(%arg0: i32) -> (i32, i32) {
    %c0_i32 = arith.constant 0 : i32
    %c0_i32_0 = arith.constant 0 : i32
    %c0_i32_1 = arith.constant 0 : i32
    return %c0_i32, %c0_i32_0 : i32, i32
  }
  func.func @transform_12(%arg0: i32) -> (i32, i32) {
    %c0_i32 = arith.constant 0 : i32
    %c0_i32_0 = arith.constant 0 : i32
    %c0_i32_1 = arith.constant 0 : i32
    return %c0_i32, %c0_i32_0 : i32, i32
  }
  func.func @transform_13(%arg0: i32) -> (i32, i32) {
    %c0_i32 = arith.constant 0 : i32
    %c0_i32_0 = arith.constant 0 : i32
    %c0_i32_1 = arith.constant 0 : i32
    return %c0_i32, %c0_i32_0 : i32, i32
  }
  func.func @transform_14(%arg0: i32) -> (i32, i32) {
    %c0_i32 = arith.constant 0 : i32
    %c0_i32_0 = arith.constant 0 : i32
    %c0_i32_1 = arith.constant 0 : i32
    return %c0_i32, %c0_i32_0 : i32, i32
  }
  func.func @transform_15(%arg0: i32) -> (i32, i32) {
    %c0_i32 = arith.constant 0 : i32
    %c0_i32_0 = arith.constant 0 : i32
    %c0_i32_1 = arith.constant 0 : i32
    return %c0_i32, %c0_i32_0 : i32, i32
  }
  func.func @transform_16(%arg0: i32) -> (i32, i32) {
    %c0_i32 = arith.constant 0 : i32
    %c0_i32_0 = arith.constant 0 : i32
    %c0_i32_1 = arith.constant 0 : i32
    return %c0_i32, %c0_i32_0 : i32, i32
  }
  func.func @transform_17(%arg0: i32) -> (i32, i32) {
    %c0_i32 = arith.constant 0 : i32
    %c0_i32_0 = arith.constant 0 : i32
    %c0_i32_1 = arith.constant 0 : i32
    return %c0_i32, %c0_i32_0 : i32, i32
  }
  func.func @transform_18(%arg0: i32) -> (i32, i32, i32) {
    %c0_i32 = arith.constant 0 : i32
    %c0_i32_0 = arith.constant 0 : i32
    %c0_i32_1 = arith.constant 0 : i32
    return %arg0, %c0_i32, %c0_i32_0 : i32, i32, i32
  }
}

module attributes {stable_mosaic.version = 11 : i64} {
  func.func @mtp_sub_kernel(%arg0: i32, %arg1: memref<2x8x64xbf16, #tpu.memory_space<vmem>>, %arg2: memref<2x8x64xbf16, #tpu.memory_space<vmem>>, %arg3: memref<1x64xf32, #tpu.memory_space<vmem>>, %arg4: memref<64x64xbf16, #tpu.memory_space<vmem>>, %arg5: memref<64x64xbf16, #tpu.memory_space<vmem>>, %arg6: memref<1x64xf32, #tpu.memory_space<vmem>>, %arg7: memref<1x64xf32, #tpu.memory_space<vmem>>, %arg8: memref<64x224xbf16, #tpu.memory_space<vmem>>, %arg9: memref<1x224xf32, #tpu.memory_space<vmem>>, %arg10: memref<64x64xbf16, #tpu.memory_space<vmem>>, %arg11: memref<1x64xf32, #tpu.memory_space<vmem>>, %arg12: memref<1x64xf32, #tpu.memory_space<vmem>>, %arg13: memref<64x256xbf16, #tpu.memory_space<vmem>>, %arg14: memref<1x256xf32, #tpu.memory_space<vmem>>, %arg15: memref<128x64xbf16, #tpu.memory_space<vmem>>, %arg16: memref<1x64xf32, #tpu.memory_space<vmem>>, %arg17: memref<8x16xf32, #tpu.memory_space<vmem>>, %arg18: memref<8x16xf32, #tpu.memory_space<vmem>>, %arg19: memref<2x8x64xf32, #tpu.memory_space<vmem>>, %arg20: memref<16x64xbf16, #tpu.memory_space<vmem>>) attributes {dimension_semantics = [#tpu.dimension_semantics<parallel>], iteration_bounds = array<i64: 1>, scalar_prefetch = 0 : i64, scratch_operands = 1 : i64, tpu.core_type = #tpu.core_type<tc>, window_params = [{transform_indices = @transform_0, window_bounds = array<i64: 2, 8, 64>}, {transform_indices = @transform_1, window_bounds = array<i64: 2, 8, 64>}, {pipeline_mode = #tpu.pipeline_mode<synchronous>, transform_indices = @transform_2, window_bounds = array<i64: 1, 64>}, {pipeline_mode = #tpu.pipeline_mode<synchronous>, transform_indices = @transform_3, window_bounds = array<i64: 64, 64>}, {pipeline_mode = #tpu.pipeline_mode<synchronous>, transform_indices = @transform_4, window_bounds = array<i64: 64, 64>}, {pipeline_mode = #tpu.pipeline_mode<synchronous>, transform_indices = @transform_5, window_bounds = array<i64: 1, 64>}, {pipeline_mode = #tpu.pipeline_mode<synchronous>, transform_indices = @transform_6, window_bounds = array<i64: 1, 64>}, {pipeline_mode = #tpu.pipeline_mode<synchronous>, transform_indices = @transform_7, window_bounds = array<i64: 64, 224>}, {pipeline_mode = #tpu.pipeline_mode<synchronous>, transform_indices = @transform_8, window_bounds = array<i64: 1, 224>}, {pipeline_mode = #tpu.pipeline_mode<synchronous>, transform_indices = @transform_9, window_bounds = array<i64: 64, 64>}, {pipeline_mode = #tpu.pipeline_mode<synchronous>, transform_indices = @transform_10, window_bounds = array<i64: 1, 64>}, {pipeline_mode = #tpu.pipeline_mode<synchronous>, transform_indices = @transform_11, window_bounds = array<i64: 1, 64>}, {pipeline_mode = #tpu.pipeline_mode<synchronous>, transform_indices = @transform_12, window_bounds = array<i64: 64, 256>}, {pipeline_mode = #tpu.pipeline_mode<synchronous>, transform_indices = @transform_13, window_bounds = array<i64: 1, 256>}, {pipeline_mode = #tpu.pipeline_mode<synchronous>, transform_indices = @transform_14, window_bounds = array<i64: 128, 64>}, {pipeline_mode = #tpu.pipeline_mode<synchronous>, transform_indices = @transform_15, window_bounds = array<i64: 1, 64>}, {pipeline_mode = #tpu.pipeline_mode<synchronous>, transform_indices = @transform_16, window_bounds = array<i64: 8, 16>}, {pipeline_mode = #tpu.pipeline_mode<synchronous>, transform_indices = @transform_17, window_bounds = array<i64: 8, 16>}, {transform_indices = @transform_18, window_bounds = array<i64: 2, 8, 64>}]} {
    %c0 = arith.constant 0 : index
    %c0_0 = arith.constant 0 : index
    %c0_1 = arith.constant 0 : index
    %0 = vector.load %arg1[%c0, %c0_0, %c0_1] : memref<2x8x64xbf16, #tpu.memory_space<vmem>>, vector<2x8x64xbf16>
    %1 = arith.extf %0 : vector<2x8x64xbf16> to vector<2x8x64xf32>
    %2 = vector.shape_cast %1 : vector<2x8x64xf32> to vector<16x64xf32>
    %c0_2 = arith.constant 0 : index
    %c0_3 = arith.constant 0 : index
    %c0_4 = arith.constant 0 : index
    %3 = vector.load %arg2[%c0_2, %c0_3, %c0_4] : memref<2x8x64xbf16, #tpu.memory_space<vmem>>, vector<2x8x64xbf16>
    %4 = arith.extf %3 : vector<2x8x64xbf16> to vector<2x8x64xf32>
    %5 = vector.shape_cast %4 : vector<2x8x64xf32> to vector<16x64xf32>
    %c0_5 = arith.constant 0 : index
    %c0_6 = arith.constant 0 : index
    %6 = vector.load %arg3[%c0_5, %c0_6] : memref<1x64xf32, #tpu.memory_space<vmem>>, vector<1x64xf32>
    %7 = arith.mulf %2, %2 : vector<16x64xf32>
    %cst = arith.constant dense<0.000000e+00> : vector<16xf32>
    %8 = vector.multi_reduction <add>, %7, %cst [1] : vector<16x64xf32> to vector<16xf32>
    %9 = vector.shape_cast %8 : vector<16xf32> to vector<16x1xf32>
    %cst_7 = arith.constant 6.400000e+01 : f32
    %10 = vector.broadcast %cst_7 : f32 to vector<16x1xf32>
    %11 = arith.divf %9, %10 : vector<16x1xf32>
    %cst_8 = arith.constant 9.99999993E-9 : f32
    %12 = vector.broadcast %cst_8 : f32 to vector<16x1xf32>
    %13 = arith.addf %11, %12 : vector<16x1xf32>
    %14 = math.rsqrt %13 : vector<16x1xf32>
    %15 = vector.broadcast %14 : vector<16x1xf32> to vector<16x64xf32>
    %16 = arith.mulf %2, %15 : vector<16x64xf32>
    %17 = vector.broadcast %6 : vector<1x64xf32> to vector<16x64xf32>
    %18 = arith.mulf %17, %16 : vector<16x64xf32>
    %19 = arith.truncf %18 : vector<16x64xf32> to vector<16x64xbf16>
    %c0_9 = arith.constant 0 : index
    %c0_10 = arith.constant 0 : index
    %20 = vector.load %arg4[%c0_9, %c0_10] : memref<64x64xbf16, #tpu.memory_space<vmem>>, vector<64x64xbf16>
    %cst_11 = arith.constant dense<0.000000e+00> : vector<16x64xf32>
    %21 = tpu.matmul %19, %20, %cst_11 {dimension_numbers = #tpu.dot_dimension_numbers<[1], [0], [0], [1], [0, 0, 1, 1], [], []>} : vector<16x64xbf16>, vector<64x64xbf16>, vector<16x64xf32> -> vector<16x64xf32>
    %22 = arith.mulf %5, %5 : vector<16x64xf32>
    %cst_12 = arith.constant dense<0.000000e+00> : vector<16xf32>
    %23 = vector.multi_reduction <add>, %22, %cst_12 [1] : vector<16x64xf32> to vector<16xf32>
    %24 = vector.shape_cast %23 : vector<16xf32> to vector<16x1xf32>
    %cst_13 = arith.constant 6.400000e+01 : f32
    %25 = vector.broadcast %cst_13 : f32 to vector<16x1xf32>
    %26 = arith.divf %24, %25 : vector<16x1xf32>
    %cst_14 = arith.constant 9.99999993E-9 : f32
    %27 = vector.broadcast %cst_14 : f32 to vector<16x1xf32>
    %28 = arith.addf %26, %27 : vector<16x1xf32>
    %29 = math.rsqrt %28 : vector<16x1xf32>
    %30 = vector.broadcast %29 : vector<16x1xf32> to vector<16x64xf32>
    %31 = arith.mulf %5, %30 : vector<16x64xf32>
    %32 = vector.broadcast %6 : vector<1x64xf32> to vector<16x64xf32>
    %33 = arith.mulf %32, %31 : vector<16x64xf32>
    %34 = arith.truncf %33 : vector<16x64xf32> to vector<16x64xbf16>
    %c0_15 = arith.constant 0 : index
    %c0_16 = arith.constant 0 : index
    %35 = vector.load %arg5[%c0_15, %c0_16] : memref<64x64xbf16, #tpu.memory_space<vmem>>, vector<64x64xbf16>
    %cst_17 = arith.constant dense<0.000000e+00> : vector<16x64xf32>
    %36 = tpu.matmul %34, %35, %cst_17 {dimension_numbers = #tpu.dot_dimension_numbers<[1], [0], [0], [1], [0, 0, 1, 1], [], []>} : vector<16x64xbf16>, vector<64x64xbf16>, vector<16x64xf32> -> vector<16x64xf32>
    %37 = arith.addf %21, %36 : vector<16x64xf32>
    %c0_18 = arith.constant 0 : index
    %c0_19 = arith.constant 0 : index
    %38 = vector.load %arg6[%c0_18, %c0_19] : memref<1x64xf32, #tpu.memory_space<vmem>>, vector<1x64xf32>
    %39 = vector.broadcast %38 : vector<1x64xf32> to vector<16x64xf32>
    %40 = arith.addf %37, %39 : vector<16x64xf32>
    %c0_20 = arith.constant 0 : index
    %c0_21 = arith.constant 0 : index
    %41 = vector.load %arg7[%c0_20, %c0_21] : memref<1x64xf32, #tpu.memory_space<vmem>>, vector<1x64xf32>
    %42 = arith.mulf %40, %40 : vector<16x64xf32>
    %cst_22 = arith.constant dense<0.000000e+00> : vector<16xf32>
    %43 = vector.multi_reduction <add>, %42, %cst_22 [1] : vector<16x64xf32> to vector<16xf32>
    %44 = vector.shape_cast %43 : vector<16xf32> to vector<16x1xf32>
    %cst_23 = arith.constant 6.400000e+01 : f32
    %45 = vector.broadcast %cst_23 : f32 to vector<16x1xf32>
    %46 = arith.divf %44, %45 : vector<16x1xf32>
    %cst_24 = arith.constant 9.99999993E-9 : f32
    %47 = vector.broadcast %cst_24 : f32 to vector<16x1xf32>
    %48 = arith.addf %46, %47 : vector<16x1xf32>
    %49 = math.rsqrt %48 : vector<16x1xf32>
    %50 = vector.broadcast %49 : vector<16x1xf32> to vector<16x64xf32>
    %51 = arith.mulf %40, %50 : vector<16x64xf32>
    %52 = vector.broadcast %41 : vector<1x64xf32> to vector<16x64xf32>
    %53 = arith.mulf %52, %51 : vector<16x64xf32>
    %54 = arith.truncf %53 : vector<16x64xf32> to vector<16x64xbf16>
    %c0_25 = arith.constant 0 : index
    %c0_26 = arith.constant 0 : index
    %55 = vector.load %arg8[%c0_25, %c0_26] : memref<64x224xbf16, #tpu.memory_space<vmem>>, vector<64x224xbf16>
    %cst_27 = arith.constant dense<0.000000e+00> : vector<16x224xf32>
    %56 = tpu.matmul %54, %55, %cst_27 {dimension_numbers = #tpu.dot_dimension_numbers<[1], [0], [0], [1], [0, 0, 1, 1], [], []>} : vector<16x64xbf16>, vector<64x224xbf16>, vector<16x224xf32> -> vector<16x224xf32>
    %c0_28 = arith.constant 0 : index
    %c0_29 = arith.constant 0 : index
    %57 = vector.load %arg9[%c0_28, %c0_29] : memref<1x224xf32, #tpu.memory_space<vmem>>, vector<1x224xf32>
    %58 = vector.broadcast %57 : vector<1x224xf32> to vector<16x224xf32>
    %59 = arith.addf %56, %58 : vector<16x224xf32>
    %60 = vector.extract_strided_slice %59 {offsets = [0, 0], sizes = [16, 64], strides = [1, 1]} : vector<16x224xf32> to vector<16x64xf32>
    %61 = vector.extract_strided_slice %59 {offsets = [0, 64], sizes = [16, 64], strides = [1, 1]} : vector<16x224xf32> to vector<16x64xf32>
    %62 = vector.extract_strided_slice %59 {offsets = [0, 128], sizes = [16, 32], strides = [1, 1]} : vector<16x224xf32> to vector<16x32xf32>
    %63 = vector.extract_strided_slice %59 {offsets = [0, 160], sizes = [16, 32], strides = [1, 1]} : vector<16x224xf32> to vector<16x32xf32>
    %64 = vector.extract_strided_slice %59 {offsets = [0, 192], sizes = [16, 32], strides = [1, 1]} : vector<16x224xf32> to vector<16x32xf32>
    %c0_30 = arith.constant 0 : index
    %c0_31 = arith.constant 0 : index
    %65 = vector.load %arg17[%c0_30, %c0_31] : memref<8x16xf32, #tpu.memory_space<vmem>>, vector<8x16xf32>
    %66 = vector.shape_cast %65 : vector<8x16xf32> to vector<1x8x16xf32>
    %67 = vector.shape_cast %66 : vector<1x8x16xf32> to vector<1x8x16xf32>
    %68 = vector.broadcast %67 : vector<1x8x16xf32> to vector<2x8x16xf32>
    %69 = vector.shape_cast %68 : vector<2x8x16xf32> to vector<16x16xf32>
    %c0_32 = arith.constant 0 : index
    %c0_33 = arith.constant 0 : index
    %70 = vector.load %arg18[%c0_32, %c0_33] : memref<8x16xf32, #tpu.memory_space<vmem>>, vector<8x16xf32>
    %71 = vector.shape_cast %70 : vector<8x16xf32> to vector<1x8x16xf32>
    %72 = vector.shape_cast %71 : vector<1x8x16xf32> to vector<1x8x16xf32>
    %73 = vector.broadcast %72 : vector<1x8x16xf32> to vector<2x8x16xf32>
    %74 = vector.shape_cast %73 : vector<2x8x16xf32> to vector<16x16xf32>
    %75 = tpu.iota {dimensions = array<i32: 0>} : vector<8x8xi32>
    %76 = tpu.iota {dimensions = array<i32: 1>} : vector<8x8xi32>
    %77 = arith.cmpi sge, %75, %76 : vector<8x8xi32>
    %cst_34 = arith.constant 0.000000e+00 : f32
    %cst_35 = arith.constant -1.000000e+30 : f32
    %78 = vector.broadcast %cst_34 : f32 to vector<8x8xf32>
    %79 = vector.broadcast %cst_35 : f32 to vector<8x8xf32>
    %80 = arith.select %77, %78, %79 : vector<8x8xi1>, vector<8x8xf32>
    %81 = vector.shape_cast %80 : vector<8x8xf32> to vector<1x8x8xf32>
    %82 = vector.extract_strided_slice %62 {offsets = [0, 0], sizes = [16, 16], strides = [1, 1]} : vector<16x32xf32> to vector<16x16xf32>
    %83 = arith.mulf %82, %69 : vector<16x16xf32>
    %84 = vector.extract_strided_slice %63 {offsets = [0, 0], sizes = [16, 16], strides = [1, 1]} : vector<16x32xf32> to vector<16x16xf32>
    %85 = arith.mulf %84, %74 : vector<16x16xf32>
    %86 = arith.addf %83, %85 : vector<16x16xf32>
    %87 = arith.truncf %86 : vector<16x16xf32> to vector<16x16xbf16>
    %88 = vector.shape_cast %87 : vector<16x16xbf16> to vector<2x8x16xbf16>
    %89 = vector.extract_strided_slice %64 {offsets = [0, 0], sizes = [16, 16], strides = [1, 1]} : vector<16x32xf32> to vector<16x16xf32>
    %90 = arith.truncf %89 : vector<16x16xf32> to vector<16x16xbf16>
    %91 = vector.shape_cast %90 : vector<16x16xbf16> to vector<2x8x16xbf16>
    %92 = vector.extract_strided_slice %60 {offsets = [0, 0], sizes = [16, 16], strides = [1, 1]} : vector<16x64xf32> to vector<16x16xf32>
    %93 = arith.mulf %92, %69 : vector<16x16xf32>
    %94 = vector.extract_strided_slice %61 {offsets = [0, 0], sizes = [16, 16], strides = [1, 1]} : vector<16x64xf32> to vector<16x16xf32>
    %95 = arith.mulf %94, %74 : vector<16x16xf32>
    %96 = arith.addf %93, %95 : vector<16x16xf32>
    %97 = arith.truncf %96 : vector<16x16xf32> to vector<16x16xbf16>
    %98 = vector.shape_cast %97 : vector<16x16xbf16> to vector<2x8x16xbf16>
    "tpu.trace_start"() <{level = 10 : i32, message = "bqd,bkd->bqk"}> : () -> ()
    %cst_36 = arith.constant dense<0.000000e+00> : vector<2x8x8xf32>
    %99 = tpu.matmul %98, %88, %cst_36 {dimension_numbers = #tpu.dot_dimension_numbers<[2], [2], [1], [1], [0, 0, 0, 1, 1, 1], [0], [0]>} : vector<2x8x16xbf16>, vector<2x8x16xbf16>, vector<2x8x8xf32> -> vector<2x8x8xf32>
    "tpu.trace_stop"() : () -> ()
    %100 = vector.broadcast %81 : vector<1x8x8xf32> to vector<2x8x8xf32>
    %101 = arith.addf %99, %100 : vector<2x8x8xf32>
    %cst_37 = arith.constant dense<0xFF800000> : vector<2x8xf32>
    %102 = vector.multi_reduction <maximumf>, %101, %cst_37 [2] : vector<2x8x8xf32> to vector<2x8xf32>
    %103 = vector.shape_cast %102 : vector<2x8xf32> to vector<2x8x1xf32>
    %104 = vector.broadcast %103 : vector<2x8x1xf32> to vector<2x8x8xf32>
    %105 = arith.subf %101, %104 : vector<2x8x8xf32>
    %106 = math.exp %105 : vector<2x8x8xf32>
    %cst_38 = arith.constant dense<0.000000e+00> : vector<2x8xf32>
    %107 = vector.multi_reduction <add>, %106, %cst_38 [2] : vector<2x8x8xf32> to vector<2x8xf32>
    %108 = vector.shape_cast %107 : vector<2x8xf32> to vector<2x8x1xf32>
    %109 = tpu.reciprocal %108 {approx = true} : vector<2x8x1xf32> -> vector<2x8x1xf32>
    %110 = vector.broadcast %109 : vector<2x8x1xf32> to vector<2x8x8xf32>
    %111 = arith.mulf %106, %110 : vector<2x8x8xf32>
    %112 = arith.truncf %111 : vector<2x8x8xf32> to vector<2x8x8xbf16>
    "tpu.trace_start"() <{level = 10 : i32, message = "bqk,bkd->bqd"}> : () -> ()
    %cst_39 = arith.constant dense<0.000000e+00> : vector<2x8x16xf32>
    %113 = tpu.matmul %112, %91, %cst_39 {dimension_numbers = #tpu.dot_dimension_numbers<[2], [1], [1], [2], [0, 0, 0, 1, 1, 2], [0], [0]>} : vector<2x8x8xbf16>, vector<2x8x16xbf16>, vector<2x8x16xf32> -> vector<2x8x16xf32>
    "tpu.trace_stop"() : () -> ()
    %114 = vector.shape_cast %113 : vector<2x8x16xf32> to vector<16x16xf32>
    %115 = arith.truncf %114 : vector<16x16xf32> to vector<16x16xbf16>
    %c0_40 = arith.constant 0 : index
    %c0_41 = arith.constant 0 : index
    %116 = vector.load %arg20[%c0_40, %c0_41] : memref<16x64xbf16, #tpu.memory_space<vmem>>, vector<16x16xbf16>
    tpu.vector_store %arg20[%c0_40, %c0_41], %115 {strides = array<i32>} : memref<16x64xbf16, #tpu.memory_space<vmem>>, vector<16x16xbf16>,
    %117 = vector.extract_strided_slice %60 {offsets = [0, 16], sizes = [16, 16], strides = [1, 1]} : vector<16x64xf32> to vector<16x16xf32>
    %118 = arith.mulf %117, %69 : vector<16x16xf32>
    %119 = vector.extract_strided_slice %61 {offsets = [0, 16], sizes = [16, 16], strides = [1, 1]} : vector<16x64xf32> to vector<16x16xf32>
    %120 = arith.mulf %119, %74 : vector<16x16xf32>
    %121 = arith.addf %118, %120 : vector<16x16xf32>
    %122 = arith.truncf %121 : vector<16x16xf32> to vector<16x16xbf16>
    %123 = vector.shape_cast %122 : vector<16x16xbf16> to vector<2x8x16xbf16>
    "tpu.trace_start"() <{level = 10 : i32, message = "bqd,bkd->bqk"}> : () -> ()
    %cst_42 = arith.constant dense<0.000000e+00> : vector<2x8x8xf32>
    %124 = tpu.matmul %123, %88, %cst_42 {dimension_numbers = #tpu.dot_dimension_numbers<[2], [2], [1], [1], [0, 0, 0, 1, 1, 1], [0], [0]>} : vector<2x8x16xbf16>, vector<2x8x16xbf16>, vector<2x8x8xf32> -> vector<2x8x8xf32>
    "tpu.trace_stop"() : () -> ()
    %125 = vector.broadcast %81 : vector<1x8x8xf32> to vector<2x8x8xf32>
    %126 = arith.addf %124, %125 : vector<2x8x8xf32>
    %cst_43 = arith.constant dense<0xFF800000> : vector<2x8xf32>
    %127 = vector.multi_reduction <maximumf>, %126, %cst_43 [2] : vector<2x8x8xf32> to vector<2x8xf32>
    %128 = vector.shape_cast %127 : vector<2x8xf32> to vector<2x8x1xf32>
    %129 = vector.broadcast %128 : vector<2x8x1xf32> to vector<2x8x8xf32>
    %130 = arith.subf %126, %129 : vector<2x8x8xf32>
    %131 = math.exp %130 : vector<2x8x8xf32>
    %cst_44 = arith.constant dense<0.000000e+00> : vector<2x8xf32>
    %132 = vector.multi_reduction <add>, %131, %cst_44 [2] : vector<2x8x8xf32> to vector<2x8xf32>
    %133 = vector.shape_cast %132 : vector<2x8xf32> to vector<2x8x1xf32>
    %134 = tpu.reciprocal %133 {approx = true} : vector<2x8x1xf32> -> vector<2x8x1xf32>
    %135 = vector.broadcast %134 : vector<2x8x1xf32> to vector<2x8x8xf32>
    %136 = arith.mulf %131, %135 : vector<2x8x8xf32>
    %137 = arith.truncf %136 : vector<2x8x8xf32> to vector<2x8x8xbf16>
    "tpu.trace_start"() <{level = 10 : i32, message = "bqk,bkd->bqd"}> : () -> ()
    %cst_45 = arith.constant dense<0.000000e+00> : vector<2x8x16xf32>
    %138 = tpu.matmul %137, %91, %cst_45 {dimension_numbers = #tpu.dot_dimension_numbers<[2], [1], [1], [2], [0, 0, 0, 1, 1, 2], [0], [0]>} : vector<2x8x8xbf16>, vector<2x8x16xbf16>, vector<2x8x16xf32> -> vector<2x8x16xf32>
    "tpu.trace_stop"() : () -> ()
    %139 = vector.shape_cast %138 : vector<2x8x16xf32> to vector<16x16xf32>
    %140 = arith.truncf %139 : vector<16x16xf32> to vector<16x16xbf16>
    %c0_46 = arith.constant 0 : index
    %c16 = arith.constant 16 : index
    %141 = vector.load %arg20[%c0_46, %c16] : memref<16x64xbf16, #tpu.memory_space<vmem>>, vector<16x16xbf16>
    tpu.vector_store %arg20[%c0_46, %c16], %140 {strides = array<i32>} : memref<16x64xbf16, #tpu.memory_space<vmem>>, vector<16x16xbf16>,
    %142 = vector.extract_strided_slice %62 {offsets = [0, 16], sizes = [16, 16], strides = [1, 1]} : vector<16x32xf32> to vector<16x16xf32>
    %143 = arith.mulf %142, %69 : vector<16x16xf32>
    %144 = vector.extract_strided_slice %63 {offsets = [0, 16], sizes = [16, 16], strides = [1, 1]} : vector<16x32xf32> to vector<16x16xf32>
    %145 = arith.mulf %144, %74 : vector<16x16xf32>
    %146 = arith.addf %143, %145 : vector<16x16xf32>
    %147 = arith.truncf %146 : vector<16x16xf32> to vector<16x16xbf16>
    %148 = vector.shape_cast %147 : vector<16x16xbf16> to vector<2x8x16xbf16>
    %149 = vector.extract_strided_slice %64 {offsets = [0, 16], sizes = [16, 16], strides = [1, 1]} : vector<16x32xf32> to vector<16x16xf32>
    %150 = arith.truncf %149 : vector<16x16xf32> to vector<16x16xbf16>
    %151 = vector.shape_cast %150 : vector<16x16xbf16> to vector<2x8x16xbf16>
    %152 = vector.extract_strided_slice %60 {offsets = [0, 32], sizes = [16, 16], strides = [1, 1]} : vector<16x64xf32> to vector<16x16xf32>
    %153 = arith.mulf %152, %69 : vector<16x16xf32>
    %154 = vector.extract_strided_slice %61 {offsets = [0, 32], sizes = [16, 16], strides = [1, 1]} : vector<16x64xf32> to vector<16x16xf32>
    %155 = arith.mulf %154, %74 : vector<16x16xf32>
    %156 = arith.addf %153, %155 : vector<16x16xf32>
    %157 = arith.truncf %156 : vector<16x16xf32> to vector<16x16xbf16>
    %158 = vector.shape_cast %157 : vector<16x16xbf16> to vector<2x8x16xbf16>
    "tpu.trace_start"() <{level = 10 : i32, message = "bqd,bkd->bqk"}> : () -> ()
    %cst_47 = arith.constant dense<0.000000e+00> : vector<2x8x8xf32>
    %159 = tpu.matmul %158, %148, %cst_47 {dimension_numbers = #tpu.dot_dimension_numbers<[2], [2], [1], [1], [0, 0, 0, 1, 1, 1], [0], [0]>} : vector<2x8x16xbf16>, vector<2x8x16xbf16>, vector<2x8x8xf32> -> vector<2x8x8xf32>
    "tpu.trace_stop"() : () -> ()
    %160 = vector.broadcast %81 : vector<1x8x8xf32> to vector<2x8x8xf32>
    %161 = arith.addf %159, %160 : vector<2x8x8xf32>
    %cst_48 = arith.constant dense<0xFF800000> : vector<2x8xf32>
    %162 = vector.multi_reduction <maximumf>, %161, %cst_48 [2] : vector<2x8x8xf32> to vector<2x8xf32>
    %163 = vector.shape_cast %162 : vector<2x8xf32> to vector<2x8x1xf32>
    %164 = vector.broadcast %163 : vector<2x8x1xf32> to vector<2x8x8xf32>
    %165 = arith.subf %161, %164 : vector<2x8x8xf32>
    %166 = math.exp %165 : vector<2x8x8xf32>
    %cst_49 = arith.constant dense<0.000000e+00> : vector<2x8xf32>
    %167 = vector.multi_reduction <add>, %166, %cst_49 [2] : vector<2x8x8xf32> to vector<2x8xf32>
    %168 = vector.shape_cast %167 : vector<2x8xf32> to vector<2x8x1xf32>
    %169 = tpu.reciprocal %168 {approx = true} : vector<2x8x1xf32> -> vector<2x8x1xf32>
    %170 = vector.broadcast %169 : vector<2x8x1xf32> to vector<2x8x8xf32>
    %171 = arith.mulf %166, %170 : vector<2x8x8xf32>
    %172 = arith.truncf %171 : vector<2x8x8xf32> to vector<2x8x8xbf16>
    "tpu.trace_start"() <{level = 10 : i32, message = "bqk,bkd->bqd"}> : () -> ()
    %cst_50 = arith.constant dense<0.000000e+00> : vector<2x8x16xf32>
    %173 = tpu.matmul %172, %151, %cst_50 {dimension_numbers = #tpu.dot_dimension_numbers<[2], [1], [1], [2], [0, 0, 0, 1, 1, 2], [0], [0]>} : vector<2x8x8xbf16>, vector<2x8x16xbf16>, vector<2x8x16xf32> -> vector<2x8x16xf32>
    "tpu.trace_stop"() : () -> ()
    %174 = vector.shape_cast %173 : vector<2x8x16xf32> to vector<16x16xf32>
    %175 = arith.truncf %174 : vector<16x16xf32> to vector<16x16xbf16>
    %c0_51 = arith.constant 0 : index
    %c32 = arith.constant 32 : index
    %176 = vector.load %arg20[%c0_51, %c32] : memref<16x64xbf16, #tpu.memory_space<vmem>>, vector<16x16xbf16>
    tpu.vector_store %arg20[%c0_51, %c32], %175 {strides = array<i32>} : memref<16x64xbf16, #tpu.memory_space<vmem>>, vector<16x16xbf16>,
    %177 = vector.extract_strided_slice %60 {offsets = [0, 48], sizes = [16, 16], strides = [1, 1]} : vector<16x64xf32> to vector<16x16xf32>
    %178 = arith.mulf %177, %69 : vector<16x16xf32>
    %179 = vector.extract_strided_slice %61 {offsets = [0, 48], sizes = [16, 16], strides = [1, 1]} : vector<16x64xf32> to vector<16x16xf32>
    %180 = arith.mulf %179, %74 : vector<16x16xf32>
    %181 = arith.addf %178, %180 : vector<16x16xf32>
    %182 = arith.truncf %181 : vector<16x16xf32> to vector<16x16xbf16>
    %183 = vector.shape_cast %182 : vector<16x16xbf16> to vector<2x8x16xbf16>
    "tpu.trace_start"() <{level = 10 : i32, message = "bqd,bkd->bqk"}> : () -> ()
    %cst_52 = arith.constant dense<0.000000e+00> : vector<2x8x8xf32>
    %184 = tpu.matmul %183, %148, %cst_52 {dimension_numbers = #tpu.dot_dimension_numbers<[2], [2], [1], [1], [0, 0, 0, 1, 1, 1], [0], [0]>} : vector<2x8x16xbf16>, vector<2x8x16xbf16>, vector<2x8x8xf32> -> vector<2x8x8xf32>
    "tpu.trace_stop"() : () -> ()
    %185 = vector.broadcast %81 : vector<1x8x8xf32> to vector<2x8x8xf32>
    %186 = arith.addf %184, %185 : vector<2x8x8xf32>
    %cst_53 = arith.constant dense<0xFF800000> : vector<2x8xf32>
    %187 = vector.multi_reduction <maximumf>, %186, %cst_53 [2] : vector<2x8x8xf32> to vector<2x8xf32>
    %188 = vector.shape_cast %187 : vector<2x8xf32> to vector<2x8x1xf32>
    %189 = vector.broadcast %188 : vector<2x8x1xf32> to vector<2x8x8xf32>
    %190 = arith.subf %186, %189 : vector<2x8x8xf32>
    %191 = math.exp %190 : vector<2x8x8xf32>
    %cst_54 = arith.constant dense<0.000000e+00> : vector<2x8xf32>
    %192 = vector.multi_reduction <add>, %191, %cst_54 [2] : vector<2x8x8xf32> to vector<2x8xf32>
    %193 = vector.shape_cast %192 : vector<2x8xf32> to vector<2x8x1xf32>
    %194 = tpu.reciprocal %193 {approx = true} : vector<2x8x1xf32> -> vector<2x8x1xf32>
    %195 = vector.broadcast %194 : vector<2x8x1xf32> to vector<2x8x8xf32>
    %196 = arith.mulf %191, %195 : vector<2x8x8xf32>
    %197 = arith.truncf %196 : vector<2x8x8xf32> to vector<2x8x8xbf16>
    "tpu.trace_start"() <{level = 10 : i32, message = "bqk,bkd->bqd"}> : () -> ()
    %cst_55 = arith.constant dense<0.000000e+00> : vector<2x8x16xf32>
    %198 = tpu.matmul %197, %151, %cst_55 {dimension_numbers = #tpu.dot_dimension_numbers<[2], [1], [1], [2], [0, 0, 0, 1, 1, 2], [0], [0]>} : vector<2x8x8xbf16>, vector<2x8x16xbf16>, vector<2x8x16xf32> -> vector<2x8x16xf32>
    "tpu.trace_stop"() : () -> ()
    %199 = vector.shape_cast %198 : vector<2x8x16xf32> to vector<16x16xf32>
    %200 = arith.truncf %199 : vector<16x16xf32> to vector<16x16xbf16>
    %c0_56 = arith.constant 0 : index
    %c48 = arith.constant 48 : index
    %201 = vector.load %arg20[%c0_56, %c48] : memref<16x64xbf16, #tpu.memory_space<vmem>>, vector<16x16xbf16>
    tpu.vector_store %arg20[%c0_56, %c48], %200 {strides = array<i32>} : memref<16x64xbf16, #tpu.memory_space<vmem>>, vector<16x16xbf16>,
    %c0_57 = arith.constant 0 : index
    %c0_58 = arith.constant 0 : index
    %202 = vector.load %arg20[%c0_57, %c0_58] : memref<16x64xbf16, #tpu.memory_space<vmem>>, vector<16x64xbf16>
    %c0_59 = arith.constant 0 : index
    %c0_60 = arith.constant 0 : index
    %203 = vector.load %arg10[%c0_59, %c0_60] : memref<64x64xbf16, #tpu.memory_space<vmem>>, vector<64x64xbf16>
    %cst_61 = arith.constant dense<0.000000e+00> : vector<16x64xf32>
    %204 = tpu.matmul %202, %203, %cst_61 {dimension_numbers = #tpu.dot_dimension_numbers<[1], [0], [0], [1], [0, 0, 1, 1], [], []>} : vector<16x64xbf16>, vector<64x64xbf16>, vector<16x64xf32> -> vector<16x64xf32>
    %c0_62 = arith.constant 0 : index
    %c0_63 = arith.constant 0 : index
    %205 = vector.load %arg11[%c0_62, %c0_63] : memref<1x64xf32, #tpu.memory_space<vmem>>, vector<1x64xf32>
    %206 = vector.broadcast %205 : vector<1x64xf32> to vector<16x64xf32>
    %207 = arith.addf %204, %206 : vector<16x64xf32>
    %208 = arith.addf %40, %207 : vector<16x64xf32>
    %c0_64 = arith.constant 0 : index
    %c0_65 = arith.constant 0 : index
    %209 = vector.load %arg12[%c0_64, %c0_65] : memref<1x64xf32, #tpu.memory_space<vmem>>, vector<1x64xf32>
    %210 = arith.mulf %208, %208 : vector<16x64xf32>
    %cst_66 = arith.constant dense<0.000000e+00> : vector<16xf32>
    %211 = vector.multi_reduction <add>, %210, %cst_66 [1] : vector<16x64xf32> to vector<16xf32>
    %212 = vector.shape_cast %211 : vector<16xf32> to vector<16x1xf32>
    %cst_67 = arith.constant 6.400000e+01 : f32
    %213 = vector.broadcast %cst_67 : f32 to vector<16x1xf32>
    %214 = arith.divf %212, %213 : vector<16x1xf32>
    %cst_68 = arith.constant 9.99999993E-9 : f32
    %215 = vector.broadcast %cst_68 : f32 to vector<16x1xf32>
    %216 = arith.addf %214, %215 : vector<16x1xf32>
    %217 = math.rsqrt %216 : vector<16x1xf32>
    %218 = vector.broadcast %217 : vector<16x1xf32> to vector<16x64xf32>
    %219 = arith.mulf %208, %218 : vector<16x64xf32>
    %220 = vector.broadcast %209 : vector<1x64xf32> to vector<16x64xf32>
    %221 = arith.mulf %220, %219 : vector<16x64xf32>
    %222 = arith.truncf %221 : vector<16x64xf32> to vector<16x64xbf16>
    %c0_69 = arith.constant 0 : index
    %c0_70 = arith.constant 0 : index
    %223 = vector.load %arg13[%c0_69, %c0_70] : memref<64x256xbf16, #tpu.memory_space<vmem>>, vector<64x256xbf16>
    %cst_71 = arith.constant dense<0.000000e+00> : vector<16x256xf32>
    %224 = tpu.matmul %222, %223, %cst_71 {dimension_numbers = #tpu.dot_dimension_numbers<[1], [0], [0], [1], [0, 0, 1, 1], [], []>} : vector<16x64xbf16>, vector<64x256xbf16>, vector<16x256xf32> -> vector<16x256xf32>
    %c0_72 = arith.constant 0 : index
    %c0_73 = arith.constant 0 : index
    %225 = vector.load %arg14[%c0_72, %c0_73] : memref<1x256xf32, #tpu.memory_space<vmem>>, vector<1x256xf32>
    %226 = vector.broadcast %225 : vector<1x256xf32> to vector<16x256xf32>
    %227 = arith.addf %224, %226 : vector<16x256xf32>
    %228 = vector.extract_strided_slice %227 {offsets = [0, 0], sizes = [16, 128], strides = [1, 1]} : vector<16x256xf32> to vector<16x128xf32>
    %229 = vector.extract_strided_slice %227 {offsets = [0, 128], sizes = [16, 128], strides = [1, 1]} : vector<16x256xf32> to vector<16x128xf32>
    %230 = arith.negf %228 : vector<16x128xf32>
    %231 = math.exp %230 : vector<16x128xf32>
    %cst_74 = arith.constant 1.000000e+00 : f32
    %232 = vector.broadcast %cst_74 : f32 to vector<16x128xf32>
    %233 = arith.addf %232, %231 : vector<16x128xf32>
    %234 = arith.divf %232, %233 : vector<16x128xf32>
    %235 = arith.mulf %228, %234 : vector<16x128xf32>
    %236 = arith.mulf %235, %229 : vector<16x128xf32>
    %237 = arith.truncf %236 : vector<16x128xf32> to vector<16x128xbf16>
    %c0_75 = arith.constant 0 : index
    %c0_76 = arith.constant 0 : index
    %238 = vector.load %arg15[%c0_75, %c0_76] : memref<128x64xbf16, #tpu.memory_space<vmem>>, vector<128x64xbf16>
    %cst_77 = arith.constant dense<0.000000e+00> : vector<16x64xf32>
    %239 = tpu.matmul %237, %238, %cst_77 {dimension_numbers = #tpu.dot_dimension_numbers<[1], [0], [0], [1], [0, 0, 1, 1], [], []>} : vector<16x128xbf16>, vector<128x64xbf16>, vector<16x64xf32> -> vector<16x64xf32>
    %c0_78 = arith.constant 0 : index
    %c0_79 = arith.constant 0 : index
    %240 = vector.load %arg16[%c0_78, %c0_79] : memref<1x64xf32, #tpu.memory_space<vmem>>, vector<1x64xf32>
    %241 = vector.broadcast %240 : vector<1x64xf32> to vector<16x64xf32>
    %242 = arith.addf %239, %241 : vector<16x64xf32>
    %243 = arith.addf %208, %242 : vector<16x64xf32>
    %244 = vector.shape_cast %243 : vector<16x64xf32> to vector<2x8x64xf32>
    %c0_80 = arith.constant 0 : index
    %c0_81 = arith.constant 0 : index
    %c0_82 = arith.constant 0 : index
    %245 = vector.load %arg19[%c0_80, %c0_81, %c0_82] : memref<2x8x64xf32, #tpu.memory_space<vmem>>, vector<2x8x64xf32>
    tpu.vector_store %arg19[%c0_80, %c0_81, %c0_82], %244 {strides = array<i32>} : memref<2x8x64xf32, #tpu.memory_space<vmem>>, vector<2x8x64xf32>,
    return
  }
  func.func @transform_0(%arg0: i32) -> (i32, i32, i32) {
    %c0_i32 = arith.constant 0 : i32
    %c0_i32_0 = arith.constant 0 : i32
    %c0_i32_1 = arith.constant 0 : i32
    return %arg0, %c0_i32, %c0_i32_0 : i32, i32, i32
  }
  func.func @transform_1(%arg0: i32) -> (i32, i32, i32) {
    %c0_i32 = arith.constant 0 : i32
    %c0_i32_0 = arith.constant 0 : i32
    %c0_i32_1 = arith.constant 0 : i32
    return %arg0, %c0_i32, %c0_i32_0 : i32, i32, i32
  }
  func.func @transform_2(%arg0: i32) -> (i32, i32) {
    %c0_i32 = arith.constant 0 : i32
    %c0_i32_0 = arith.constant 0 : i32
    %c0_i32_1 = arith.constant 0 : i32
    return %c0_i32, %c0_i32_0 : i32, i32
  }
  func.func @transform_3(%arg0: i32) -> (i32, i32) {
    %c0_i32 = arith.constant 0 : i32
    %c0_i32_0 = arith.constant 0 : i32
    %c0_i32_1 = arith.constant 0 : i32
    return %c0_i32, %c0_i32_0 : i32, i32
  }
  func.func @transform_4(%arg0: i32) -> (i32, i32) {
    %c0_i32 = arith.constant 0 : i32
    %c0_i32_0 = arith.constant 0 : i32
    %c0_i32_1 = arith.constant 0 : i32
    return %c0_i32, %c0_i32_0 : i32, i32
  }
  func.func @transform_5(%arg0: i32) -> (i32, i32) {
    %c0_i32 = arith.constant 0 : i32
    %c0_i32_0 = arith.constant 0 : i32
    %c0_i32_1 = arith.constant 0 : i32
    return %c0_i32, %c0_i32_0 : i32, i32
  }
  func.func @transform_6(%arg0: i32) -> (i32, i32) {
    %c0_i32 = arith.constant 0 : i32
    %c0_i32_0 = arith.constant 0 : i32
    %c0_i32_1 = arith.constant 0 : i32
    return %c0_i32, %c0_i32_0 : i32, i32
  }
  func.func @transform_7(%arg0: i32) -> (i32, i32) {
    %c0_i32 = arith.constant 0 : i32
    %c0_i32_0 = arith.constant 0 : i32
    %c0_i32_1 = arith.constant 0 : i32
    return %c0_i32, %c0_i32_0 : i32, i32
  }
  func.func @transform_8(%arg0: i32) -> (i32, i32) {
    %c0_i32 = arith.constant 0 : i32
    %c0_i32_0 = arith.constant 0 : i32
    %c0_i32_1 = arith.constant 0 : i32
    return %c0_i32, %c0_i32_0 : i32, i32
  }
  func.func @transform_9(%arg0: i32) -> (i32, i32) {
    %c0_i32 = arith.constant 0 : i32
    %c0_i32_0 = arith.constant 0 : i32
    %c0_i32_1 = arith.constant 0 : i32
    return %c0_i32, %c0_i32_0 : i32, i32
  }
  func.func @transform_10(%arg0: i32) -> (i32, i32) {
    %c0_i32 = arith.constant 0 : i32
    %c0_i32_0 = arith.constant 0 : i32
    %c0_i32_1 = arith.constant 0 : i32
    return %c0_i32, %c0_i32_0 : i32, i32
  }
  func.func @transform_11(%arg0: i32) -> (i32, i32) {
    %c0_i32 = arith.constant 0 : i32
    %c0_i32_0 = arith.constant 0 : i32
    %c0_i32_1 = arith.constant 0 : i32
    return %c0_i32, %c0_i32_0 : i32, i32
  }
  func.func @transform_12(%arg0: i32) -> (i32, i32) {
    %c0_i32 = arith.constant 0 : i32
    %c0_i32_0 = arith.constant 0 : i32
    %c0_i32_1 = arith.constant 0 : i32
    return %c0_i32, %c0_i32_0 : i32, i32
  }
  func.func @transform_13(%arg0: i32) -> (i32, i32) {
    %c0_i32 = arith.constant 0 : i32
    %c0_i32_0 = arith.constant 0 : i32
    %c0_i32_1 = arith.constant 0 : i32
    return %c0_i32, %c0_i32_0 : i32, i32
  }
  func.func @transform_14(%arg0: i32) -> (i32, i32) {
    %c0_i32 = arith.constant 0 : i32
    %c0_i32_0 = arith.constant 0 : i32
    %c0_i32_1 = arith.constant 0 : i32
    return %c0_i32, %c0_i32_0 : i32, i32
  }
  func.func @transform_15(%arg0: i32) -> (i32, i32) {
    %c0_i32 = arith.constant 0 : i32
    %c0_i32_0 = arith.constant 0 : i32
    %c0_i32_1 = arith.constant 0 : i32
    return %c0_i32, %c0_i32_0 : i32, i32
  }
  func.func @transform_16(%arg0: i32) -> (i32, i32) {
    %c0_i32 = arith.constant 0 : i32
    %c0_i32_0 = arith.constant 0 : i32
    %c0_i32_1 = arith.constant 0 : i32
    return %c0_i32, %c0_i32_0 : i32, i32
  }
  func.func @transform_17(%arg0: i32) -> (i32, i32) {
    %c0_i32 = arith.constant 0 : i32
    %c0_i32_0 = arith.constant 0 : i32
    %c0_i32_1 = arith.constant 0 : i32
    return %c0_i32, %c0_i32_0 : i32, i32
  }
  func.func @transform_18(%arg0: i32) -> (i32, i32, i32) {
    %c0_i32 = arith.constant 0 : i32
    %c0_i32_0 = arith.constant 0 : i32
    %c0_i32_1 = arith.constant 0 : i32
    return %arg0, %c0_i32, %c0_i32_0 : i32, i32, i32
  }
}

</mosaic_0001>

<bundles_post_ra>
// kernel: tpu_custom_call.1
= control target key start
LH: loop header
LB: loop body
LE: loop exit
PB: predicated region body
PF: predicated region fallthrough
CT: control target
= control target key end

     0   :  { %s3357_s0 = inlined_call_operand.hbm [shape: bf16[2,8,64], index: 0, kind: input, shape index: {}]   ;;  %s3358_s1 = inlined_call_operand.hbm [shape: bf16[2,8,64], index: 1, kind: input, shape index: {}]   ;;  %s3359_s2 = inlined_call_operand.vmem [shape: f32[1,64], index: 2, kind: input, shape index: {}]   ;;  %s3360_s3 = inlined_call_operand.hbm [shape: bf16[64,64], index: 3, kind: input, shape index: {}]   ;;  %s3361_s4 = inlined_call_operand.hbm [shape: bf16[64,64], index: 4, kind: input, shape index: {}]   ;;  %s3362_s5 = inlined_call_operand.hbm [shape: f32[1,64], index: 5, kind: input, shape index: {}]   ;;  %s3363_s6 = inlined_call_operand.hbm [shape: f32[1,64], index: 6, kind: input, shape index: {}]   ;;  %s3364_s7 = inlined_call_operand.vmem [shape: bf16[64,224], index: 7, kind: input, shape index: {}]   ;;  %s3365_s8 = inlined_call_operand.hbm [shape: f32[1,224], index: 8, kind: input, shape index: {}]   ;;  %s3366_s9 = inlined_call_operand.hbm [shape: bf16[64,64], index: 9, kind: input, shape index: {}]   ;;  %s3367_s10 = inlined_call_operand.hbm [shape: f32[1,64], index: 10, kind: input, shape index: {}]   ;;  %s3368_s11 = inlined_call_operand.hbm [shape: f32[1,64], index: 11, kind: input, shape index: {}]   ;;  %s3369_s12 = inlined_call_operand.vmem [shape: bf16[64,256], index: 12, kind: input, shape index: {}]   ;;  %s3370_s13 = inlined_call_operand.hbm [shape: f32[1,256], index: 13, kind: input, shape index: {}]   ;;  %s3371_s14 = inlined_call_operand.vmem [shape: bf16[128,64], index: 14, kind: input, shape index: {}]   ;;  %s3372_s15 = inlined_call_operand.vmem [shape: f32[1,64], index: 15, kind: input, shape index: {}]   ;;  %s3373_s16 = inlined_call_operand.vmem [shape: f32[8,16], index: 16, kind: input, shape index: {}]   ;;  %s3374_s17 = inlined_call_operand.vmem [shape: f32[8,16], index: 17, kind: input, shape index: {}]   ;;  %s3375_s18 = inlined_call_operand.hbm [shape: f32[2,8,64], index: 18, kind: output, shape index: {}]  }
   0x1   :  { %3379 = sst [smem:[#allocation29_spill]] %s3357_s0 }
   0x2   :  { %3380 = sst [smem:[#allocation30_spill]] %s3358_s1 }
   0x3   :  { %3381 = sst [smem:[#allocation31_spill]] %s3359_s2 }
   0x4   :  { %3382 = sst [smem:[#allocation32_spill]] %s3375_s18 }
   0x5   :  { %23 = vsyncpa [#allocation4], 0 }
   0x6   :  { %24 = vsyncpa [#allocation7], 0 }
   0x7   :  { %25 = vsyncpa [#allocation10], 0 }
   0x8   :  { %26 = vsyncpa [#allocation13], 0 }
   0x9   :  { %27 = vsyncpa [#allocation16], 0 }
   0xa   :  { %28 = vsyncpa [#allocation19], 0 }
   0xb   :  { %29 = vsyncpa [#allocation5], 0  ;;  %s2653_s27 = smov [#allocation6]   ;;  %s2654_s29 = smov [#allocation9]  }
   0xc   :  { %s47_s28 = sshll.u32 %s2653_s27, 4  ;;  %s73_s30 = sshll.u32 %s2654_s29, 4  ;;  %s48_s28 = int_to_ptr.vmem [resolvable:$true] %s47_s28  ;;  %s2774_s30 = int_to_ptr.vmem [resolvable:$true] %s73_s30 }
   0xd   :  { %s3383_s1 = sld [smem:[#allocation30_spill]] }
  0x13   :  { %s2375_s20 = scalar_lea.hbm %s3383_s1, 128 }
  0x14   :  { %p2376_p0 = scmp.ne.s32.totalorder %s3383_s1, %s2375_s20  ;;  %p2379_p1 = scmp.lt.u32.totalorder %s2375_s20, %s3383_s1 }
  0x16   :  { %p2381_p2 = pnand %p2379_p1, %p2376_p0 }
  0x18   :  { %2384 = shalt.err (!%p2381_p2)
}
  0x19   :  { %s2385_s24 = scalar_lea.vmem %s48_s28, 128  ;;  %p2390_p4 = scmp.lt.s32.totalorder %s48_s28, %s48_s28 }
  0x1a   :  { %p2386_p3 = scmp.ne.s32.totalorder %s48_s28, %s2385_s24  ;;  %p2391_p5 = scmp.lt.s32.totalorder %s2385_s24, %s2385_s24 }
  0x1c   :  { %p2392_p6 = por %p2391_p5, %p2390_p4 }
  0x1e   :  { %p2393_p7 = pnand %p2392_p6, %p2386_p3 }
  0x20   :  { %2396 = shalt.err (!%p2393_p7)
}
  0x21   :  { %s2655_s25 = smov 64   ;;  %s2656_s26 = smov 4  }
  0x22   :  { %53 = dma.hbm_to_vmem [thread:$0]  %s3383_s1, 128, %s48_s28, [#allocation7], %s2655_s25, %s2655_s25, %s2656_s26  }
  0x23   :  { %s2397_s20 = scalar_lea.hbm %s3361_s4, 512 }
  0x24   :  { %p2398_p8 = scmp.ne.s32.totalorder %s3361_s4, %s2397_s20  ;;  %p2401_p9 = scmp.lt.u32.totalorder %s2397_s20, %s3361_s4 }
  0x26   :  { %p2403_p10 = pnand %p2401_p9, %p2398_p8 }
  0x28   :  { %2406 = shalt.err (!%p2403_p10)
}
  0x29   :  { %s2407_s24 = scalar_lea.vmem %s2774_s30, 512  ;;  %p2412_p12 = scmp.lt.s32.totalorder %s2774_s30, %s2774_s30 }
  0x2a   :  { %p2408_p11 = scmp.ne.s32.totalorder %s2774_s30, %s2407_s24  ;;  %p2413_p13 = scmp.lt.s32.totalorder %s2407_s24, %s2407_s24 }
  0x2c   :  { %p2414_p0 = por %p2413_p13, %p2412_p12 }
  0x2e   :  { %p2415_p1 = pnand %p2414_p0, %p2408_p11 }
  0x30   :  { %2418 = shalt.err (!%p2415_p1)
}
  0x31   :  { %79 = dma.hbm_to_vmem [thread:$0]  %s3361_s4, 512, %s2774_s30, [#allocation10], %s2655_s25, %s2655_s25, %s2656_s26  }
  0x32   :  { %s2657_s27 = smov [#allocation12]   ;;  %s2658_s0 = smov [#allocation15]  }
  0x33   :  { %s96_s29 = sshll.u32 %s2657_s27, 4  ;;  %s117_s19 = sshll.u32 %s2658_s0, 4  ;;  %s97_s29 = int_to_ptr.vmem [resolvable:$true] %s96_s29  ;;  %s2811_s19 = int_to_ptr.vmem [resolvable:$true] %s117_s19 }
  0x34   :  { %s2419_s22 = scalar_lea.hbm %s3363_s6, 16 }
  0x35   :  { %p2420_p2 = scmp.ne.s32.totalorder %s3363_s6, %s2419_s22  ;;  %p2423_p3 = scmp.lt.u32.totalorder %s2419_s22, %s3363_s6 }
  0x37   :  { %p2425_p4 = pnand %p2423_p3, %p2420_p2 }
  0x39   :  { %2428 = shalt.err (!%p2425_p4)
}
  0x3a   :  { %s2429_s4 = scalar_lea.vmem %s97_s29, 16  ;;  %s2433_s30 = scalar_lea.vmem %s97_s29, 32 }
  0x3b   :  { %p2430_p5 = scmp.ne.s32.totalorder %s97_s29, %s2429_s4  ;;  %p2434_p6 = scmp.lt.s32.totalorder %s97_s29, %s97_s29 }
  0x3c   :  { %p2435_p7 = scmp.lt.s32.totalorder %s2433_s30, %s2429_s4 }
  0x3e   :  { %p2436_p8 = por %p2435_p7, %p2434_p6 }
  0x40   :  { %p2437_p9 = pnand %p2436_p8, %p2430_p5 }
  0x42   :  { %2440 = shalt.err (!%p2437_p9)
}
  0x43   :  { %99 = dma.hbm_to_vmem [thread:$0]  %s3363_s6, 16, %s97_s29, [#allocation13]  }
  0x44   :  { %s2441_s20 = scalar_lea.hbm %s3366_s9, 512 }
  0x45   :  { %p2442_p10 = scmp.ne.s32.totalorder %s3366_s9, %s2441_s20  ;;  %p2445_p11 = scmp.lt.u32.totalorder %s2441_s20, %s3366_s9 }
  0x47   :  { %p2447_p12 = pnand %p2445_p11, %p2442_p10 }
  0x49   :  { %2450 = shalt.err (!%p2447_p12)
}
  0x4a   :  { %s2451_s23 = scalar_lea.vmem %s2811_s19, 512  ;;  %p2456_p0 = scmp.lt.s32.totalorder %s2811_s19, %s2811_s19 }
  0x4b   :  { %p2452_p13 = scmp.ne.s32.totalorder %s2811_s19, %s2451_s23  ;;  %p2457_p1 = scmp.lt.s32.totalorder %s2451_s23, %s2451_s23 }
  0x4d   :  { %p2458_p2 = por %p2457_p1, %p2456_p0 }
  0x4f   :  { %p2459_p3 = pnand %p2458_p2, %p2452_p13 }
  0x51   :  { %2462 = shalt.err (!%p2459_p3)
}
  0x52   :  { %123 = dma.hbm_to_vmem [thread:$0]  %s3366_s9, 512, %s2811_s19, [#allocation16], %s2655_s25, %s2655_s25, %s2656_s26  }
  0x53   :  { %s2659_s24 = smov [#allocation18]   ;;  %s2660_s30 = smov [#allocation3]  }
  0x54   :  { %s140_s4 = sshll.u32 %s2659_s24, 4  ;;  %s35_s28 = sshll.u32 %s2660_s30, 4  ;;  %s141_s4 = int_to_ptr.vmem [resolvable:$true] %s140_s4  ;;  %s2845_s28 = int_to_ptr.vmem [resolvable:$true] %s35_s28 }
  0x55   :  { %s2463_s0 = scalar_lea.hbm %s3368_s11, 16 }
  0x56   :  { %p2464_p4 = scmp.ne.s32.totalorder %s3368_s11, %s2463_s0  ;;  %p2467_p5 = scmp.lt.u32.totalorder %s2463_s0, %s3368_s11 }
  0x58   :  { %p2469_p6 = pnand %p2467_p5, %p2464_p4 }
  0x5a   :  { %2472 = shalt.err (!%p2469_p6)
}
  0x5b   :  { %s2473_s9 = scalar_lea.vmem %s141_s4, 16  ;;  %s2477_s19 = scalar_lea.vmem %s141_s4, 32 }
  0x5c   :  { %p2474_p7 = scmp.ne.s32.totalorder %s141_s4, %s2473_s9  ;;  %p2478_p8 = scmp.lt.s32.totalorder %s141_s4, %s141_s4 }
  0x5d   :  { %p2479_p9 = scmp.lt.s32.totalorder %s2477_s19, %s2473_s9 }
  0x5f   :  { %p2480_p10 = por %p2479_p9, %p2478_p8 }
  0x61   :  { %p2481_p11 = pnand %p2480_p10, %p2474_p7 }
  0x63   :  { %2484 = shalt.err (!%p2481_p11)
}
  0x64   :  { %143 = dma.hbm_to_vmem [thread:$0]  %s3368_s11, 16, %s141_s4, [#allocation19]  }
  0x65   :  { %s3384_s24 = sld [smem:[#allocation29_spill]] }
  0x6b   :  { %s2485_s30 = scalar_lea.hbm %s3384_s24, 128 }
  0x6c   :  { %p2486_p12 = scmp.ne.s32.totalorder %s3384_s24, %s2485_s30  ;;  %p2489_p13 = scmp.lt.u32.totalorder %s2485_s30, %s3384_s24 }
  0x6e   :  { %p2491_p0 = pnand %p2489_p13, %p2486_p12 }
  0x70   :  { %2494 = shalt.err (!%p2491_p0)
}
  0x71   :  { %s2495_s18 = scalar_lea.vmem %s2845_s28, 128  ;;  %p2500_p2 = scmp.lt.s32.totalorder %s2845_s28, %s2845_s28 }
  0x72   :  { %p2496_p1 = scmp.ne.s32.totalorder %s2845_s28, %s2495_s18  ;;  %p2501_p3 = scmp.lt.s32.totalorder %s2495_s18, %s2495_s18 }
  0x74   :  { %p2502_p4 = por %p2501_p3, %p2500_p2 }
  0x76   :  { %p2503_p5 = pnand %p2502_p4, %p2496_p1 }
  0x78   :  { %2506 = shalt.err (!%p2503_p5)
}
  0x79   :  { %41 = dma.hbm_to_vmem [thread:$0]  %s3384_s24, 128, %s2845_s28, [#allocation4], %s2655_s25, %s2655_s25, %s2656_s26  }
  0x7a   :  { %s2661_s21 = smov [#allocation8]   ;;  %s2662_s9 = smov [#allocation11]  }
  0x7b   :  { %s61_s22 = sshll.u32 %s2661_s21, 4  ;;  %s86_s19 = sshll.u32 %s2662_s9, 4  ;;  %s62_s22 = int_to_ptr.vmem [resolvable:$true] %s61_s22  ;;  %s87_s19 = int_to_ptr.vmem [resolvable:$true] %s86_s19 }
  0x7c   :  { %s2507_s6 = scalar_lea.hbm %s3360_s3, 512 }
  0x7d   :  { %p2508_p6 = scmp.ne.s32.totalorder %s3360_s3, %s2507_s6  ;;  %p2511_p7 = scmp.lt.u32.totalorder %s2507_s6, %s3360_s3 }
  0x7f   :  { %p2513_p8 = pnand %p2511_p7, %p2508_p6 }
  0x81   :  { %2516 = shalt.err (!%p2513_p8)
}
  0x82   :  { %s2517_s28 = scalar_lea.vmem %s62_s22, 512  ;;  %p2522_p10 = scmp.lt.s32.totalorder %s62_s22, %s62_s22 }
  0x83   :  { %p2518_p9 = scmp.ne.s32.totalorder %s62_s22, %s2517_s28  ;;  %p2523_p11 = scmp.lt.s32.totalorder %s2517_s28, %s2517_s28 }
  0x85   :  { %p2524_p12 = por %p2523_p11, %p2522_p10 }
  0x87   :  { %p2525_p13 = pnand %p2524_p12, %p2518_p9 }
  0x89   :  { %2528 = shalt.err (!%p2525_p13)
}
  0x8a   :  { %67 = dma.hbm_to_vmem [thread:$0]  %s3360_s3, 512, %s62_s22, [#allocation7], %s2655_s25, %s2655_s25, %s2656_s26  }
  0x8b   :  { %s2529_s11 = scalar_lea.hbm %s3362_s5, 16 }
  0x8c   :  { %p2530_p0 = scmp.ne.s32.totalorder %s3362_s5, %s2529_s11  ;;  %p2533_p1 = scmp.lt.u32.totalorder %s2529_s11, %s3362_s5 }
  0x8e   :  { %p2535_p2 = pnand %p2533_p1, %p2530_p0 }
  0x90   :  { %2538 = shalt.err (!%p2535_p2)
}
  0x91   :  { %s2539_s23 = scalar_lea.vmem %s87_s19, 16  ;;  %s2543_s6 = scalar_lea.vmem %s87_s19, 32 }
  0x92   :  { %p2540_p3 = scmp.ne.s32.totalorder %s87_s19, %s2539_s23  ;;  %p2544_p4 = scmp.lt.s32.totalorder %s87_s19, %s87_s19 }
  0x93   :  { %p2545_p5 = scmp.lt.s32.totalorder %s2543_s6, %s2539_s23 }
  0x95   :  { %p2546_p6 = por %p2545_p5, %p2544_p4 }
  0x97   :  { %p2547_p7 = pnand %p2546_p6, %p2540_p3 }
  0x99   :  { %2550 = shalt.err (!%p2547_p7)
}
  0x9a   :  { %89 = dma.hbm_to_vmem [thread:$0]  %s3362_s5, 16, %s87_s19, [#allocation10]  }
  0x9b   :  { %s2663_s22 = smov [#allocation14]   ;;  %s2664_s30 = smov [#allocation17]  }
  0x9c   :  { %s108_s29 = sshll.u32 %s2663_s22, 4  ;;  %s130_s1 = sshll.u32 %s2664_s30, 4  ;;  %s109_s29 = int_to_ptr.vmem [resolvable:$true] %s108_s29  ;;  %s131_s1 = int_to_ptr.vmem [resolvable:$true] %s130_s1 }
  0x9d   :  { %s2551_s24 = scalar_lea.hbm %s3365_s8, 32 }
  0x9e   :  { %p2552_p8 = scmp.ne.s32.totalorder %s3365_s8, %s2551_s24  ;;  %p2555_p9 = scmp.lt.u32.totalorder %s2551_s24, %s3365_s8 }
  0xa0   :  { %p2557_p10 = pnand %p2555_p9, %p2552_p8 }
  0xa2   :  { %2560 = shalt.err (!%p2557_p10)
}
  0xa3   :  { %s2561_s5 = scalar_lea.vmem %s109_s29, 32  ;;  %p2566_p12 = scmp.lt.s32.totalorder %s109_s29, %s109_s29 }
  0xa4   :  { %p2562_p11 = scmp.ne.s32.totalorder %s109_s29, %s2561_s5  ;;  %p2567_p13 = scmp.lt.s32.totalorder %s2561_s5, %s2561_s5 }
  0xa6   :  { %p2568_p0 = por %p2567_p13, %p2566_p12 }
  0xa8   :  { %p2569_p1 = pnand %p2568_p0, %p2562_p11 }
  0xaa   :  { %2572 = shalt.err (!%p2569_p1)
}
  0xab   :  { %111 = dma.hbm_to_vmem [thread:$0]  %s3365_s8, 32, %s109_s29, [#allocation13]  }
  0xac   :  { %s2573_s2 = scalar_lea.hbm %s3367_s10, 16 }
  0xad   :  { %p2574_p2 = scmp.ne.s32.totalorder %s3367_s10, %s2573_s2  ;;  %p2577_p3 = scmp.lt.u32.totalorder %s2573_s2, %s3367_s10 }
  0xaf   :  { %p2579_p4 = pnand %p2577_p3, %p2574_p2 }
  0xb1   :  { %2582 = shalt.err (!%p2579_p4)
}
  0xb2   :  { %s2583_s22 = scalar_lea.vmem %s131_s1, 16  ;;  %s2587_s30 = scalar_lea.vmem %s131_s1, 32 }
  0xb3   :  { %p2584_p5 = scmp.ne.s32.totalorder %s131_s1, %s2583_s22  ;;  %p2588_p6 = scmp.lt.s32.totalorder %s131_s1, %s131_s1 }
  0xb4   :  { %p2589_p7 = scmp.lt.s32.totalorder %s2587_s30, %s2583_s22 }
  0xb6   :  { %p2590_p8 = por %p2589_p7, %p2588_p6 }
  0xb8   :  { %p2591_p9 = pnand %p2590_p8, %p2584_p5 }
  0xba   :  { %2594 = shalt.err (!%p2591_p9)
}
  0xbb   :  { %133 = dma.hbm_to_vmem [thread:$0]  %s3367_s10, 16, %s131_s1, [#allocation16]  }
  0xbc   :  { %s2665_s27 = smov [#allocation20]   ;;  %s2595_s20 = scalar_lea.hbm %s3370_s13, 32 }
  0xbd   :  { %s152_s28 = sshll.u32 %s2665_s27, 4  ;;  %p2596_p10 = scmp.ne.s32.totalorder %s3370_s13, %s2595_s20  ;;  %s153_s28 = int_to_ptr.vmem [resolvable:$true] %s152_s28 }
  0xbe   :  { %p2599_p11 = scmp.lt.u32.totalorder %s2595_s20, %s3370_s13 }
  0xc0   :  { %p2601_p12 = pnand %p2599_p11, %p2596_p10 }
  0xc2   :  { %2604 = shalt.err (!%p2601_p12)
}
  0xc3   :  { %s2605_s4 = scalar_lea.vmem %s153_s28, 32  ;;  %p2610_p0 = scmp.lt.s32.totalorder %s153_s28, %s153_s28 }
  0xc4   :  { %p2606_p13 = scmp.ne.s32.totalorder %s153_s28, %s2605_s4  ;;  %p2611_p1 = scmp.lt.s32.totalorder %s2605_s4, %s2605_s4 }
  0xc6   :  { %p2612_p2 = por %p2611_p1, %p2610_p0 }
  0xc8   :  { %p2613_p3 = pnand %p2612_p2, %p2606_p13 }
  0xca   :  { %2616 = shalt.err (!%p2613_p3)
}
  0xcb   :  { %155 = dma.hbm_to_vmem [thread:$0]  %s3370_s13, 32, %s153_s28, [#allocation19]  }
  0xcc   :  { %2639 = dma.done.wait [#allocation4], 128  }
  0xcd   :  { %2640 = vsyncadd [#allocation4], 4294967168 }
  0xce   :  { %2641 = dma.done.wait [#allocation7], 640  }
  0xcf   :  { %2642 = vsyncadd [#allocation7], 4294966656 }
  0xd0   :  { %2643 = dma.done.wait [#allocation10], 528  }
  0xd1   :  { %2644 = vsyncadd [#allocation10], 4294966768 }
  0xd2   :  { %2645 = dma.done.wait [#allocation13], 48  }
  0xd3   :  { %2646 = vsyncadd [#allocation13], 4294967248 }
  0xd4   :  { %2647 = dma.done.wait [#allocation16], 528  }
  0xd5   :  { %2648 = vsyncadd [#allocation16], 4294966768 }
  0xd6   :  { %2649 = dma.done.wait [#allocation19], 48  }
  0xd7   :  { %2650 = vsyncadd [#allocation19], 4294967248  ;;  %v2038_v0 = vld [vmem:[#allocation6] sm:$0xff]   ;;  %vm209_vm0 = vcmask 523264   ;;  %v2034_v1 = vld [vmem:[#allocation3] sm:$0xff]   ;;  %v2666_v15 = vmov 0.0  }
  0xd8   :  { %v2039_v2 = vunpack.c.l.bf16 %v2038_v0  ;;  %v2040_v3 = vunpack.c.h.bf16 %v2038_v0  ;;  %v2942_v4 = vunpack.c.l.bf16 %v2034_v1  ;;  %v2944_v5 = vunpack.c.h.bf16 %v2034_v1  ;;  %v2275_v14 = vld [vmem:[#allocation9] sm:$0xff]   ;;  %2097 = vmatprep.subr.bf16.mxu1 %v2666_v15  ;;  %v2276_v16 = vld [vmem:[#allocation9 + $0x8] sm:$0xff]   ;;  %v2277_v17 = vld [vmem:[#allocation9 + $0x10] sm:$0xff]   ;;  %s3385_s9 = sld [smem:[#allocation31_spill]]  ;;  %s2669_s4 = smov 32  }
  0xd9   :  { %2098 = vmatpush3.bf16.msra.mxu1 %v2275_v14  ;;  %v2278_v18 = vld [vmem:[#allocation9 + $0x18] sm:$0xff]   ;;  %vm2667_vm1 = vmmov 0   ;;  %v2279_v38 = vld [vmem:[#allocation8] sm:$0xff]   ;;  %v2280_v40 = vld [vmem:[#allocation8 + $0x8] sm:$0xff]   ;;  %vm605_vm2 = vcmask 130048   ;;  %vm698_vm4 = vcmask 64512  }
  0xda   :  { %v242_v6 = vmul.f32 %v2039_v2, %v2039_v2  ;;  %v243_v7 = vmul.f32 %v2040_v3, %v2040_v3  ;;  %v207_v8 = vmul.f32 %v2942_v4, %v2942_v4  ;;  %v208_v9 = vmul.f32 %v2944_v5, %v2944_v5  ;;  %2099 = vmatprep.subr.bf16.mxu1 %v2666_v15  ;;  %v2281_v43 = vld [vmem:[#allocation8 + $0x10] sm:$0xff]   ;;  %v2282_v46 = vld [vmem:[#allocation8 + $0x18] sm:$0xff]   ;;  %v1951_v55 = vld [vmem:[#allocation11] ss:$0 sm:$0xff]  ;;  %s2673_s1 = smov 16   ;;  %s2674_s13 = smov 112  }
  0xdb   :  { %2105 = vmatprep.mubr.msk.bf16.mxu1 %vm2667_vm1, %v2666_v15  ;;  %s2675_s21 = smov 48   ;;  %vm729_vm5 = vcmask 1043456   ;;  %vm1056_vm6 = vcmask 261248   ;;  %vm1332_vm7 = vcmask 392448   ;;  %vm1565_vm8 = vcmask 523648   ;;  %s2676_s6 = smov [#allocation21]  }
  0xdc   :  { %v244_v10 = vsel %vm209_vm0, %v242_v6, 0.0  ;;  %v210_v11 = vsel %vm209_vm0, %v207_v8, 0.0  ;;  %v247_v12 = vsel %vm209_vm0, %v243_v7, 0.0  ;;  %v213_v13 = vsel %vm209_vm0, %v208_v9, 0.0  ;;  %v2288_v6 = vld [vmem:[%s3364_s7 + $0x10] ss:$8 sps:$4 sm:$0xff]  }
  0xdd   :  { %245 = vadd.xlane.f32.xlu0 %v244_v10  ;;  %211 = vadd.xlane.f32.xlu1 %v210_v11  ;;  %v2289_v7 = vld [vmem:[%s3364_s7 + $0x24] ss:$8 sps:$4 sm:$0xff]   ;;  %v2668_v8 = vmov 0   ;;  %v2291_v9 = vld [vmem:[%s3364_s7 + $0x20] ss:$8 sps:$4 sm:$0xff]   ;;  %s1923_s3 = sshll.u32 %s2676_s6, 4  ;;  %s1924_s3 = int_to_ptr.vmem [resolvable:$true] %s1923_s3 }
  0xde   :  { %2100 = vmatpush3.bf16.msra.mxu1 %v2276_v16  ;;  %v1940_v34 = vld [vmem:[%s3385_s9] ss:$0 sm:$0xff]  ;;  %535 = vmatprep.mubr.bf16.mxu0 %v2668_v8  ;;  %v2292_v10 = vld [vmem:[%s3364_s7 + $0x34] ss:$8 sps:$4 sm:$0xff]   ;;  %v2294_v11 = vld [vmem:[%s3364_s7 + $0x30] ss:$8 sps:$4 sm:$0xff]   ;;  %p2622_p5 = scmp.lt.s32.totalorder %s1924_s3, %s1924_s3 }
  0xdf   :  { %2101 = vmatprep.subr.bf16.mxu1 %v2666_v15  ;;  %s2617_s26 = scalar_lea.vmem %s1924_s3, 256 }
  0xe0   :  { %p2618_p4 = scmp.ne.s32.totalorder %s1924_s3, %s2617_s26  ;;  %p2623_p6 = scmp.lt.s32.totalorder %s2617_s26, %s2617_s26 }
  0xe1   :  { %248 = vadd.xlane.f32.xlu0 %v247_v12  ;;  %214 = vadd.xlane.f32.xlu1 %v213_v13  ;;  %v3015_v12 = vld [vmem:[%s3374_s17] sm:$0xff] }
  0xe2   :  { %2102 = vmatpush3.bf16.msra.mxu1 %v2277_v17  ;;  %p2624_p7 = por %p2623_p6, %p2622_p5 }
  0xe3   :  { %2103 = vmatprep.subr.bf16.mxu1 %v2666_v15 }
  0xe4   :  { %p2625_p8 = pnand %p2624_p7, %p2618_p4 }
  0xe6   :  { %2104 = vmatpush3.bf16.msra.mxu1 %v2278_v18 }
  0xe7   :  { %2109 = vmatprep.subr.bf16.mxu1 %v2666_v15 }
 0x16a   :  { %v246_v19 = vpop.xlane.xlu0 %245  ;;  %v212_v21 = vpop.xlane.xlu1 %211 }
 0x16b   :  { %v250_v20 = vmul.f32 0.015625, %v246_v19  ;;  %v217_v27 = vmul.f32 0.015625, %v212_v21 }
 0x16d   :  { %v252_v22 = vadd.f32 1e-08, %v250_v20  ;;  %v219_v29 = vadd.f32 1e-08, %v217_v27 }
 0x16e   :  { %v249_v23 = vpop.xlane.xlu0 %248  ;;  %v215_v26 = vpop.xlane.xlu1 %214 }
 0x16f   :  { %2319 = vrsqrt.f32 %v252_v22  ;;  %v251_v24 = vmul.f32 0.015625, %v249_v23  ;;  %v218_v28 = vmul.f32 0.015625, %v215_v26  ;;  %v1952_v23 = vld [vmem:[#allocation12] ss:$0 sm:$0xff] }
 0x171   :  { %v253_v25 = vadd.f32 1e-08, %v251_v24  ;;  %v220_v31 = vadd.f32 1e-08, %v218_v28  ;;  %v450_v28 = vlaneseq }
 0x173   :  { %2321 = vrsqrt.f32 %v253_v25 }
 0x174   :  { %2323 = vrsqrt.f32 %v219_v29  ;;  %v3026_v29 = vshrl.u32 %v450_v28, 7 }
 0x175   :  { %2325 = vrsqrt.f32 %v220_v31  ;;  %v448_v31 = vld [vmem:[#allocation14] sm:$0x3] }
 0x179   :  { %v2320_v30 = vpop.eup %2319 }
 0x17a   :  { %v256_v32 = vmul.f32 %v2320_v30, %v2039_v2  ;;  %v452_v30 = vsub.s32 0, %v3026_v29 }
 0x17c   :  { %v258_v36 = vmul.f32 %v1940_v34, %v256_v32  ;;  %v456_v32 = vsub.s32 1, %v3026_v29 }
 0x17d   :  { %v2322_v33 = vpop.eup %2321 }
 0x17e   :  { %v257_v35 = vmul.f32 %v2322_v33, %v2040_v3  ;;  %v2324_v41 = vpop.eup %2323  ;;  %v2283_v3 = vld [vmem:[%s3364_s7 + $0x4] ss:$8 sps:$4 sm:$0xff]   ;;  %v453_v33 = vrot.slane %v448_v31, %v452_v30 }
 0x17f   :  { %v2326_v42 = vpop.eup %2325  ;;  %v223_v44 = vmul.f32 %v2324_v41, %v2942_v4  ;;  %v2285_v4 = vld [vmem:[%s3364_s7] ss:$8 sps:$4 sm:$0xff]   ;;  %503 = vmatprep.subr.bf16.mxu0 %v2283_v3 }
 0x180   :  { %v259_v37 = vmul.f32 %v1940_v34, %v257_v35  ;;  %v224_v45 = vmul.f32 %v2326_v42, %v2944_v5  ;;  %v2286_v5 = vld [vmem:[%s3364_s7 + $0x14] ss:$8 sps:$4 sm:$0xff]   ;;  %504 = vmatpush1.bf16.msra.mxu0 %v2285_v4  ;;  %s2670_s7 = smov 96  }
 0x181   :  { %v231_v47 = vmul.f32 %v1940_v34, %v223_v44  ;;  %505 = vmatprep.subr.bf16.mxu0 %v2286_v5 }
 0x182   :  { %v260_v39 = vpack.c.bf16 %v259_v37, %v258_v36  ;;  %v232_v48 = vmul.f32 %v1940_v34, %v224_v45  ;;  %v457_v34 = vrot.slane %v448_v31, %v456_v32 }
 0x184   :  { %2106 = vmatmul.mubr.msk.bf16.vlgmr.msra.gmra.mrb[0].mxu1 %vm209_vm0, %v260_v39  ;;  %v233_v49 = vpack.c.bf16 %v232_v48, %v231_v47  ;;  %506 = vmatpush1.bf16.msra.mxu0 %v2288_v6  ;;  %v551_v6 = vand.u32 127, %v450_v28 }
 0x185   :  { %2110 = vmatpush3.bf16.msra.mxu1 %v2279_v38  ;;  %2117 = vmatprep.mubr.msk.bf16.mxu1 %vm2667_vm1, %v2666_v15 }
 0x186   :  { %2111 = vmatprep.subr.bf16.mxu1 %v2666_v15  ;;  %507 = vmatprep.subr.bf16.mxu0 %v2289_v7  ;;  %vm552_vm3 = vcmp.ge.s32.totalorder %v3026_v29, %v551_v6  ;;  %v2671_v7 = vmov -1e+30  }
 0x188   :  { %508 = vmatpush1.bf16.msra.mxu0 %v2291_v9  ;;  %v3080_v9 = vsel %vm552_vm3, 0.0, %v2671_v7 }
 0x189   :  { %2112 = vmatpush3.bf16.msra.mxu1 %v2280_v40  ;;  %509 = vmatprep.subr.bf16.mxu0 %v2292_v10 }
 0x18a   :  { %2113 = vmatprep.subr.bf16.mxu1 %v2666_v15 }
 0x18c   :  { %510 = vmatpush1.bf16.msra.mxu0 %v2294_v11 }
 0x18d   :  { %2114 = vmatpush3.bf16.msra.mxu1 %v2281_v43  ;;  %2133 = vmatprep.subr.bf16.mxu0 %v2666_v15 }
 0x18e   :  { %2115 = vmatprep.subr.bf16.mxu1 %v2666_v15 }
 0x191   :  { %2116 = vmatpush3.bf16.msra.mxu1 %v2282_v46 }
 0x192   :  { %2121 = vmatprep.subr.bf16.mxu1 %v2666_v15 }
 0x194   :  { %2118 = vmatmul.mubr.msk.bf16.vlgmr.msra.gmra.mrb[4].mxu1 %vm209_vm0, %v233_v49  ;;  %v3053_v49 = vld [vmem:[%s3373_s16] sm:$0xff]  ;;  %s2672_s16 = smov 80  }
 0x195   :  { %2123 = vmatprep.mubr.msk.bf16.mxu1 %vm2667_vm1, %v2666_v15 }
 0x257   :  { %v330_v50 = vpop.f32.mrb[0].mxu1 }
 0x258   :  { %v2107_v51 = vpop.f32.mrb[1].mxu1 }
 0x259   :  { %v333_v52 = vpop.f32.mrb[2].mxu1 }
 0x25a   :  { %v2108_v53 = vpop.f32.mrb[3].mxu1 }
 0x267   :  { %v398_v54 = vpop.f32.mrb[4].mxu1 }
 0x268   :  { %v399_v56 = vadd.f32 %v398_v54, %v330_v50  ;;  %v2119_v57 = vpop.f32.mrb[5].mxu1 }
 0x269   :  { %v401_v58 = vpop.f32.mrb[6].mxu1 }
 0x26a   :  { %v2976_v59 = vadd.f32 %v1951_v55, %v399_v56  ;;  %v402_v60 = vadd.f32 %v401_v58, %v333_v52  ;;  %v2120_v61 = vpop.f32.mrb[7].mxu1 }
 0x26c   :  { %v2978_v62 = vadd.f32 %v1951_v55, %v402_v60  ;;  %v415_v63 = vmul.f32 %v2976_v59, %v2976_v59 }
 0x26e   :  { %v417_v0 = vsel %vm209_vm0, %v415_v63, 0.0  ;;  %v416_v1 = vmul.f32 %v2978_v62, %v2978_v62 }
 0x26f   :  { %418 = vadd.xlane.f32.xlu0 %v417_v0 }
 0x270   :  { %v420_v2 = vsel %vm209_vm0, %v416_v1, 0.0 }
 0x271   :  { %421 = vadd.xlane.f32.xlu1 %v420_v2 }
 0x282   :  { %584 = vrot.lane.b32.xlu1 %v3015_v12, %s2655_s25 }
 0x285   :  { %557 = vrot.lane.b32.xlu0 %v3015_v12, %s2669_s4 }
 0x2fc   :  { %v419_v13 = vpop.xlane.xlu0 %418 }
 0x2fd   :  { %v423_v14 = vmul.f32 0.015625, %v419_v13 }
 0x2fe   :  { %v422_v16 = vpop.xlane.xlu1 %421 }
 0x2ff   :  { %v425_v17 = vadd.f32 1e-08, %v423_v14  ;;  %v424_v18 = vmul.f32 0.015625, %v422_v16 }
 0x300   :  { %v558_v39 = vpop.permute.xlu0 %557 }
 0x301   :  { %2327 = vrsqrt.f32 %v425_v17  ;;  %v426_v19 = vadd.f32 1e-08, %v424_v18 }
 0x302   :  { %v585_v36 = vpop.permute.xlu1 %584 }
 0x303   :  { %2329 = vrsqrt.f32 %v426_v19 }
 0x30b   :  { %v2328_v20 = vpop.eup %2327 }
 0x30c   :  { %v429_v21 = vmul.f32 %v2328_v20, %v2976_v59 }
 0x30d   :  { %v2330_v22 = vpop.eup %2329 }
 0x30e   :  { %v430_v24 = vmul.f32 %v2330_v22, %v2978_v62  ;;  %v437_v25 = vmul.f32 %v1952_v23, %v429_v21 }
 0x310   :  { %v438_v26 = vmul.f32 %v1952_v23, %v430_v24 }
 0x312   :  { %v439_v27 = vpack.c.bf16 %v438_v26, %v437_v25 }
 0x314   :  { %1961 = vmatmul.mubr.msk.bf16.vlgmr.msra.gmra.mrb[0].mxu0 %vm209_vm0, %v439_v27 }
 0x315   :  { %2135 = vmatprep.mubr.msk.bf16.mxu0 %vm2667_vm1, %v2666_v15 }
 0x3e7   :  { %v537_v35 = vpop.f32.mrb[0].mxu0 }
 0x3e8   :  { %v3034_v37 = vadd.f32 %v537_v35, %v453_v33  ;;  %v539_v38 = vpop.f32.mrb[1].mxu0 }
 0x3e9   :  { %v3036_v40 = vadd.f32 %v539_v38, %v457_v34  ;;  %v541_v41 = vpop.f32.mrb[2].mxu0 }
 0x3ea   :  { %v543_v42 = vpop.f32.mrb[3].mxu0  ;;  %v587_v43 = vmul.f32 %v585_v36, %v3034_v37  ;;  %v3044_v46 = vadd.f32 %v541_v41, %v453_v33  ;;  %v582_v57 = vmul.f32 %v3053_v49, %v3034_v37 }
 0x3eb   :  { %v560_v44 = vmul.f32 %v558_v39, %v3036_v40  ;;  %v3040_v45 = vadd.f32 %v543_v42, %v457_v34  ;;  %v554_v50 = vmul.f32 %v3053_v49, %v3036_v40  ;;  %v3098_v42 = vpack.c.bf16 %v3036_v40, %v3036_v40 }
 0x3ec   :  { %591 = vrot.lane.b32.xlu0 %v587_v43, %s2655_s25  ;;  %v588_v48 = vmul.f32 %v585_v36, %v3044_v46  ;;  %v583_v3 = vmul.f32 %v3053_v49, %v3044_v46 }
 0x3ed   :  { %564 = vrot.lane.b32.xlu1 %v560_v44, %s2670_s7  ;;  %v561_v47 = vmul.f32 %v558_v39, %v3040_v45  ;;  %v555_v54 = vmul.f32 %v3053_v49, %v3040_v45  ;;  %v3102_v43 = vpack.c.bf16 %v3040_v45, %v3040_v45 }
 0x3f1   :  { %566 = vrot.lane.b32.xlu1 %v561_v47, %s2670_s7 }
 0x3f5   :  { %593 = vrot.lane.b32.xlu1 %v588_v48, %s2655_s25 }
 0x45e   :  { %v592_v55 = vpop.permute.xlu0 %591 }
 0x45f   :  { %v565_v51 = vpop.permute.xlu1 %564  ;;  %v597_v61 = vadd.f32 %v592_v55, %v582_v57 }
 0x460   :  { %v570_v52 = vadd.f32 %v565_v51, %v554_v50 }
 0x461   :  { %v2021_v0 = vpack.c.bf16 %v597_v61, %v597_v61 }
 0x462   :  { %v2019_v53 = vpack.c.bf16 %v570_v52, %v570_v52 }
 0x463   :  { %v567_v56 = vpop.permute.xlu1 %566 }
 0x464   :  { %v3062_v58 = vsel %vm605_vm2, %v2019_v53, 0  ;;  %v571_v60 = vadd.f32 %v567_v56, %v555_v54 }
 0x465   :  { %2122 = vmatpush3.bf16.xpose.msra.mxu1 %v3062_v58 }
 0x466   :  { %2127 = vmatprep.subr.bf16.mxu1 %v2666_v15  ;;  %v2020_v63 = vpack.c.bf16 %v571_v60, %v571_v60 }
 0x467   :  { %v594_v1 = vpop.permute.xlu1 %593 }
 0x468   :  { %v3067_v2 = vsel %vm605_vm2, %v2020_v63, 0  ;;  %v598_v4 = vadd.f32 %v594_v1, %v583_v3 }
 0x46a   :  { %v2022_v5 = vpack.c.bf16 %v598_v4, %v598_v4 }
 0x46c   :  { %2124 = vmatmul.mubr.msk.bf16.vlgmr.msra.gmra.mrb[8].mxu1 %vm605_vm2, %v2021_v0 }
 0x46d   :  { %2128 = vmatpush3.bf16.xpose.msra.mxu1 %v3067_v2  ;;  %2129 = vmatprep.mubr.msk.bf16.mxu1 %vm2667_vm1, %v2666_v15 }
 0x46e   :  { %2139 = vmatprep.subr.bf16.mxu1 %v2666_v15 }
 0x474   :  { %2130 = vmatmul.mubr.msk.bf16.vlgmr.msra.gmra.mrb[12].mxu1 %vm605_vm2, %v2022_v5 }
 0x475   :  { %2141 = vmatprep.mubr.msk.bf16.mxu1 %vm2667_vm1, %v2666_v15 }
 0x53f   :  { %v646_v10 = vpop.f32.mrb[8].mxu1 }
 0x540   :  { %v647_v11 = vadd.f32 %v646_v10, %v3080_v9  ;;  %v2125_v13 = vpop.f32.mrb[9].mxu1 }
 0x541   :  { %v649_v14 = vpop.f32.mrb[10].mxu1 }
 0x542   :  { %v2126_v16 = vpop.f32.mrb[11].mxu1  ;;  %v699_v17 = vsel %vm698_vm4, %v647_v11, -inf }
 0x543   :  { %700 = vmax.xlane.f32.xlu0 %v699_v17 }
 0x547   :  { %v692_v18 = vpop.f32.mrb[12].mxu1 }
 0x548   :  { %v693_v19 = vadd.f32 %v692_v18, %v3080_v9  ;;  %v2131_v20 = vpop.f32.mrb[13].mxu1 }
 0x549   :  { %v695_v21 = vpop.f32.mrb[14].mxu1 }
 0x54a   :  { %v2132_v22 = vpop.f32.mrb[15].mxu1  ;;  %v702_v23 = vsel %vm698_vm4, %v693_v19, -inf }
 0x54b   :  { %703 = vmax.xlane.f32.xlu1 %v702_v23 }
 0x559   :  { %830 = vrot.lane.b32.xlu0 %v3015_v12, %s2672_s16 }
 0x55c   :  { %825 = vrot.lane.b32.xlu1 %v3053_v49, %s2673_s1 }
 0x5d0   :  { %v701_v24 = vpop.xlane.xlu0 %700 }
 0x5d1   :  { %v705_v28 = vsub.f32 %v647_v11, %v701_v24 }
 0x5d3   :  { %v707_v33 = vmul.f32 1.442695, %v705_v28 }
 0x5d4   :  { %v831_v25 = vpop.permute.xlu0 %830 }
 0x5d5   :  { %v833_v26 = vmul.f32 %v831_v25, %v3034_v37  ;;  %v834_v27 = vmul.f32 %v831_v25, %v3044_v46  ;;  %2331 = vpow2.f32 %v707_v33 }
 0x5d7   :  { %837 = vrot.lane.b32.xlu0 %v833_v26, %s2655_s25  ;;  %839 = vrot.lane.b32.xlu1 %v834_v27, %s2655_s25 }
 0x5d8   :  { %v704_v31 = vpop.xlane.xlu1 %703 }
 0x5d9   :  { %v706_v34 = vsub.f32 %v693_v19, %v704_v31 }
 0x5db   :  { %v709_v35 = vmul.f32 1.442695, %v706_v34 }
 0x5dc   :  { %v3108_v44 = vpop.permute.xlu1 %825 }
 0x5dd   :  { %2333 = vpow2.f32 %v709_v35  ;;  %v828_v47 = vmul.f32 %v3108_v44, %v3034_v37  ;;  %v829_v48 = vmul.f32 %v3108_v44, %v3044_v46 }
 0x5df   :  { %v2332_v36 = vpop.eup %2331 }
 0x5e0   :  { %v711_v38 = vsel %vm698_vm4, %v2332_v36, 0.0 }
 0x5e7   :  { %v2334_v39 = vpop.eup %2333 }
 0x5e8   :  { %v714_v41 = vsel %vm698_vm4, %v2334_v39, 0.0 }
 0x5f6   :  { %712 = vadd.xlane.f32.xlu0 %v711_v38 }
 0x5fb   :  { %715 = vadd.xlane.f32.xlu1 %v714_v41 }
 0x60c   :  { %724 = vrot.lane.b32.xlu0 %v3098_v42, %s2655_s25  ;;  %774 = vrot.lane.b32.xlu1 %v3102_v43, %s2655_s25 }
 0x649   :  { %v838_v50 = vpop.permute.xlu0 %837  ;;  %v840_v51 = vpop.permute.xlu1 %839 }
 0x64a   :  { %v843_v52 = vadd.f32 %v838_v50, %v828_v47  ;;  %v844_v53 = vadd.f32 %v840_v51, %v829_v48 }
 0x64c   :  { %v2025_v54 = vpack.c.bf16 %v843_v52, %v843_v52  ;;  %v2026_v55 = vpack.c.bf16 %v844_v53, %v844_v53 }
 0x64e   :  { %850 = vrot.lane.b32.xlu0 %v2025_v54, %s2674_s13  ;;  %896 = vrot.lane.b32.xlu1 %v2026_v55, %s2674_s13 }
 0x652   :  { %1060 = vrot.lane.b32.xlu0 %v3015_v12, %s2675_s21 }
 0x683   :  { %v713_v56 = vpop.xlane.xlu0 %712 }
 0x684   :  { %2335 = vrcp.f32 %v713_v56 }
 0x687   :  { %v725_v57 = vpop.permute.xlu0 %724 }
 0x688   :  { %v731_v60 = vsel %vm729_vm5, %v725_v57, 0  ;;  %v716_v61 = vpop.xlane.xlu1 %715 }
 0x689   :  { %2337 = vrcp.f32 %v716_v61  ;;  %2134 = vmatpush3.bf16.msra.mxu0 %v731_v60 }
 0x68a   :  { %2145 = vmatprep.subr.bf16.mxu0 %v2666_v15 }
 0x68c   :  { %v775_v63 = vpop.permute.xlu1 %774 }
 0x68d   :  { %v780_v0 = vsel %vm729_vm5, %v775_v63, 0 }
 0x68e   :  { %v2336_v1 = vpop.eup %2335  ;;  %2140 = vmatpush3.bf16.msra.mxu1 %v780_v0 }
 0x68f   :  { %v719_v3 = vmul.f32 %v2336_v1, %v2332_v36  ;;  %2151 = vmatprep.subr.bf16.mxu1 %v2666_v15  ;;  %v1058_v1 = vmul.f32 %v3108_v44, %v3036_v40 }
 0x691   :  { %v721_v4 = vpack.c.bf16 %v719_v3, %v719_v3  ;;  %v1059_v3 = vmul.f32 %v3108_v44, %v3040_v45 }
 0x693   :  { %v2338_v5 = vpop.eup %2337  ;;  %2136 = vmatmul.mubr.msk.bf16.vlgmr.msra.gmra.mrb[4].mxu0 %vm698_vm4, %v721_v4 }
 0x694   :  { %v720_v6 = vmul.f32 %v2338_v5, %v2334_v39  ;;  %2146 = vmatpush3.bf16.xpose.msra.mxu0 %v3062_v58  ;;  %2147 = vmatprep.mubr.msk.bf16.mxu0 %vm2667_vm1, %v2666_v15 }
 0x695   :  { %2157 = vmatprep.subr.bf16.mxu0 %v2666_v15 }
 0x696   :  { %v722_v7 = vpack.c.bf16 %v720_v6, %v720_v6 }
 0x698   :  { %2142 = vmatmul.mubr.msk.bf16.vlgmr.msra.gmra.mrb[16].mxu1 %vm698_vm4, %v722_v7 }
 0x699   :  { %2152 = vmatpush3.bf16.xpose.msra.mxu1 %v3067_v2  ;;  %2153 = vmatprep.mubr.msk.bf16.mxu1 %vm2667_vm1, %v2666_v15 }
 0x69a   :  { %2163 = vmatprep.subr.bf16.mxu1 %v2666_v15 }
 0x6c0   :  { %v851_v10 = vpop.permute.xlu0 %850  ;;  %v897_v11 = vpop.permute.xlu1 %896 }
 0x6c1   :  { %2148 = vmatmul.mubr.msk.bf16.vlgmr.msra.gmra.mrb[8].mxu0 %vm605_vm2, %v851_v10  ;;  %2154 = vmatmul.mubr.msk.bf16.vlgmr.msra.gmra.mrb[20].mxu1 %vm605_vm2, %v897_v11 }
 0x6c2   :  { %2158 = vmatpush3.bf16.msra.mxu0 %v731_v60  ;;  %2164 = vmatpush3.bf16.msra.mxu1 %v780_v0 }
 0x6c3   :  { %2165 = vmatprep.mubr.msk.bf16.mxu1 %vm2667_vm1, %v2666_v15  ;;  %2175 = vmatprep.subr.bf16.mxu1 %v2666_v15 }
 0x6c4   :  { %2159 = vmatprep.mubr.msk.bf16.mxu0 %vm2667_vm1, %v2666_v15  ;;  %2169 = vmatprep.subr.bf16.mxu0 %v2666_v15  ;;  %v1061_v36 = vpop.permute.xlu0 %1060 }
 0x6c5   :  { %v1063_v38 = vmul.f32 %v1061_v36, %v3036_v40  ;;  %v1064_v39 = vmul.f32 %v1061_v36, %v3040_v45 }
 0x766   :  { %v767_v58 = vpop.f32.mrb[4].mxu0 }
 0x767   :  { %v2137_v2 = vpop.f32.mrb[5].mxu0 }
 0x768   :  { %v770_v13 = vpop.f32.mrb[6].mxu0 }
 0x769   :  { %v2138_v14 = vpop.f32.mrb[7].mxu0 }
 0x76b   :  { %v816_v16 = vpop.f32.mrb[16].mxu1 }
 0x76c   :  { %v822_v17 = vpack.c.bf16 %v816_v16, %v767_v58  ;;  %v2143_v18 = vpop.f32.mrb[17].mxu1 }
 0x76d   :  { %v819_v19 = vpop.f32.mrb[18].mxu1 }
 0x76e   :  { %823 = vst.msk [vmem:[#allocation2] sm:$0xff] %vm605_vm2, %v822_v17  ;;  %v2144_v20 = vpop.f32.mrb[19].mxu1 }
 0x794   :  { %v889_v21 = vpop.f32.mrb[8].mxu0  ;;  %v935_v22 = vpop.f32.mrb[20].mxu1 }
 0x795   :  { %v890_v23 = vadd.f32 %v889_v21, %v3080_v9  ;;  %v936_v24 = vadd.f32 %v935_v22, %v3080_v9  ;;  %v2149_v25 = vpop.f32.mrb[9].mxu0  ;;  %v2155_v26 = vpop.f32.mrb[21].mxu1 }
 0x796   :  { %v892_v27 = vpop.f32.mrb[10].mxu0  ;;  %v938_v28 = vpop.f32.mrb[22].mxu1 }
 0x797   :  { %v2150_v31 = vpop.f32.mrb[11].mxu0  ;;  %v2156_v33 = vpop.f32.mrb[23].mxu1  ;;  %v941_v34 = vsel %vm698_vm4, %v890_v23, -inf  ;;  %v944_v35 = vsel %vm698_vm4, %v936_v24, -inf }
 0x798   :  { %942 = vmax.xlane.f32.xlu1 %v941_v34  ;;  %945 = vmax.xlane.f32.xlu0 %v944_v35 }
 0x7a9   :  { %1067 = vrot.lane.b32.xlu1 %v1063_v38, %s2670_s7 }
 0x7ad   :  { %1069 = vrot.lane.b32.xlu1 %v1064_v39, %s2670_s7 }
 0x7ae   :  { %1084 = vrot.lane.b32.xlu0 %v3015_v12, %s2670_s7 }
 0x7b2   :  { %1079 = vrot.lane.b32.xlu0 %v3053_v49, %s2669_s4 }
 0x825   :  { %v946_v41 = vpop.xlane.xlu0 %945  ;;  %v943_v52 = vpop.xlane.xlu1 %942 }
 0x826   :  { %v948_v51 = vsub.f32 %v936_v24, %v946_v41  ;;  %v947_v54 = vsub.f32 %v890_v23, %v943_v52 }
 0x828   :  { %v951_v53 = vmul.f32 1.442695, %v948_v51  ;;  %v949_v55 = vmul.f32 1.442695, %v947_v54 }
 0x829   :  { %v1085_v47 = vpop.permute.xlu0 %1084  ;;  %v1068_v63 = vpop.permute.xlu1 %1067 }
 0x82a   :  { %v1088_v48 = vmul.f32 %v1085_v47, %v3044_v46  ;;  %v1087_v50 = vmul.f32 %v1085_v47, %v3034_v37  ;;  %2339 = vpow2.f32 %v951_v53  ;;  %v1073_v4 = vadd.f32 %v1068_v63, %v1058_v1 }
 0x82b   :  { %2341 = vpow2.f32 %v949_v55 }
 0x82c   :  { %1093 = vrot.lane.b32.xlu0 %v1088_v48, %s2655_s25  ;;  %1091 = vrot.lane.b32.xlu1 %v1087_v50, %s2655_s25  ;;  %v2028_v6 = vpack.c.bf16 %v1073_v4, %v1073_v4 }
 0x82d   :  { %v1070_v0 = vpop.permute.xlu1 %1069  ;;  %v1080_v10 = vpop.permute.xlu0 %1079 }
 0x82e   :  { %v1074_v5 = vadd.f32 %v1070_v0, %v1059_v3  ;;  %v1082_v11 = vmul.f32 %v1080_v10, %v3034_v37  ;;  %v1083_v58 = vmul.f32 %v1080_v10, %v3044_v46 }
 0x830   :  { %v2030_v7 = vpack.c.bf16 %v1074_v5, %v1074_v5 }
 0x834   :  { %v2340_v56 = vpop.eup %2339 }
 0x835   :  { %v956_v57 = vsel %vm698_vm4, %v2340_v56, 0.0  ;;  %v2342_v60 = vpop.eup %2341 }
 0x836   :  { %v953_v61 = vsel %vm698_vm4, %v2342_v60, 0.0 }
 0x84b   :  { %957 = vadd.xlane.f32.xlu0 %v956_v57 }
 0x850   :  { %954 = vadd.xlane.f32.xlu1 %v953_v61 }
 0x861   :  { %1107 = vrot.lane.b32.xlu0 %v2028_v6, %s2674_s13  ;;  %1159 = vrot.lane.b32.xlu1 %v2030_v7, %s2674_s13 }
 0x89e   :  { %v1092_v2 = vpop.permute.xlu1 %1091  ;;  %v1094_v13 = vpop.permute.xlu0 %1093 }
 0x89f   :  { %v1097_v14 = vadd.f32 %v1092_v2, %v1082_v11  ;;  %v1098_v40 = vadd.f32 %v1094_v13, %v1083_v58 }
 0x8a1   :  { %v2027_v16 = vpack.c.bf16 %v1097_v14, %v1097_v14  ;;  %v2029_v17 = vpack.c.bf16 %v1098_v40, %v1098_v40 }
 0x8a3   :  { %1104 = vrot.lane.b32.xlu1 %v2027_v16, %s2670_s7  ;;  %1156 = vrot.lane.b32.xlu0 %v2029_v17, %s2670_s7 }
 0x8d8   :  { %v958_v45 = vpop.xlane.xlu0 %957 }
 0x8d9   :  { %2343 = vrcp.f32 %v958_v45 }
 0x8dc   :  { %v1108_v25 = vpop.permute.xlu0 %1107 }
 0x8dd   :  { %v955_v44 = vpop.xlane.xlu1 %954  ;;  %v3178_v27 = vsel %vm605_vm2, %v1108_v25, 0 }
 0x8de   :  { %2345 = vrcp.f32 %v955_v44 }
 0x8e1   :  { %v1160_v20 = vpop.permute.xlu1 %1159 }
 0x8e2   :  { %v3170_v23 = vsel %vm605_vm2, %v1160_v20, 0 }
 0x8e3   :  { %v2344_v18 = vpop.eup %2343 }
 0x8e4   :  { %v962_v19 = vmul.f32 %v2344_v18, %v2340_v56 }
 0x8e6   :  { %v964_v21 = vpack.c.bf16 %v962_v19, %v962_v19 }
 0x8e8   :  { %v2346_v22 = vpop.eup %2345  ;;  %2166 = vmatmul.mubr.msk.bf16.vlgmr.msra.gmra.mrb[24].mxu1 %vm698_vm4, %v964_v21 }
 0x8e9   :  { %v961_v24 = vmul.f32 %v2346_v22, %v2342_v60  ;;  %2176 = vmatpush3.bf16.xpose.msra.mxu1 %v3170_v23  ;;  %2177 = vmatprep.mubr.msk.bf16.mxu1 %vm2667_vm1, %v2666_v15 }
 0x8ea   :  { %2187 = vmatprep.subr.bf16.mxu1 %v2666_v15 }
 0x8eb   :  { %v963_v26 = vpack.c.bf16 %v961_v24, %v961_v24 }
 0x8ed   :  { %2160 = vmatmul.mubr.msk.bf16.vlgmr.msra.gmra.mrb[12].mxu0 %vm698_vm4, %v963_v26 }
 0x8ee   :  { %2170 = vmatpush3.bf16.xpose.msra.mxu0 %v3178_v27  ;;  %2171 = vmatprep.mubr.msk.bf16.mxu0 %vm2667_vm1, %v2666_v15 }
 0x8ef   :  { %2181 = vmatprep.subr.bf16.mxu0 %v2666_v15 }
 0x915   :  { %v1105_v28 = vpop.permute.xlu1 %1104  ;;  %v1157_v31 = vpop.permute.xlu0 %1156 }
 0x916   :  { %2172 = vmatmul.mubr.msk.bf16.vlgmr.msra.gmra.mrb[16].mxu0 %vm605_vm2, %v1105_v28  ;;  %2178 = vmatmul.mubr.msk.bf16.vlgmr.msra.gmra.mrb[28].mxu1 %vm605_vm2, %v1157_v31 }
 0x917   :  { %2189 = vmatprep.mubr.msk.bf16.mxu1 %vm2667_vm1, %v2666_v15  ;;  %2183 = vmatprep.mubr.msk.bf16.mxu0 %vm2667_vm1, %v2666_v15 }
 0x9bb   :  { %v3191_v33 = vpop.f32.mrb[24].mxu1 }
 0x9bc   :  { %v2167_v34 = vpop.f32.mrb[25].mxu1 }
 0x9bd   :  { %v1048_v35 = vpop.f32.mrb[26].mxu1 }
 0x9be   :  { %v2168_v36 = vpop.f32.mrb[27].mxu1 }
 0x9c0   :  { %v3193_v38 = vpop.f32.mrb[12].mxu0 }
 0x9c1   :  { %v1051_v39 = vpack.c.bf16 %v3191_v33, %v3193_v38  ;;  %v2161_v41 = vpop.f32.mrb[13].mxu0 }
 0x9c2   :  { %v1005_v47 = vpop.f32.mrb[14].mxu0 }
 0x9c3   :  { %v2162_v48 = vpop.f32.mrb[15].mxu0 }
 0x9e9   :  { %v1149_v50 = vpop.f32.mrb[16].mxu0  ;;  %v1201_v51 = vpop.f32.mrb[28].mxu1 }
 0x9ea   :  { %v1150_v52 = vadd.f32 %v1149_v50, %v3080_v9  ;;  %v1202_v53 = vadd.f32 %v1201_v51, %v3080_v9  ;;  %v2173_v54 = vpop.f32.mrb[17].mxu0  ;;  %v2179_v55 = vpop.f32.mrb[29].mxu1 }
 0x9eb   :  { %v1152_v56 = vpop.f32.mrb[18].mxu0  ;;  %v1204_v57 = vpop.f32.mrb[30].mxu1 }
 0x9ec   :  { %v2174_v60 = vpop.f32.mrb[19].mxu0  ;;  %v2180_v61 = vpop.f32.mrb[31].mxu1  ;;  %v1207_v63 = vsel %vm698_vm4, %v1150_v52, -inf  ;;  %v1210_v0 = vsel %vm698_vm4, %v1202_v53, -inf }
 0x9ed   :  { %1208 = vmax.xlane.f32.xlu1 %v1207_v63  ;;  %1211 = vmax.xlane.f32.xlu0 %v1210_v0 }
 0x9fe   :  { %1334 = vrot.lane.b32.xlu1 %v3053_v49, %s2675_s21 }
 0xa03   :  { %1339 = vrot.lane.b32.xlu0 %v3015_v12, %s2674_s13 }
 0xa7a   :  { %v1212_v1 = vpop.xlane.xlu0 %1211  ;;  %v1209_v7 = vpop.xlane.xlu1 %1208 }
 0xa7b   :  { %v1214_v6 = vsub.f32 %v1202_v53, %v1212_v1  ;;  %v1213_v11 = vsub.f32 %v1150_v52, %v1209_v7 }
 0xa7d   :  { %v1217_v10 = vmul.f32 1.442695, %v1214_v6  ;;  %v1215_v58 = vmul.f32 1.442695, %v1213_v11 }
 0xa7e   :  { %v1340_v3 = vpop.permute.xlu0 %1339  ;;  %v1335_v14 = vpop.permute.xlu1 %1334 }
 0xa7f   :  { %v1343_v4 = vmul.f32 %v1340_v3, %v3044_v46  ;;  %v1342_v5 = vmul.f32 %v1340_v3, %v3034_v37  ;;  %2347 = vpow2.f32 %v1217_v10  ;;  %v1338_v40 = vmul.f32 %v1335_v14, %v3044_v46 }
 0xa80   :  { %2349 = vpow2.f32 %v1215_v58  ;;  %v1337_v16 = vmul.f32 %v1335_v14, %v3034_v37 }
 0xa81   :  { %1348 = vrot.lane.b32.xlu0 %v1343_v4, %s2655_s25  ;;  %1346 = vrot.lane.b32.xlu1 %v1342_v5, %s2655_s25 }
 0xa89   :  { %v2348_v49 = vpop.eup %2347 }
 0xa8a   :  { %v1222_v12 = vsel %vm698_vm4, %v2348_v49, 0.0  ;;  %v2350_v2 = vpop.eup %2349 }
 0xa8b   :  { %v1219_v13 = vsel %vm698_vm4, %v2350_v2, 0.0 }
 0xaa0   :  { %1223 = vadd.xlane.f32.xlu0 %v1222_v12 }
 0xaa5   :  { %1220 = vadd.xlane.f32.xlu1 %v1219_v13 }
 0xab6   :  { %1231 = vrot.lane.b32.xlu0 %v3098_v42, %s2675_s21  ;;  %1279 = vrot.lane.b32.xlu1 %v3102_v43, %s2675_s21 }
 0xaf3   :  { %v1349_v17 = vpop.permute.xlu0 %1348  ;;  %v1347_v44 = vpop.permute.xlu1 %1346 }
 0xaf4   :  { %v1353_v45 = vadd.f32 %v1349_v17, %v1338_v40  ;;  %v1352_v18 = vadd.f32 %v1347_v44, %v1337_v16 }
 0xaf6   :  { %v2032_v19 = vpack.c.bf16 %v1353_v45, %v1353_v45  ;;  %v2031_v20 = vpack.c.bf16 %v1352_v18, %v1352_v18 }
 0xaf8   :  { %1405 = vrot.lane.b32.xlu0 %v2032_v19, %s2672_s16  ;;  %1359 = vrot.lane.b32.xlu1 %v2031_v20, %s2672_s16  ;;  %v2295_v19 = vld [vmem:[#allocation15] sm:$0xff]   ;;  %v2296_v20 = vld [vmem:[#allocation15 + $0x8] sm:$0xff]  }
 0xb2d   :  { %v1224_v21 = vpop.xlane.xlu0 %1223 }
 0xb2e   :  { %2351 = vrcp.f32 %v1224_v21  ;;  %v2297_v21 = vld [vmem:[#allocation15 + $0x10] sm:$0xff]  }
 0xb31   :  { %v1232_v42 = vpop.permute.xlu0 %1231 }
 0xb32   :  { %v1237_v43 = vsel %vm729_vm5, %v1232_v42, 0  ;;  %v1221_v22 = vpop.xlane.xlu1 %1220  ;;  %v2298_v42 = vld [vmem:[#allocation15 + $0x18] sm:$0xff]  }
 0xb33   :  { %2182 = vmatpush3.bf16.msra.mxu0 %v1237_v43  ;;  %2353 = vrcp.f32 %v1221_v22 }
 0xb34   :  { %2193 = vmatprep.subr.bf16.mxu0 %v2666_v15 }
 0xb36   :  { %v1280_v37 = vpop.permute.xlu1 %1279 }
 0xb37   :  { %v1285_v24 = vsel %vm729_vm5, %v1280_v37, 0 }
 0xb38   :  { %v2352_v46 = vpop.eup %2351  ;;  %2188 = vmatpush3.bf16.msra.mxu1 %v1285_v24 }
 0xb39   :  { %v1228_v25 = vmul.f32 %v2352_v46, %v2348_v49  ;;  %2199 = vmatprep.subr.bf16.mxu1 %v2666_v15 }
 0xb3b   :  { %v1230_v26 = vpack.c.bf16 %v1228_v25, %v1228_v25 }
 0xb3d   :  { %2190 = vmatmul.mubr.msk.bf16.vlgmr.msra.gmra.mrb[32].mxu1 %vm698_vm4, %v1230_v26  ;;  %v2354_v28 = vpop.eup %2353 }
 0xb3e   :  { %2201 = vmatprep.mubr.msk.bf16.mxu1 %vm2667_vm1, %v2666_v15  ;;  %v1227_v31 = vmul.f32 %v2354_v28, %v2350_v2 }
 0xb40   :  { %v1229_v34 = vpack.c.bf16 %v1227_v31, %v1227_v31 }
 0xb41   :  { %2200 = vmatpush3.bf16.xpose.msra.mxu1 %v3170_v23 }
 0xb42   :  { %2184 = vmatmul.mubr.msk.bf16.vlgmr.msra.gmra.mrb[20].mxu0 %vm698_vm4, %v1229_v34  ;;  %2211 = vmatprep.subr.bf16.mxu1 %v2666_v15 }
 0xb43   :  { %2194 = vmatpush3.bf16.xpose.msra.mxu0 %v3178_v27  ;;  %2195 = vmatprep.mubr.msk.bf16.mxu0 %vm2667_vm1, %v2666_v15 }
 0xb44   :  { %2205 = vmatprep.subr.bf16.mxu0 %v2666_v15 }
 0xb6a   :  { %v1406_v35 = vpop.permute.xlu0 %1405  ;;  %v1360_v36 = vpop.permute.xlu1 %1359 }
 0xb6b   :  { %2202 = vmatmul.mubr.msk.bf16.vlgmr.msra.gmra.mrb[36].mxu1 %vm605_vm2, %v1406_v35  ;;  %2196 = vmatmul.mubr.msk.bf16.vlgmr.msra.gmra.mrb[24].mxu0 %vm605_vm2, %v1360_v36  ;;  %v1992_v35 = vld [vmem:[#allocation17] ss:$0 sm:$0xff] }
 0xb6c   :  { %2212 = vmatpush3.bf16.msra.mxu1 %v1285_v24  ;;  %2206 = vmatpush3.bf16.msra.mxu0 %v1237_v43 }
 0xb6d   :  { %2207 = vmatprep.mubr.msk.bf16.mxu0 %vm2667_vm1, %v2666_v15  ;;  %2213 = vmatprep.mubr.msk.bf16.mxu1 %vm2667_vm1, %v2666_v15 }
 0xb6e   :  { %2217 = vmatprep.subr.bf16.mxu0 %v2666_v15 }
 0xc10   :  { %v1321_v23 = vpop.f32.mrb[32].mxu1 }
 0xc11   :  { %v2191_v27 = vpop.f32.mrb[33].mxu1 }
 0xc12   :  { %v1324_v41 = vpop.f32.mrb[34].mxu1 }
 0xc13   :  { %v2192_v47 = vpop.f32.mrb[35].mxu1 }
 0xc15   :  { %v1273_v48 = vpop.f32.mrb[20].mxu0 }
 0xc16   :  { %v1327_v50 = vpack.c.bf16 %v1321_v23, %v1273_v48  ;;  %v2185_v51 = vpop.f32.mrb[21].mxu0 }
 0xc17   :  { %v1276_v52 = vpop.f32.mrb[22].mxu0 }
 0xc18   :  { %v2186_v53 = vpop.f32.mrb[23].mxu0 }
 0xc3e   :  { %v1444_v54 = vpop.f32.mrb[36].mxu1  ;;  %v1398_v55 = vpop.f32.mrb[24].mxu0 }
 0xc3f   :  { %v1445_v56 = vadd.f32 %v1444_v54, %v3080_v9  ;;  %v2203_v57 = vpop.f32.mrb[37].mxu1  ;;  %v1399_v60 = vadd.f32 %v1398_v55, %v3080_v9  ;;  %v2197_v61 = vpop.f32.mrb[25].mxu0 }
 0xc40   :  { %v1447_v63 = vpop.f32.mrb[38].mxu1  ;;  %v1401_v0 = vpop.f32.mrb[26].mxu0  ;;  %v2302_v57 = vld [vmem:[%s3369_s12 + $0x10] ss:$8 sps:$4 sm:$0xff]   ;;  %v2305_v61 = vld [vmem:[%s3369_s12 + $0x20] ss:$8 sps:$4 sm:$0xff]  }
 0xc41   :  { %v2204_v1 = vpop.f32.mrb[39].mxu1  ;;  %v1453_v3 = vsel %vm698_vm4, %v1445_v56, -inf  ;;  %v2198_v4 = vpop.f32.mrb[27].mxu0  ;;  %v1450_v5 = vsel %vm698_vm4, %v1399_v60, -inf  ;;  %v2310_v63 = vld [vmem:[%s3369_s12 + $0x34] ss:$8 sps:$4 sm:$0xff]  }
 0xc42   :  { %1454 = vmax.xlane.f32.xlu0 %v1453_v3  ;;  %1451 = vmax.xlane.f32.xlu1 %v1450_v5  ;;  %v2308_v0 = vld [vmem:[%s3369_s12 + $0x30] ss:$8 sps:$4 sm:$0xff]  }
 0xc53   :  { %1053 = vrot.lane.b32.xlu1 %v1051_v39, %s2673_s1 }
 0xccf   :  { %v1455_v6 = vpop.xlane.xlu0 %1454  ;;  %v1452_v7 = vpop.xlane.xlu1 %1451 }
 0xcd0   :  { %v1457_v10 = vsub.f32 %v1445_v56, %v1455_v6  ;;  %v1456_v9 = vsub.f32 %v1399_v60, %v1452_v7  ;;  %v2304_v56 = vld [vmem:[%s3369_s12 + $0x14] ss:$8 sps:$4 sm:$0xff]   ;;  %v2307_v60 = vld [vmem:[%s3369_s12 + $0x24] ss:$8 sps:$4 sm:$0xff]  }
 0xcd2   :  { %v1458_v11 = vmul.f32 1.442695, %v1456_v9  ;;  %v1460_v58 = vmul.f32 1.442695, %v1457_v10 }
 0xcd3   :  { %v1054_v49 = vpop.permute.xlu1 %1053 }
 0xcd4   :  { %2355 = vpow2.f32 %v1458_v11  ;;  %1057 = vst.msk [vmem:[#allocation2] sm:$0xff] %vm1056_vm6, %v1054_v49 }
 0xcd5   :  { %2357 = vpow2.f32 %v1460_v58  ;;  %v1998_v58 = vld [vmem:[#allocation18] ss:$0 sm:$0xff] }
 0xcde   :  { %v2356_v12 = vpop.eup %2355 }
 0xcdf   :  { %v1462_v2 = vsel %vm698_vm4, %v2356_v12, 0.0  ;;  %v2358_v13 = vpop.eup %2357 }
 0xce0   :  { %1463 = vadd.xlane.f32.xlu0 %v1462_v2  ;;  %v1465_v14 = vsel %vm698_vm4, %v2358_v13, 0.0 }
 0xce4   :  { %1466 = vadd.xlane.f32.xlu0 %v1465_v14  ;;  %v2311_v14 = vld [vmem:[%s3371_s14] sm:$0xff]  }
 0xcfa   :  { %1329 = vrot.lane.b32.xlu0 %v1327_v50, %s2669_s4 }
 0xd6d   :  { %v1464_v33 = vpop.xlane.xlu0 %1463 }
 0xd6e   :  { %2359 = vrcp.f32 %v1464_v33  ;;  %v2312_v33 = vld [vmem:[%s3371_s14 + $0x8] sm:$0xff]  }
 0xd71   :  { %v1467_v38 = vpop.xlane.xlu0 %1466 }
 0xd72   :  { %2361 = vrcp.f32 %v1467_v38  ;;  %v2313_v38 = vld [vmem:[%s3371_s14 + $0x10] sm:$0xff]  }
 0xd75   :  { %v1330_v39 = vpop.permute.xlu0 %1329 }
 0xd76   :  { %1333 = vst.msk [vmem:[#allocation2] sm:$0xff] %vm1332_vm7, %v1330_v39  ;;  %v2314_v39 = vld [vmem:[%s3371_s14 + $0x18] sm:$0xff]  }
 0xd78   :  { %v2360_v40 = vpop.eup %2359 }
 0xd79   :  { %v1470_v16 = vmul.f32 %v2360_v40, %v2356_v12  ;;  %v2315_v40 = vld [vmem:[%s3371_s14 + $0x20] sm:$0xff]  }
 0xd7b   :  { %v1472_v17 = vpack.c.bf16 %v1470_v16, %v1470_v16  ;;  %v2316_v16 = vld [vmem:[%s3371_s14 + $0x28] sm:$0xff]  }
 0xd7c   :  { %v2362_v45 = vpop.eup %2361 }
 0xd7d   :  { %v1471_v44 = vmul.f32 %v2362_v45, %v2358_v13  ;;  %2208 = vmatmul.mubr.msk.bf16.vlgmr.msra.gmra.mrb[28].mxu0 %vm698_vm4, %v1472_v17  ;;  %v2317_v17 = vld [vmem:[%s3371_s14 + $0x30] sm:$0xff]   ;;  %v2318_v45 = vld [vmem:[%s3371_s14 + $0x38] sm:$0xff]  }
 0xd7e   :  { %2225 = vmatprep.mubr.msk.bf16.mxu0 %vm2667_vm1, %v2666_v15  ;;  %2218 = vmatpush3.bf16.msra.mxu0 %v2295_v19 }
 0xd7f   :  { %v1473_v18 = vpack.c.bf16 %v1471_v44, %v1471_v44  ;;  %2219 = vmatprep.subr.bf16.mxu0 %v2666_v15  ;;  %v1687_v44 = vld [vmem:[#allocation20] sm:$0x3] }
 0xd81   :  { %2214 = vmatmul.mubr.msk.bf16.vlgmr.msra.gmra.mrb[40].mxu1 %vm698_vm4, %v1473_v18  ;;  %v1692_v18 = vrot.slane %v1687_v44, %v452_v30 }
 0xd82   :  { %1774 = vmatprep.mubr.bf16.mxu1 %v2668_v8  ;;  %2220 = vmatpush3.bf16.msra.mxu0 %v2296_v20 }
 0xd83   :  { %2221 = vmatprep.subr.bf16.mxu0 %v2666_v15 }
 0xd86   :  { %2222 = vmatpush3.bf16.msra.mxu0 %v2297_v21 }
 0xd87   :  { %2223 = vmatprep.subr.bf16.mxu0 %v2666_v15 }
 0xd8a   :  { %2224 = vmatpush3.bf16.msra.mxu0 %v2298_v42 }
 0xd8b   :  { %2229 = vmatprep.subr.bf16.mxu0 %v2666_v15 }
 0xe50   :  { %v1511_v43 = vpop.f32.mrb[28].mxu0 }
 0xe51   :  { %v2209_v22 = vpop.f32.mrb[29].mxu0 }
 0xe52   :  { %v1514_v37 = vpop.f32.mrb[30].mxu0 }
 0xe53   :  { %v2210_v8 = vpop.f32.mrb[31].mxu0 }
 0xe54   :  { %v1554_v46 = vpop.f32.mrb[40].mxu1 }
 0xe55   :  { %v1560_v24 = vpack.c.bf16 %v1554_v46, %v1511_v43  ;;  %v2215_v25 = vpop.f32.mrb[41].mxu1 }
 0xe56   :  { %v1557_v26 = vpop.f32.mrb[42].mxu1 }
 0xe57   :  { %1562 = vrot.lane.b32.xlu1 %v1560_v24, %s2675_s21  ;;  %v2216_v28 = vpop.f32.mrb[43].mxu1  ;;  %v1696_v26 = vrot.slane %v1687_v44, %v456_v32 }
 0xec9   :  { %v1563_v31 = vpop.permute.xlu1 %1562 }
 0xeca   :  { %1566 = vst.msk [vmem:[#allocation2] sm:$0xff] %vm1565_vm8, %v1563_v31 }
 0xed1   :  { %v1567_v34 = vld [vmem:[#allocation2] sm:$0xff] }
 0xed2   :  { %2226 = vmatmul.mubr.msk.bf16.vlgmr.msra.gmra.mrb[32].mxu0 %vm209_vm0, %v1567_v34 }
 0xed3   :  { %2245 = vmatprep.mubr.msk.bf16.mxu0 %vm2667_vm1, %v2666_v15  ;;  %2230 = vmatpush3.bf16.msra.mxu0 %v2311_v14 }
 0xed4   :  { %2231 = vmatprep.subr.bf16.mxu0 %v2666_v15 }
 0xed7   :  { %2232 = vmatpush3.bf16.msra.mxu0 %v2312_v33 }
 0xed8   :  { %2233 = vmatprep.subr.bf16.mxu0 %v2666_v15 }
 0xedb   :  { %2234 = vmatpush3.bf16.msra.mxu0 %v2313_v38 }
 0xedc   :  { %2235 = vmatprep.subr.bf16.mxu0 %v2666_v15 }
 0xedf   :  { %2236 = vmatpush3.bf16.msra.mxu0 %v2314_v39 }
 0xee0   :  { %2237 = vmatprep.subr.bf16.mxu0 %v2666_v15 }
 0xee3   :  { %2238 = vmatpush3.bf16.msra.mxu0 %v2315_v40 }
 0xee4   :  { %2239 = vmatprep.subr.bf16.mxu0 %v2666_v15 }
 0xee7   :  { %2240 = vmatpush3.bf16.msra.mxu0 %v2316_v16 }
 0xee8   :  { %2241 = vmatprep.subr.bf16.mxu0 %v2666_v15 }
 0xeeb   :  { %2242 = vmatpush3.bf16.msra.mxu0 %v2317_v17 }
 0xeec   :  { %2243 = vmatprep.subr.bf16.mxu0 %v2666_v15 }
 0xeef   :  { %2244 = vmatpush3.bf16.msra.mxu0 %v2318_v45 }
 0xfa5   :  { %v1644_v36 = vpop.f32.mrb[32].mxu0 }
 0xfa6   :  { %v1645_v23 = vadd.f32 %v1992_v35, %v1644_v36  ;;  %v2227_v27 = vpop.f32.mrb[33].mxu0 }
 0xfa7   :  { %v1647_v41 = vpop.f32.mrb[34].mxu0 }
 0xfa8   :  { %v3265_v47 = vadd.f32 %v1645_v23, %v2976_v59  ;;  %v1648_v48 = vadd.f32 %v1992_v35, %v1647_v41  ;;  %v2228_v50 = vpop.f32.mrb[35].mxu0  ;;  %v2301_v59 = vld [vmem:[%s3369_s12 + $0x4] ss:$8 sps:$4 sm:$0xff]  }
 0xfa9   :  { %1742 = vmatprep.subr.bf16.mxu1 %v2301_v59 }
 0xfaa   :  { %v3268_v51 = vadd.f32 %v1648_v48, %v2978_v62  ;;  %v1654_v52 = vmul.f32 %v3265_v47, %v3265_v47  ;;  %v2299_v62 = vld [vmem:[%s3369_s12] ss:$8 sps:$4 sm:$0xff]  }
 0xfab   :  { %1743 = vmatpush1.bf16.msra.mxu1 %v2299_v62  ;;  %v2010_v48 = vld [vmem:[%s3372_s15] ss:$0 sm:$0xff] }
 0xfac   :  { %v1656_v53 = vsel %vm209_vm0, %v1654_v52, 0.0  ;;  %v1655_v54 = vmul.f32 %v3268_v51, %v3268_v51  ;;  %1744 = vmatprep.subr.bf16.mxu1 %v2304_v56 }
 0xfad   :  { %1657 = vadd.xlane.f32.xlu1 %v1656_v53 }
 0xfae   :  { %v1659_v55 = vsel %vm209_vm0, %v1655_v54, 0.0 }
 0xfaf   :  { %1660 = vadd.xlane.f32.xlu0 %v1659_v55  ;;  %1745 = vmatpush1.bf16.msra.mxu1 %v2302_v57 }
 0xfb0   :  { %1746 = vmatprep.subr.bf16.mxu1 %v2307_v60 }
 0xfb3   :  { %1747 = vmatpush1.bf16.msra.mxu1 %v2305_v61 }
 0xfb4   :  { %1748 = vmatprep.subr.bf16.mxu1 %v2310_v63 }
 0xfb7   :  { %1749 = vmatpush1.bf16.msra.mxu1 %v2308_v0 }
0x103a   :  { %v1658_v1 = vpop.xlane.xlu1 %1657 }
0x103b   :  { %v1662_v3 = vmul.f32 0.015625, %v1658_v1 }
0x103c   :  { %v1661_v4 = vpop.xlane.xlu0 %1660 }
0x103d   :  { %v1664_v5 = vadd.f32 1e-08, %v1662_v3  ;;  %v1663_v6 = vmul.f32 0.015625, %v1661_v4 }
0x103f   :  { %2363 = vrsqrt.f32 %v1664_v5  ;;  %v1665_v7 = vadd.f32 1e-08, %v1663_v6 }
0x1041   :  { %2365 = vrsqrt.f32 %v1665_v7 }
0x1049   :  { %v2364_v10 = vpop.eup %2363 }
0x104a   :  { %v1668_v9 = vmul.f32 %v2364_v10, %v3265_v47 }
0x104b   :  { %v2366_v11 = vpop.eup %2365 }
0x104c   :  { %v1669_v49 = vmul.f32 %v2366_v11, %v3268_v51  ;;  %v1676_v12 = vmul.f32 %v1998_v58, %v1668_v9 }
0x104e   :  { %v1677_v2 = vmul.f32 %v1998_v58, %v1669_v49 }
0x1050   :  { %v1678_v13 = vpack.c.bf16 %v1677_v2, %v1676_v12 }
0x1052   :  { %2007 = vmatmul.mubr.msk.bf16.vlgmr.msra.gmra.mrb[44].mxu1 %vm209_vm0, %v1678_v13 }
0x1125   :  { %v1776_v19 = vpop.f32.mrb[44].mxu1 }
0x1126   :  { %v1777_v20 = vadd.f32 %v1776_v19, %v1692_v18  ;;  %v1778_v21 = vpop.f32.mrb[45].mxu1 }
0x1127   :  { %v1780_v42 = vpop.f32.mrb[46].mxu1  ;;  %v1779_v31 = vadd.f32 %v1778_v21, %v1696_v26 }
0x1128   :  { %v2008_v43 = vmul.f32 -1.442695, %v1777_v20  ;;  %v1781_v22 = vadd.f32 %v1780_v42, %v1692_v18  ;;  %v1782_v37 = vpop.f32.mrb[47].mxu1 }
0x1129   :  { %v1783_v23 = vadd.f32 %v1782_v37, %v1696_v26 }
0x112a   :  { %2367 = vpow2.f32 %v2008_v43  ;;  %v2009_v8 = vmul.f32 -1.442695, %v1781_v22 }
0x112c   :  { %2369 = vpow2.f32 %v2009_v8 }
0x1134   :  { %v2368_v15 = vpop.eup %2367 }
0x1135   :  { %v1791_v46 = vadd.f32 1.0, %v2368_v15 }
0x1136   :  { %v2370_v24 = vpop.eup %2369 }
0x1137   :  { %2371 = vrcp.f32 %v1791_v46  ;;  %v1792_v25 = vadd.f32 1.0, %v2370_v24 }
0x1139   :  { %2373 = vrcp.f32 %v1792_v25 }
0x1141   :  { %v2372_v30 = vpop.eup %2371 }
0x1142   :  { %v1797_v28 = vmul.f32 %v2372_v30, %v1777_v20 }
0x1143   :  { %v2374_v34 = vpop.eup %2373 }
0x1144   :  { %v1799_v35 = vmul.f32 %v1797_v28, %v1779_v31  ;;  %v1798_v36 = vmul.f32 %v2374_v34, %v1781_v22 }
0x1146   :  { %v1800_v27 = vmul.f32 %v1798_v36, %v1783_v23 }
0x1148   :  { %v1801_v41 = vpack.c.bf16 %v1800_v27, %v1799_v35 }
0x114a   :  { %2246 = vmatmul.mubr.bf16.vlgmr.msra.gmra.mrb[36].mxu0 %v1801_v41 }
0x121d   :  { %v1907_v50 = vpop.f32.mrb[36].mxu0 }
0x121e   :  { %v1908_v52 = vadd.f32 %v2010_v48, %v1907_v50  ;;  %v2247_v53 = vpop.f32.mrb[37].mxu0 }
0x121f   :  { %v1910_v54 = vpop.f32.mrb[38].mxu0 }
0x1220   :  { %v1914_v29 = vadd.f32 %v1908_v52, %v3265_v47  ;;  %v1911_v32 = vadd.f32 %v2010_v48, %v1910_v54  ;;  %v2248_v55 = vpop.f32.mrb[39].mxu0 }
0x1222   :  { %1916 = vst.msk [vmem:[#allocation21] sm:$0xff] %vm209_vm0, %v1914_v29  ;;  %v1915_v59 = vadd.f32 %v1911_v32, %v3268_v51 }
0x1224   :  { %1917 = vst.msk [vmem:[#allocation21 + $0x8] sm:$0xff] %vm209_vm0, %v1915_v59 }
0x1225   :  { %2628 = shalt.err (!%p2625_p8)
}
0x1226   :  { %s3386_s30 = sld [smem:[#allocation32_spill]] }
0x122c   :  { %s2629_s8 = scalar_lea.hbm %s3386_s30, 256 }
0x122d   :  { %p2630_p9 = scmp.ne.s32.totalorder %s3386_s30, %s2629_s8  ;;  %p2633_p10 = scmp.lt.u32.totalorder %s2629_s8, %s3386_s30 }
0x122f   :  { %p2635_p11 = pnand %p2633_p10, %p2630_p9 }
0x1231   :  { %2638 = shalt.err (!%p2635_p11)
}
0x1232   :  { %s2677_s0 = smov 128   ;;  %s2678_s20 = smov 8  }
0x1233   :  { %1929 = dma.vmem_to_hbm [thread:$0]  %s1924_s3, 256, %s3386_s30, [#allocation5], %s2677_s0, %s2677_s0, %s2678_s20  }
0x1234   :  { %2651 = dma.done.wait [#allocation5], 256  }
0x1235   :  { %2652 = vsyncadd [#allocation5], 4294967040 }
0x1236   :  { %1933 = vsyncpa [#allocation4], 1 }
0x1237   :  { %1934 = vsyncpa [#allocation7], 1 }
0x1238   :  { %1935 = vsyncpa [#allocation10], 1 }
0x1239   :  { %1936 = vsyncpa [#allocation13], 1 }
0x123a   :  { %1937 = vsyncpa [#allocation16], 1 }
0x123b   :  { %1938 = vsyncpa [#allocation19], 1 }
0x123c   :  { %1939 = vsyncpa [#allocation5], 1 }

// kernel: tpu_custom_call.1
= control target key start
LH: loop header
LB: loop body
LE: loop exit
PB: predicated region body
PF: predicated region fallthrough
CT: control target
= control target key end

     0   :  { %s3357_s0 = inlined_call_operand.hbm [shape: bf16[2,8,64], index: 0, kind: input, shape index: {}]   ;;  %s3358_s1 = inlined_call_operand.hbm [shape: bf16[2,8,64], index: 1, kind: input, shape index: {}]   ;;  %s3359_s2 = inlined_call_operand.vmem [shape: f32[1,64], index: 2, kind: input, shape index: {}]   ;;  %s3360_s3 = inlined_call_operand.hbm [shape: bf16[64,64], index: 3, kind: input, shape index: {}]   ;;  %s3361_s4 = inlined_call_operand.hbm [shape: bf16[64,64], index: 4, kind: input, shape index: {}]   ;;  %s3362_s5 = inlined_call_operand.hbm [shape: f32[1,64], index: 5, kind: input, shape index: {}]   ;;  %s3363_s6 = inlined_call_operand.hbm [shape: f32[1,64], index: 6, kind: input, shape index: {}]   ;;  %s3364_s7 = inlined_call_operand.vmem [shape: bf16[64,224], index: 7, kind: input, shape index: {}]   ;;  %s3365_s8 = inlined_call_operand.hbm [shape: f32[1,224], index: 8, kind: input, shape index: {}]   ;;  %s3366_s9 = inlined_call_operand.hbm [shape: bf16[64,64], index: 9, kind: input, shape index: {}]   ;;  %s3367_s10 = inlined_call_operand.hbm [shape: f32[1,64], index: 10, kind: input, shape index: {}]   ;;  %s3368_s11 = inlined_call_operand.hbm [shape: f32[1,64], index: 11, kind: input, shape index: {}]   ;;  %s3369_s12 = inlined_call_operand.vmem [shape: bf16[64,256], index: 12, kind: input, shape index: {}]   ;;  %s3370_s13 = inlined_call_operand.hbm [shape: f32[1,256], index: 13, kind: input, shape index: {}]   ;;  %s3371_s14 = inlined_call_operand.vmem [shape: bf16[128,64], index: 14, kind: input, shape index: {}]   ;;  %s3372_s15 = inlined_call_operand.vmem [shape: f32[1,64], index: 15, kind: input, shape index: {}]   ;;  %s3373_s16 = inlined_call_operand.vmem [shape: f32[8,16], index: 16, kind: input, shape index: {}]   ;;  %s3374_s17 = inlined_call_operand.vmem [shape: f32[8,16], index: 17, kind: input, shape index: {}]   ;;  %s3375_s18 = inlined_call_operand.hbm [shape: f32[2,8,64], index: 18, kind: output, shape index: {}]  }
   0x1   :  { %3379 = sst [smem:[#allocation29_spill]] %s3357_s0 }
   0x2   :  { %3380 = sst [smem:[#allocation30_spill]] %s3358_s1 }
   0x3   :  { %3381 = sst [smem:[#allocation31_spill]] %s3359_s2 }
   0x4   :  { %3382 = sst [smem:[#allocation32_spill]] %s3375_s18 }
   0x5   :  { %23 = vsyncpa [#allocation4], 0 }
   0x6   :  { %24 = vsyncpa [#allocation7], 0 }
   0x7   :  { %25 = vsyncpa [#allocation10], 0 }
   0x8   :  { %26 = vsyncpa [#allocation13], 0 }
   0x9   :  { %27 = vsyncpa [#allocation16], 0 }
   0xa   :  { %28 = vsyncpa [#allocation19], 0 }
   0xb   :  { %29 = vsyncpa [#allocation5], 0  ;;  %s2653_s27 = smov [#allocation6]   ;;  %s2654_s29 = smov [#allocation9]  }
   0xc   :  { %s47_s28 = sshll.u32 %s2653_s27, 4  ;;  %s73_s30 = sshll.u32 %s2654_s29, 4  ;;  %s48_s28 = int_to_ptr.vmem [resolvable:$true] %s47_s28  ;;  %s2774_s30 = int_to_ptr.vmem [resolvable:$true] %s73_s30 }
   0xd   :  { %s3383_s1 = sld [smem:[#allocation30_spill]] }
  0x13   :  { %s2375_s20 = scalar_lea.hbm %s3383_s1, 128 }
  0x14   :  { %p2376_p0 = scmp.ne.s32.totalorder %s3383_s1, %s2375_s20  ;;  %p2379_p1 = scmp.lt.u32.totalorder %s2375_s20, %s3383_s1 }
  0x16   :  { %p2381_p2 = pnand %p2379_p1, %p2376_p0 }
  0x18   :  { %2384 = shalt.err (!%p2381_p2)
}
  0x19   :  { %s2385_s24 = scalar_lea.vmem %s48_s28, 128  ;;  %p2390_p4 = scmp.lt.s32.totalorder %s48_s28, %s48_s28 }
  0x1a   :  { %p2386_p3 = scmp.ne.s32.totalorder %s48_s28, %s2385_s24  ;;  %p2391_p5 = scmp.lt.s32.totalorder %s2385_s24, %s2385_s24 }
  0x1c   :  { %p2392_p6 = por %p2391_p5, %p2390_p4 }
  0x1e   :  { %p2393_p7 = pnand %p2392_p6, %p2386_p3 }
  0x20   :  { %2396 = shalt.err (!%p2393_p7)
}
  0x21   :  { %s2655_s25 = smov 64   ;;  %s2656_s26 = smov 4  }
  0x22   :  { %53 = dma.hbm_to_vmem [thread:$0]  %s3383_s1, 128, %s48_s28, [#allocation7], %s2655_s25, %s2655_s25, %s2656_s26  }
  0x23   :  { %s2397_s20 = scalar_lea.hbm %s3361_s4, 512 }
  0x24   :  { %p2398_p8 = scmp.ne.s32.totalorder %s3361_s4, %s2397_s20  ;;  %p2401_p9 = scmp.lt.u32.totalorder %s2397_s20, %s3361_s4 }
  0x26   :  { %p2403_p10 = pnand %p2401_p9, %p2398_p8 }
  0x28   :  { %2406 = shalt.err (!%p2403_p10)
}
  0x29   :  { %s2407_s24 = scalar_lea.vmem %s2774_s30, 512  ;;  %p2412_p12 = scmp.lt.s32.totalorder %s2774_s30, %s2774_s30 }
  0x2a   :  { %p2408_p11 = scmp.ne.s32.totalorder %s2774_s30, %s2407_s24  ;;  %p2413_p13 = scmp.lt.s32.totalorder %s2407_s24, %s2407_s24 }
  0x2c   :  { %p2414_p0 = por %p2413_p13, %p2412_p12 }
  0x2e   :  { %p2415_p1 = pnand %p2414_p0, %p2408_p11 }
  0x30   :  { %2418 = shalt.err (!%p2415_p1)
}
  0x31   :  { %79 = dma.hbm_to_vmem [thread:$0]  %s3361_s4, 512, %s2774_s30, [#allocation10], %s2655_s25, %s2655_s25, %s2656_s26  }
  0x32   :  { %s2657_s27 = smov [#allocation12]   ;;  %s2658_s0 = smov [#allocation15]  }
  0x33   :  { %s96_s29 = sshll.u32 %s2657_s27, 4  ;;  %s117_s19 = sshll.u32 %s2658_s0, 4  ;;  %s97_s29 = int_to_ptr.vmem [resolvable:$true] %s96_s29  ;;  %s2811_s19 = int_to_ptr.vmem [resolvable:$true] %s117_s19 }
  0x34   :  { %s2419_s22 = scalar_lea.hbm %s3363_s6, 16 }
  0x35   :  { %p2420_p2 = scmp.ne.s32.totalorder %s3363_s6, %s2419_s22  ;;  %p2423_p3 = scmp.lt.u32.totalorder %s2419_s22, %s3363_s6 }
  0x37   :  { %p2425_p4 = pnand %p2423_p3, %p2420_p2 }
  0x39   :  { %2428 = shalt.err (!%p2425_p4)
}
  0x3a   :  { %s2429_s4 = scalar_lea.vmem %s97_s29, 16  ;;  %s2433_s30 = scalar_lea.vmem %s97_s29, 32 }
  0x3b   :  { %p2430_p5 = scmp.ne.s32.totalorder %s97_s29, %s2429_s4  ;;  %p2434_p6 = scmp.lt.s32.totalorder %s97_s29, %s97_s29 }
  0x3c   :  { %p2435_p7 = scmp.lt.s32.totalorder %s2433_s30, %s2429_s4 }
  0x3e   :  { %p2436_p8 = por %p2435_p7, %p2434_p6 }
  0x40   :  { %p2437_p9 = pnand %p2436_p8, %p2430_p5 }
  0x42   :  { %2440 = shalt.err (!%p2437_p9)
}
  0x43   :  { %99 = dma.hbm_to_vmem [thread:$0]  %s3363_s6, 16, %s97_s29, [#allocation13]  }
  0x44   :  { %s2441_s20 = scalar_lea.hbm %s3366_s9, 512 }
  0x45   :  { %p2442_p10 = scmp.ne.s32.totalorder %s3366_s9, %s2441_s20  ;;  %p2445_p11 = scmp.lt.u32.totalorder %s2441_s20, %s3366_s9 }
  0x47   :  { %p2447_p12 = pnand %p2445_p11, %p2442_p10 }
  0x49   :  { %2450 = shalt.err (!%p2447_p12)
}
  0x4a   :  { %s2451_s23 = scalar_lea.vmem %s2811_s19, 512  ;;  %p2456_p0 = scmp.lt.s32.totalorder %s2811_s19, %s2811_s19 }
  0x4b   :  { %p2452_p13 = scmp.ne.s32.totalorder %s2811_s19, %s2451_s23  ;;  %p2457_p1 = scmp.lt.s32.totalorder %s2451_s23, %s2451_s23 }
  0x4d   :  { %p2458_p2 = por %p2457_p1, %p2456_p0 }
  0x4f   :  { %p2459_p3 = pnand %p2458_p2, %p2452_p13 }
  0x51   :  { %2462 = shalt.err (!%p2459_p3)
}
  0x52   :  { %123 = dma.hbm_to_vmem [thread:$0]  %s3366_s9, 512, %s2811_s19, [#allocation16], %s2655_s25, %s2655_s25, %s2656_s26  }
  0x53   :  { %s2659_s24 = smov [#allocation18]   ;;  %s2660_s30 = smov [#allocation3]  }
  0x54   :  { %s140_s4 = sshll.u32 %s2659_s24, 4  ;;  %s35_s28 = sshll.u32 %s2660_s30, 4  ;;  %s141_s4 = int_to_ptr.vmem [resolvable:$true] %s140_s4  ;;  %s2845_s28 = int_to_ptr.vmem [resolvable:$true] %s35_s28 }
  0x55   :  { %s2463_s0 = scalar_lea.hbm %s3368_s11, 16 }
  0x56   :  { %p2464_p4 = scmp.ne.s32.totalorder %s3368_s11, %s2463_s0  ;;  %p2467_p5 = scmp.lt.u32.totalorder %s2463_s0, %s3368_s11 }
  0x58   :  { %p2469_p6 = pnand %p2467_p5, %p2464_p4 }
  0x5a   :  { %2472 = shalt.err (!%p2469_p6)
}
  0x5b   :  { %s2473_s9 = scalar_lea.vmem %s141_s4, 16  ;;  %s2477_s19 = scalar_lea.vmem %s141_s4, 32 }
  0x5c   :  { %p2474_p7 = scmp.ne.s32.totalorder %s141_s4, %s2473_s9  ;;  %p2478_p8 = scmp.lt.s32.totalorder %s141_s4, %s141_s4 }
  0x5d   :  { %p2479_p9 = scmp.lt.s32.totalorder %s2477_s19, %s2473_s9 }
  0x5f   :  { %p2480_p10 = por %p2479_p9, %p2478_p8 }
  0x61   :  { %p2481_p11 = pnand %p2480_p10, %p2474_p7 }
  0x63   :  { %2484 = shalt.err (!%p2481_p11)
}
  0x64   :  { %143 = dma.hbm_to_vmem [thread:$0]  %s3368_s11, 16, %s141_s4, [#allocation19]  }
  0x65   :  { %s3384_s24 = sld [smem:[#allocation29_spill]] }
  0x6b   :  { %s2485_s30 = scalar_lea.hbm %s3384_s24, 128 }
  0x6c   :  { %p2486_p12 = scmp.ne.s32.totalorder %s3384_s24, %s2485_s30  ;;  %p2489_p13 = scmp.lt.u32.totalorder %s2485_s30, %s3384_s24 }
  0x6e   :  { %p2491_p0 = pnand %p2489_p13, %p2486_p12 }
  0x70   :  { %2494 = shalt.err (!%p2491_p0)
}
  0x71   :  { %s2495_s18 = scalar_lea.vmem %s2845_s28, 128  ;;  %p2500_p2 = scmp.lt.s32.totalorder %s2845_s28, %s2845_s28 }
  0x72   :  { %p2496_p1 = scmp.ne.s32.totalorder %s2845_s28, %s2495_s18  ;;  %p2501_p3 = scmp.lt.s32.totalorder %s2495_s18, %s2495_s18 }
  0x74   :  { %p2502_p4 = por %p2501_p3, %p2500_p2 }
  0x76   :  { %p2503_p5 = pnand %p2502_p4, %p2496_p1 }
  0x78   :  { %2506 = shalt.err (!%p2503_p5)
}
  0x79   :  { %41 = dma.hbm_to_vmem [thread:$0]  %s3384_s24, 128, %s2845_s28, [#allocation4], %s2655_s25, %s2655_s25, %s2656_s26  }
  0x7a   :  { %s2661_s21 = smov [#allocation8]   ;;  %s2662_s9 = smov [#allocation11]  }
  0x7b   :  { %s61_s22 = sshll.u32 %s2661_s21, 4  ;;  %s86_s19 = sshll.u32 %s2662_s9, 4  ;;  %s62_s22 = int_to_ptr.vmem [resolvable:$true] %s61_s22  ;;  %s87_s19 = int_to_ptr.vmem [resolvable:$true] %s86_s19 }
  0x7c   :  { %s2507_s6 = scalar_lea.hbm %s3360_s3, 512 }
  0x7d   :  { %p2508_p6 = scmp.ne.s32.totalorder %s3360_s3, %s2507_s6  ;;  %p2511_p7 = scmp.lt.u32.totalorder %s2507_s6, %s3360_s3 }
  0x7f   :  { %p2513_p8 = pnand %p2511_p7, %p2508_p6 }
  0x81   :  { %2516 = shalt.err (!%p2513_p8)
}
  0x82   :  { %s2517_s28 = scalar_lea.vmem %s62_s22, 512  ;;  %p2522_p10 = scmp.lt.s32.totalorder %s62_s22, %s62_s22 }
  0x83   :  { %p2518_p9 = scmp.ne.s32.totalorder %s62_s22, %s2517_s28  ;;  %p2523_p11 = scmp.lt.s32.totalorder %s2517_s28, %s2517_s28 }
  0x85   :  { %p2524_p12 = por %p2523_p11, %p2522_p10 }
  0x87   :  { %p2525_p13 = pnand %p2524_p12, %p2518_p9 }
  0x89   :  { %2528 = shalt.err (!%p2525_p13)
}
  0x8a   :  { %67 = dma.hbm_to_vmem [thread:$0]  %s3360_s3, 512, %s62_s22, [#allocation7], %s2655_s25, %s2655_s25, %s2656_s26  }
  0x8b   :  { %s2529_s11 = scalar_lea.hbm %s3362_s5, 16 }
  0x8c   :  { %p2530_p0 = scmp.ne.s32.totalorder %s3362_s5, %s2529_s11  ;;  %p2533_p1 = scmp.lt.u32.totalorder %s2529_s11, %s3362_s5 }
  0x8e   :  { %p2535_p2 = pnand %p2533_p1, %p2530_p0 }
  0x90   :  { %2538 = shalt.err (!%p2535_p2)
}
  0x91   :  { %s2539_s23 = scalar_lea.vmem %s87_s19, 16  ;;  %s2543_s6 = scalar_lea.vmem %s87_s19, 32 }
  0x92   :  { %p2540_p3 = scmp.ne.s32.totalorder %s87_s19, %s2539_s23  ;;  %p2544_p4 = scmp.lt.s32.totalorder %s87_s19, %s87_s19 }
  0x93   :  { %p2545_p5 = scmp.lt.s32.totalorder %s2543_s6, %s2539_s23 }
  0x95   :  { %p2546_p6 = por %p2545_p5, %p2544_p4 }
  0x97   :  { %p2547_p7 = pnand %p2546_p6, %p2540_p3 }
  0x99   :  { %2550 = shalt.err (!%p2547_p7)
}
  0x9a   :  { %89 = dma.hbm_to_vmem [thread:$0]  %s3362_s5, 16, %s87_s19, [#allocation10]  }
  0x9b   :  { %s2663_s22 = smov [#allocation14]   ;;  %s2664_s30 = smov [#allocation17]  }
  0x9c   :  { %s108_s29 = sshll.u32 %s2663_s22, 4  ;;  %s130_s1 = sshll.u32 %s2664_s30, 4  ;;  %s109_s29 = int_to_ptr.vmem [resolvable:$true] %s108_s29  ;;  %s131_s1 = int_to_ptr.vmem [resolvable:$true] %s130_s1 }
  0x9d   :  { %s2551_s24 = scalar_lea.hbm %s3365_s8, 32 }
  0x9e   :  { %p2552_p8 = scmp.ne.s32.totalorder %s3365_s8, %s2551_s24  ;;  %p2555_p9 = scmp.lt.u32.totalorder %s2551_s24, %s3365_s8 }
  0xa0   :  { %p2557_p10 = pnand %p2555_p9, %p2552_p8 }
  0xa2   :  { %2560 = shalt.err (!%p2557_p10)
}
  0xa3   :  { %s2561_s5 = scalar_lea.vmem %s109_s29, 32  ;;  %p2566_p12 = scmp.lt.s32.totalorder %s109_s29, %s109_s29 }
  0xa4   :  { %p2562_p11 = scmp.ne.s32.totalorder %s109_s29, %s2561_s5  ;;  %p2567_p13 = scmp.lt.s32.totalorder %s2561_s5, %s2561_s5 }
  0xa6   :  { %p2568_p0 = por %p2567_p13, %p2566_p12 }
  0xa8   :  { %p2569_p1 = pnand %p2568_p0, %p2562_p11 }
  0xaa   :  { %2572 = shalt.err (!%p2569_p1)
}
  0xab   :  { %111 = dma.hbm_to_vmem [thread:$0]  %s3365_s8, 32, %s109_s29, [#allocation13]  }
  0xac   :  { %s2573_s2 = scalar_lea.hbm %s3367_s10, 16 }
  0xad   :  { %p2574_p2 = scmp.ne.s32.totalorder %s3367_s10, %s2573_s2  ;;  %p2577_p3 = scmp.lt.u32.totalorder %s2573_s2, %s3367_s10 }
  0xaf   :  { %p2579_p4 = pnand %p2577_p3, %p2574_p2 }
  0xb1   :  { %2582 = shalt.err (!%p2579_p4)
}
  0xb2   :  { %s2583_s22 = scalar_lea.vmem %s131_s1, 16  ;;  %s2587_s30 = scalar_lea.vmem %s131_s1, 32 }
  0xb3   :  { %p2584_p5 = scmp.ne.s32.totalorder %s131_s1, %s2583_s22  ;;  %p2588_p6 = scmp.lt.s32.totalorder %s131_s1, %s131_s1 }
  0xb4   :  { %p2589_p7 = scmp.lt.s32.totalorder %s2587_s30, %s2583_s22 }
  0xb6   :  { %p2590_p8 = por %p2589_p7, %p2588_p6 }
  0xb8   :  { %p2591_p9 = pnand %p2590_p8, %p2584_p5 }
  0xba   :  { %2594 = shalt.err (!%p2591_p9)
}
  0xbb   :  { %133 = dma.hbm_to_vmem [thread:$0]  %s3367_s10, 16, %s131_s1, [#allocation16]  }
  0xbc   :  { %s2665_s27 = smov [#allocation20]   ;;  %s2595_s20 = scalar_lea.hbm %s3370_s13, 32 }
  0xbd   :  { %s152_s28 = sshll.u32 %s2665_s27, 4  ;;  %p2596_p10 = scmp.ne.s32.totalorder %s3370_s13, %s2595_s20  ;;  %s153_s28 = int_to_ptr.vmem [resolvable:$true] %s152_s28 }
  0xbe   :  { %p2599_p11 = scmp.lt.u32.totalorder %s2595_s20, %s3370_s13 }
  0xc0   :  { %p2601_p12 = pnand %p2599_p11, %p2596_p10 }
  0xc2   :  { %2604 = shalt.err (!%p2601_p12)
}
  0xc3   :  { %s2605_s4 = scalar_lea.vmem %s153_s28, 32  ;;  %p2610_p0 = scmp.lt.s32.totalorder %s153_s28, %s153_s28 }
  0xc4   :  { %p2606_p13 = scmp.ne.s32.totalorder %s153_s28, %s2605_s4  ;;  %p2611_p1 = scmp.lt.s32.totalorder %s2605_s4, %s2605_s4 }
  0xc6   :  { %p2612_p2 = por %p2611_p1, %p2610_p0 }
  0xc8   :  { %p2613_p3 = pnand %p2612_p2, %p2606_p13 }
  0xca   :  { %2616 = shalt.err (!%p2613_p3)
}
  0xcb   :  { %155 = dma.hbm_to_vmem [thread:$0]  %s3370_s13, 32, %s153_s28, [#allocation19]  }
  0xcc   :  { %2639 = dma.done.wait [#allocation4], 128  }
  0xcd   :  { %2640 = vsyncadd [#allocation4], 4294967168 }
  0xce   :  { %2641 = dma.done.wait [#allocation7], 640  }
  0xcf   :  { %2642 = vsyncadd [#allocation7], 4294966656 }
  0xd0   :  { %2643 = dma.done.wait [#allocation10], 528  }
  0xd1   :  { %2644 = vsyncadd [#allocation10], 4294966768 }
  0xd2   :  { %2645 = dma.done.wait [#allocation13], 48  }
  0xd3   :  { %2646 = vsyncadd [#allocation13], 4294967248 }
  0xd4   :  { %2647 = dma.done.wait [#allocation16], 528  }
  0xd5   :  { %2648 = vsyncadd [#allocation16], 4294966768 }
  0xd6   :  { %2649 = dma.done.wait [#allocation19], 48  }
  0xd7   :  { %2650 = vsyncadd [#allocation19], 4294967248  ;;  %v2038_v0 = vld [vmem:[#allocation6] sm:$0xff]   ;;  %vm209_vm0 = vcmask 523264   ;;  %v2034_v1 = vld [vmem:[#allocation3] sm:$0xff]   ;;  %v2666_v15 = vmov 0.0  }
  0xd8   :  { %v2039_v2 = vunpack.c.l.bf16 %v2038_v0  ;;  %v2040_v3 = vunpack.c.h.bf16 %v2038_v0  ;;  %v2942_v4 = vunpack.c.l.bf16 %v2034_v1  ;;  %v2944_v5 = vunpack.c.h.bf16 %v2034_v1  ;;  %v2275_v14 = vld [vmem:[#allocation9] sm:$0xff]   ;;  %2097 = vmatprep.subr.bf16.mxu1 %v2666_v15  ;;  %v2276_v16 = vld [vmem:[#allocation9 + $0x8] sm:$0xff]   ;;  %v2277_v17 = vld [vmem:[#allocation9 + $0x10] sm:$0xff]   ;;  %s3385_s9 = sld [smem:[#allocation31_spill]]  ;;  %s2669_s4 = smov 32  }
  0xd9   :  { %2098 = vmatpush3.bf16.msra.mxu1 %v2275_v14  ;;  %v2278_v18 = vld [vmem:[#allocation9 + $0x18] sm:$0xff]   ;;  %vm2667_vm1 = vmmov 0   ;;  %v2279_v38 = vld [vmem:[#allocation8] sm:$0xff]   ;;  %v2280_v40 = vld [vmem:[#allocation8 + $0x8] sm:$0xff]   ;;  %vm605_vm2 = vcmask 130048   ;;  %vm698_vm4 = vcmask 64512  }
  0xda   :  { %v242_v6 = vmul.f32 %v2039_v2, %v2039_v2  ;;  %v243_v7 = vmul.f32 %v2040_v3, %v2040_v3  ;;  %v207_v8 = vmul.f32 %v2942_v4, %v2942_v4  ;;  %v208_v9 = vmul.f32 %v2944_v5, %v2944_v5  ;;  %2099 = vmatprep.subr.bf16.mxu1 %v2666_v15  ;;  %v2281_v43 = vld [vmem:[#allocation8 + $0x10] sm:$0xff]   ;;  %v2282_v46 = vld [vmem:[#allocation8 + $0x18] sm:$0xff]   ;;  %v1951_v55 = vld [vmem:[#allocation11] ss:$0 sm:$0xff]  ;;  %s2673_s1 = smov 16   ;;  %s2674_s13 = smov 112  }
  0xdb   :  { %2105 = vmatprep.mubr.msk.bf16.mxu1 %vm2667_vm1, %v2666_v15  ;;  %s2675_s21 = smov 48   ;;  %vm729_vm5 = vcmask 1043456   ;;  %vm1056_vm6 = vcmask 261248   ;;  %vm1332_vm7 = vcmask 392448   ;;  %vm1565_vm8 = vcmask 523648   ;;  %s2676_s6 = smov [#allocation21]  }
  0xdc   :  { %v244_v10 = vsel %vm209_vm0, %v242_v6, 0.0  ;;  %v210_v11 = vsel %vm209_vm0, %v207_v8, 0.0  ;;  %v247_v12 = vsel %vm209_vm0, %v243_v7, 0.0  ;;  %v213_v13 = vsel %vm209_vm0, %v208_v9, 0.0  ;;  %v2288_v6 = vld [vmem:[%s3364_s7 + $0x10] ss:$8 sps:$4 sm:$0xff]  }
  0xdd   :  { %245 = vadd.xlane.f32.xlu0 %v244_v10  ;;  %211 = vadd.xlane.f32.xlu1 %v210_v11  ;;  %v2289_v7 = vld [vmem:[%s3364_s7 + $0x24] ss:$8 sps:$4 sm:$0xff]   ;;  %v2668_v8 = vmov 0   ;;  %v2291_v9 = vld [vmem:[%s3364_s7 + $0x20] ss:$8 sps:$4 sm:$0xff]   ;;  %s1923_s3 = sshll.u32 %s2676_s6, 4  ;;  %s1924_s3 = int_to_ptr.vmem [resolvable:$true] %s1923_s3 }
  0xde   :  { %2100 = vmatpush3.bf16.msra.mxu1 %v2276_v16  ;;  %v1940_v34 = vld [vmem:[%s3385_s9] ss:$0 sm:$0xff]  ;;  %535 = vmatprep.mubr.bf16.mxu0 %v2668_v8  ;;  %v2292_v10 = vld [vmem:[%s3364_s7 + $0x34] ss:$8 sps:$4 sm:$0xff]   ;;  %v2294_v11 = vld [vmem:[%s3364_s7 + $0x30] ss:$8 sps:$4 sm:$0xff]   ;;  %p2622_p5 = scmp.lt.s32.totalorder %s1924_s3, %s1924_s3 }
  0xdf   :  { %2101 = vmatprep.subr.bf16.mxu1 %v2666_v15  ;;  %s2617_s26 = scalar_lea.vmem %s1924_s3, 256 }
  0xe0   :  { %p2618_p4 = scmp.ne.s32.totalorder %s1924_s3, %s2617_s26  ;;  %p2623_p6 = scmp.lt.s32.totalorder %s2617_s26, %s2617_s26 }
  0xe1   :  { %248 = vadd.xlane.f32.xlu0 %v247_v12  ;;  %214 = vadd.xlane.f32.xlu1 %v213_v13  ;;  %v3015_v12 = vld [vmem:[%s3374_s17] sm:$0xff] }
  0xe2   :  { %2102 = vmatpush3.bf16.msra.mxu1 %v2277_v17  ;;  %p2624_p7 = por %p2623_p6, %p2622_p5 }
  0xe3   :  { %2103 = vmatprep.subr.bf16.mxu1 %v2666_v15 }
  0xe4   :  { %p2625_p8 = pnand %p2624_p7, %p2618_p4 }
  0xe6   :  { %2104 = vmatpush3.bf16.msra.mxu1 %v2278_v18 }
  0xe7   :  { %2109 = vmatprep.subr.bf16.mxu1 %v2666_v15 }
 0x16a   :  { %v246_v19 = vpop.xlane.xlu0 %245  ;;  %v212_v21 = vpop.xlane.xlu1 %211 }
 0x16b   :  { %v250_v20 = vmul.f32 0.015625, %v246_v19  ;;  %v217_v27 = vmul.f32 0.015625, %v212_v21 }
 0x16d   :  { %v252_v22 = vadd.f32 1e-08, %v250_v20  ;;  %v219_v29 = vadd.f32 1e-08, %v217_v27 }
 0x16e   :  { %v249_v23 = vpop.xlane.xlu0 %248  ;;  %v215_v26 = vpop.xlane.xlu1 %214 }
 0x16f   :  { %2319 = vrsqrt.f32 %v252_v22  ;;  %v251_v24 = vmul.f32 0.015625, %v249_v23  ;;  %v218_v28 = vmul.f32 0.015625, %v215_v26  ;;  %v1952_v23 = vld [vmem:[#allocation12] ss:$0 sm:$0xff] }
 0x171   :  { %v253_v25 = vadd.f32 1e-08, %v251_v24  ;;  %v220_v31 = vadd.f32 1e-08, %v218_v28  ;;  %v450_v28 = vlaneseq }
 0x173   :  { %2321 = vrsqrt.f32 %v253_v25 }
 0x174   :  { %2323 = vrsqrt.f32 %v219_v29  ;;  %v3026_v29 = vshrl.u32 %v450_v28, 7 }
 0x175   :  { %2325 = vrsqrt.f32 %v220_v31  ;;  %v448_v31 = vld [vmem:[#allocation14] sm:$0x3] }
 0x179   :  { %v2320_v30 = vpop.eup %2319 }
 0x17a   :  { %v256_v32 = vmul.f32 %v2320_v30, %v2039_v2  ;;  %v452_v30 = vsub.s32 0, %v3026_v29 }
 0x17c   :  { %v258_v36 = vmul.f32 %v1940_v34, %v256_v32  ;;  %v456_v32 = vsub.s32 1, %v3026_v29 }
 0x17d   :  { %v2322_v33 = vpop.eup %2321 }
 0x17e   :  { %v257_v35 = vmul.f32 %v2322_v33, %v2040_v3  ;;  %v2324_v41 = vpop.eup %2323  ;;  %v2283_v3 = vld [vmem:[%s3364_s7 + $0x4] ss:$8 sps:$4 sm:$0xff]   ;;  %v453_v33 = vrot.slane %v448_v31, %v452_v30 }
 0x17f   :  { %v2326_v42 = vpop.eup %2325  ;;  %v223_v44 = vmul.f32 %v2324_v41, %v2942_v4  ;;  %v2285_v4 = vld [vmem:[%s3364_s7] ss:$8 sps:$4 sm:$0xff]   ;;  %503 = vmatprep.subr.bf16.mxu0 %v2283_v3 }
 0x180   :  { %v259_v37 = vmul.f32 %v1940_v34, %v257_v35  ;;  %v224_v45 = vmul.f32 %v2326_v42, %v2944_v5  ;;  %v2286_v5 = vld [vmem:[%s3364_s7 + $0x14] ss:$8 sps:$4 sm:$0xff]   ;;  %504 = vmatpush1.bf16.msra.mxu0 %v2285_v4  ;;  %s2670_s7 = smov 96  }
 0x181   :  { %v231_v47 = vmul.f32 %v1940_v34, %v223_v44  ;;  %505 = vmatprep.subr.bf16.mxu0 %v2286_v5 }
 0x182   :  { %v260_v39 = vpack.c.bf16 %v259_v37, %v258_v36  ;;  %v232_v48 = vmul.f32 %v1940_v34, %v224_v45  ;;  %v457_v34 = vrot.slane %v448_v31, %v456_v32 }
 0x184   :  { %2106 = vmatmul.mubr.msk.bf16.vlgmr.msra.gmra.mrb[0].mxu1 %vm209_vm0, %v260_v39  ;;  %v233_v49 = vpack.c.bf16 %v232_v48, %v231_v47  ;;  %506 = vmatpush1.bf16.msra.mxu0 %v2288_v6  ;;  %v551_v6 = vand.u32 127, %v450_v28 }
 0x185   :  { %2110 = vmatpush3.bf16.msra.mxu1 %v2279_v38  ;;  %2117 = vmatprep.mubr.msk.bf16.mxu1 %vm2667_vm1, %v2666_v15 }
 0x186   :  { %2111 = vmatprep.subr.bf16.mxu1 %v2666_v15  ;;  %507 = vmatprep.subr.bf16.mxu0 %v2289_v7  ;;  %vm552_vm3 = vcmp.ge.s32.totalorder %v3026_v29, %v551_v6  ;;  %v2671_v7 = vmov -1e+30  }
 0x188   :  { %508 = vmatpush1.bf16.msra.mxu0 %v2291_v9  ;;  %v3080_v9 = vsel %vm552_vm3, 0.0, %v2671_v7 }
 0x189   :  { %2112 = vmatpush3.bf16.msra.mxu1 %v2280_v40  ;;  %509 = vmatprep.subr.bf16.mxu0 %v2292_v10 }
 0x18a   :  { %2113 = vmatprep.subr.bf16.mxu1 %v2666_v15 }
 0x18c   :  { %510 = vmatpush1.bf16.msra.mxu0 %v2294_v11 }
 0x18d   :  { %2114 = vmatpush3.bf16.msra.mxu1 %v2281_v43  ;;  %2133 = vmatprep.subr.bf16.mxu0 %v2666_v15 }
 0x18e   :  { %2115 = vmatprep.subr.bf16.mxu1 %v2666_v15 }
 0x191   :  { %2116 = vmatpush3.bf16.msra.mxu1 %v2282_v46 }
 0x192   :  { %2121 = vmatprep.subr.bf16.mxu1 %v2666_v15 }
 0x194   :  { %2118 = vmatmul.mubr.msk.bf16.vlgmr.msra.gmra.mrb[4].mxu1 %vm209_vm0, %v233_v49  ;;  %v3053_v49 = vld [vmem:[%s3373_s16] sm:$0xff]  ;;  %s2672_s16 = smov 80  }
 0x195   :  { %2123 = vmatprep.mubr.msk.bf16.mxu1 %vm2667_vm1, %v2666_v15 }
 0x257   :  { %v330_v50 = vpop.f32.mrb[0].mxu1 }
 0x258   :  { %v2107_v51 = vpop.f32.mrb[1].mxu1 }
 0x259   :  { %v333_v52 = vpop.f32.mrb[2].mxu1 }
 0x25a   :  { %v2108_v53 = vpop.f32.mrb[3].mxu1 }
 0x267   :  { %v398_v54 = vpop.f32.mrb[4].mxu1 }
 0x268   :  { %v399_v56 = vadd.f32 %v398_v54, %v330_v50  ;;  %v2119_v57 = vpop.f32.mrb[5].mxu1 }
 0x269   :  { %v401_v58 = vpop.f32.mrb[6].mxu1 }
 0x26a   :  { %v2976_v59 = vadd.f32 %v1951_v55, %v399_v56  ;;  %v402_v60 = vadd.f32 %v401_v58, %v333_v52  ;;  %v2120_v61 = vpop.f32.mrb[7].mxu1 }
 0x26c   :  { %v2978_v62 = vadd.f32 %v1951_v55, %v402_v60  ;;  %v415_v63 = vmul.f32 %v2976_v59, %v2976_v59 }
 0x26e   :  { %v417_v0 = vsel %vm209_vm0, %v415_v63, 0.0  ;;  %v416_v1 = vmul.f32 %v2978_v62, %v2978_v62 }
 0x26f   :  { %418 = vadd.xlane.f32.xlu0 %v417_v0 }
 0x270   :  { %v420_v2 = vsel %vm209_vm0, %v416_v1, 0.0 }
 0x271   :  { %421 = vadd.xlane.f32.xlu1 %v420_v2 }
 0x282   :  { %584 = vrot.lane.b32.xlu1 %v3015_v12, %s2655_s25 }
 0x285   :  { %557 = vrot.lane.b32.xlu0 %v3015_v12, %s2669_s4 }
 0x2fc   :  { %v419_v13 = vpop.xlane.xlu0 %418 }
 0x2fd   :  { %v423_v14 = vmul.f32 0.015625, %v419_v13 }
 0x2fe   :  { %v422_v16 = vpop.xlane.xlu1 %421 }
 0x2ff   :  { %v425_v17 = vadd.f32 1e-08, %v423_v14  ;;  %v424_v18 = vmul.f32 0.015625, %v422_v16 }
 0x300   :  { %v558_v39 = vpop.permute.xlu0 %557 }
 0x301   :  { %2327 = vrsqrt.f32 %v425_v17  ;;  %v426_v19 = vadd.f32 1e-08, %v424_v18 }
 0x302   :  { %v585_v36 = vpop.permute.xlu1 %584 }
 0x303   :  { %2329 = vrsqrt.f32 %v426_v19 }
 0x30b   :  { %v2328_v20 = vpop.eup %2327 }
 0x30c   :  { %v429_v21 = vmul.f32 %v2328_v20, %v2976_v59 }
 0x30d   :  { %v2330_v22 = vpop.eup %2329 }
 0x30e   :  { %v430_v24 = vmul.f32 %v2330_v22, %v2978_v62  ;;  %v437_v25 = vmul.f32 %v1952_v23, %v429_v21 }
 0x310   :  { %v438_v26 = vmul.f32 %v1952_v23, %v430_v24 }
 0x312   :  { %v439_v27 = vpack.c.bf16 %v438_v26, %v437_v25 }
 0x314   :  { %1961 = vmatmul.mubr.msk.bf16.vlgmr.msra.gmra.mrb[0].mxu0 %vm209_vm0, %v439_v27 }
 0x315   :  { %2135 = vmatprep.mubr.msk.bf16.mxu0 %vm2667_vm1, %v2666_v15 }
 0x3e7   :  { %v537_v35 = vpop.f32.mrb[0].mxu0 }
 0x3e8   :  { %v3034_v37 = vadd.f32 %v537_v35, %v453_v33  ;;  %v539_v38 = vpop.f32.mrb[1].mxu0 }
 0x3e9   :  { %v3036_v40 = vadd.f32 %v539_v38, %v457_v34  ;;  %v541_v41 = vpop.f32.mrb[2].mxu0 }
 0x3ea   :  { %v543_v42 = vpop.f32.mrb[3].mxu0  ;;  %v587_v43 = vmul.f32 %v585_v36, %v3034_v37  ;;  %v3044_v46 = vadd.f32 %v541_v41, %v453_v33  ;;  %v582_v57 = vmul.f32 %v3053_v49, %v3034_v37 }
 0x3eb   :  { %v560_v44 = vmul.f32 %v558_v39, %v3036_v40  ;;  %v3040_v45 = vadd.f32 %v543_v42, %v457_v34  ;;  %v554_v50 = vmul.f32 %v3053_v49, %v3036_v40  ;;  %v3098_v42 = vpack.c.bf16 %v3036_v40, %v3036_v40 }
 0x3ec   :  { %591 = vrot.lane.b32.xlu0 %v587_v43, %s2655_s25  ;;  %v588_v48 = vmul.f32 %v585_v36, %v3044_v46  ;;  %v583_v3 = vmul.f32 %v3053_v49, %v3044_v46 }
 0x3ed   :  { %564 = vrot.lane.b32.xlu1 %v560_v44, %s2670_s7  ;;  %v561_v47 = vmul.f32 %v558_v39, %v3040_v45  ;;  %v555_v54 = vmul.f32 %v3053_v49, %v3040_v45  ;;  %v3102_v43 = vpack.c.bf16 %v3040_v45, %v3040_v45 }
 0x3f1   :  { %566 = vrot.lane.b32.xlu1 %v561_v47, %s2670_s7 }
 0x3f5   :  { %593 = vrot.lane.b32.xlu1 %v588_v48, %s2655_s25 }
 0x45e   :  { %v592_v55 = vpop.permute.xlu0 %591 }
 0x45f   :  { %v565_v51 = vpop.permute.xlu1 %564  ;;  %v597_v61 = vadd.f32 %v592_v55, %v582_v57 }
 0x460   :  { %v570_v52 = vadd.f32 %v565_v51, %v554_v50 }
 0x461   :  { %v2021_v0 = vpack.c.bf16 %v597_v61, %v597_v61 }
 0x462   :  { %v2019_v53 = vpack.c.bf16 %v570_v52, %v570_v52 }
 0x463   :  { %v567_v56 = vpop.permute.xlu1 %566 }
 0x464   :  { %v3062_v58 = vsel %vm605_vm2, %v2019_v53, 0  ;;  %v571_v60 = vadd.f32 %v567_v56, %v555_v54 }
 0x465   :  { %2122 = vmatpush3.bf16.xpose.msra.mxu1 %v3062_v58 }
 0x466   :  { %2127 = vmatprep.subr.bf16.mxu1 %v2666_v15  ;;  %v2020_v63 = vpack.c.bf16 %v571_v60, %v571_v60 }
 0x467   :  { %v594_v1 = vpop.permute.xlu1 %593 }
 0x468   :  { %v3067_v2 = vsel %vm605_vm2, %v2020_v63, 0  ;;  %v598_v4 = vadd.f32 %v594_v1, %v583_v3 }
 0x46a   :  { %v2022_v5 = vpack.c.bf16 %v598_v4, %v598_v4 }
 0x46c   :  { %2124 = vmatmul.mubr.msk.bf16.vlgmr.msra.gmra.mrb[8].mxu1 %vm605_vm2, %v2021_v0 }
 0x46d   :  { %2128 = vmatpush3.bf16.xpose.msra.mxu1 %v3067_v2  ;;  %2129 = vmatprep.mubr.msk.bf16.mxu1 %vm2667_vm1, %v2666_v15 }
 0x46e   :  { %2139 = vmatprep.subr.bf16.mxu1 %v2666_v15 }
 0x474   :  { %2130 = vmatmul.mubr.msk.bf16.vlgmr.msra.gmra.mrb[12].mxu1 %vm605_vm2, %v2022_v5 }
 0x475   :  { %2141 = vmatprep.mubr.msk.bf16.mxu1 %vm2667_vm1, %v2666_v15 }
 0x53f   :  { %v646_v10 = vpop.f32.mrb[8].mxu1 }
 0x540   :  { %v647_v11 = vadd.f32 %v646_v10, %v3080_v9  ;;  %v2125_v13 = vpop.f32.mrb[9].mxu1 }
 0x541   :  { %v649_v14 = vpop.f32.mrb[10].mxu1 }
 0x542   :  { %v2126_v16 = vpop.f32.mrb[11].mxu1  ;;  %v699_v17 = vsel %vm698_vm4, %v647_v11, -inf }
 0x543   :  { %700 = vmax.xlane.f32.xlu0 %v699_v17 }
 0x547   :  { %v692_v18 = vpop.f32.mrb[12].mxu1 }
 0x548   :  { %v693_v19 = vadd.f32 %v692_v18, %v3080_v9  ;;  %v2131_v20 = vpop.f32.mrb[13].mxu1 }
 0x549   :  { %v695_v21 = vpop.f32.mrb[14].mxu1 }
 0x54a   :  { %v2132_v22 = vpop.f32.mrb[15].mxu1  ;;  %v702_v23 = vsel %vm698_vm4, %v693_v19, -inf }
 0x54b   :  { %703 = vmax.xlane.f32.xlu1 %v702_v23 }
 0x559   :  { %830 = vrot.lane.b32.xlu0 %v3015_v12, %s2672_s16 }
 0x55c   :  { %825 = vrot.lane.b32.xlu1 %v3053_v49, %s2673_s1 }
 0x5d0   :  { %v701_v24 = vpop.xlane.xlu0 %700 }
 0x5d1   :  { %v705_v28 = vsub.f32 %v647_v11, %v701_v24 }
 0x5d3   :  { %v707_v33 = vmul.f32 1.442695, %v705_v28 }
 0x5d4   :  { %v831_v25 = vpop.permute.xlu0 %830 }
 0x5d5   :  { %v833_v26 = vmul.f32 %v831_v25, %v3034_v37  ;;  %v834_v27 = vmul.f32 %v831_v25, %v3044_v46  ;;  %2331 = vpow2.f32 %v707_v33 }
 0x5d7   :  { %837 = vrot.lane.b32.xlu0 %v833_v26, %s2655_s25  ;;  %839 = vrot.lane.b32.xlu1 %v834_v27, %s2655_s25 }
 0x5d8   :  { %v704_v31 = vpop.xlane.xlu1 %703 }
 0x5d9   :  { %v706_v34 = vsub.f32 %v693_v19, %v704_v31 }
 0x5db   :  { %v709_v35 = vmul.f32 1.442695, %v706_v34 }
 0x5dc   :  { %v3108_v44 = vpop.permute.xlu1 %825 }
 0x5dd   :  { %2333 = vpow2.f32 %v709_v35  ;;  %v828_v47 = vmul.f32 %v3108_v44, %v3034_v37  ;;  %v829_v48 = vmul.f32 %v3108_v44, %v3044_v46 }
 0x5df   :  { %v2332_v36 = vpop.eup %2331 }
 0x5e0   :  { %v711_v38 = vsel %vm698_vm4, %v2332_v36, 0.0 }
 0x5e7   :  { %v2334_v39 = vpop.eup %2333 }
 0x5e8   :  { %v714_v41 = vsel %vm698_vm4, %v2334_v39, 0.0 }
 0x5f6   :  { %712 = vadd.xlane.f32.xlu0 %v711_v38 }
 0x5fb   :  { %715 = vadd.xlane.f32.xlu1 %v714_v41 }
 0x60c   :  { %724 = vrot.lane.b32.xlu0 %v3098_v42, %s2655_s25  ;;  %774 = vrot.lane.b32.xlu1 %v3102_v43, %s2655_s25 }
 0x649   :  { %v838_v50 = vpop.permute.xlu0 %837  ;;  %v840_v51 = vpop.permute.xlu1 %839 }
 0x64a   :  { %v843_v52 = vadd.f32 %v838_v50, %v828_v47  ;;  %v844_v53 = vadd.f32 %v840_v51, %v829_v48 }
 0x64c   :  { %v2025_v54 = vpack.c.bf16 %v843_v52, %v843_v52  ;;  %v2026_v55 = vpack.c.bf16 %v844_v53, %v844_v53 }
 0x64e   :  { %850 = vrot.lane.b32.xlu0 %v2025_v54, %s2674_s13  ;;  %896 = vrot.lane.b32.xlu1 %v2026_v55, %s2674_s13 }
 0x652   :  { %1060 = vrot.lane.b32.xlu0 %v3015_v12, %s2675_s21 }
 0x683   :  { %v713_v56 = vpop.xlane.xlu0 %712 }
 0x684   :  { %2335 = vrcp.f32 %v713_v56 }
 0x687   :  { %v725_v57 = vpop.permute.xlu0 %724 }
 0x688   :  { %v731_v60 = vsel %vm729_vm5, %v725_v57, 0  ;;  %v716_v61 = vpop.xlane.xlu1 %715 }
 0x689   :  { %2337 = vrcp.f32 %v716_v61  ;;  %2134 = vmatpush3.bf16.msra.mxu0 %v731_v60 }
 0x68a   :  { %2145 = vmatprep.subr.bf16.mxu0 %v2666_v15 }
 0x68c   :  { %v775_v63 = vpop.permute.xlu1 %774 }
 0x68d   :  { %v780_v0 = vsel %vm729_vm5, %v775_v63, 0 }
 0x68e   :  { %v2336_v1 = vpop.eup %2335  ;;  %2140 = vmatpush3.bf16.msra.mxu1 %v780_v0 }
 0x68f   :  { %v719_v3 = vmul.f32 %v2336_v1, %v2332_v36  ;;  %2151 = vmatprep.subr.bf16.mxu1 %v2666_v15  ;;  %v1058_v1 = vmul.f32 %v3108_v44, %v3036_v40 }
 0x691   :  { %v721_v4 = vpack.c.bf16 %v719_v3, %v719_v3  ;;  %v1059_v3 = vmul.f32 %v3108_v44, %v3040_v45 }
 0x693   :  { %v2338_v5 = vpop.eup %2337  ;;  %2136 = vmatmul.mubr.msk.bf16.vlgmr.msra.gmra.mrb[4].mxu0 %vm698_vm4, %v721_v4 }
 0x694   :  { %v720_v6 = vmul.f32 %v2338_v5, %v2334_v39  ;;  %2146 = vmatpush3.bf16.xpose.msra.mxu0 %v3062_v58  ;;  %2147 = vmatprep.mubr.msk.bf16.mxu0 %vm2667_vm1, %v2666_v15 }
 0x695   :  { %2157 = vmatprep.subr.bf16.mxu0 %v2666_v15 }
 0x696   :  { %v722_v7 = vpack.c.bf16 %v720_v6, %v720_v6 }
 0x698   :  { %2142 = vmatmul.mubr.msk.bf16.vlgmr.msra.gmra.mrb[16].mxu1 %vm698_vm4, %v722_v7 }
 0x699   :  { %2152 = vmatpush3.bf16.xpose.msra.mxu1 %v3067_v2  ;;  %2153 = vmatprep.mubr.msk.bf16.mxu1 %vm2667_vm1, %v2666_v15 }
 0x69a   :  { %2163 = vmatprep.subr.bf16.mxu1 %v2666_v15 }
 0x6c0   :  { %v851_v10 = vpop.permute.xlu0 %850  ;;  %v897_v11 = vpop.permute.xlu1 %896 }
 0x6c1   :  { %2148 = vmatmul.mubr.msk.bf16.vlgmr.msra.gmra.mrb[8].mxu0 %vm605_vm2, %v851_v10  ;;  %2154 = vmatmul.mubr.msk.bf16.vlgmr.msra.gmra.mrb[20].mxu1 %vm605_vm2, %v897_v11 }
 0x6c2   :  { %2158 = vmatpush3.bf16.msra.mxu0 %v731_v60  ;;  %2164 = vmatpush3.bf16.msra.mxu1 %v780_v0 }
 0x6c3   :  { %2165 = vmatprep.mubr.msk.bf16.mxu1 %vm2667_vm1, %v2666_v15  ;;  %2175 = vmatprep.subr.bf16.mxu1 %v2666_v15 }
 0x6c4   :  { %2159 = vmatprep.mubr.msk.bf16.mxu0 %vm2667_vm1, %v2666_v15  ;;  %2169 = vmatprep.subr.bf16.mxu0 %v2666_v15  ;;  %v1061_v36 = vpop.permute.xlu0 %1060 }
 0x6c5   :  { %v1063_v38 = vmul.f32 %v1061_v36, %v3036_v40  ;;  %v1064_v39 = vmul.f32 %v1061_v36, %v3040_v45 }
 0x766   :  { %v767_v58 = vpop.f32.mrb[4].mxu0 }
 0x767   :  { %v2137_v2 = vpop.f32.mrb[5].mxu0 }
 0x768   :  { %v770_v13 = vpop.f32.mrb[6].mxu0 }
 0x769   :  { %v2138_v14 = vpop.f32.mrb[7].mxu0 }
 0x76b   :  { %v816_v16 = vpop.f32.mrb[16].mxu1 }
 0x76c   :  { %v822_v17 = vpack.c.bf16 %v816_v16, %v767_v58  ;;  %v2143_v18 = vpop.f32.mrb[17].mxu1 }
 0x76d   :  { %v819_v19 = vpop.f32.mrb[18].mxu1 }
 0x76e   :  { %823 = vst.msk [vmem:[#allocation2] sm:$0xff] %vm605_vm2, %v822_v17  ;;  %v2144_v20 = vpop.f32.mrb[19].mxu1 }
 0x794   :  { %v889_v21 = vpop.f32.mrb[8].mxu0  ;;  %v935_v22 = vpop.f32.mrb[20].mxu1 }
 0x795   :  { %v890_v23 = vadd.f32 %v889_v21, %v3080_v9  ;;  %v936_v24 = vadd.f32 %v935_v22, %v3080_v9  ;;  %v2149_v25 = vpop.f32.mrb[9].mxu0  ;;  %v2155_v26 = vpop.f32.mrb[21].mxu1 }
 0x796   :  { %v892_v27 = vpop.f32.mrb[10].mxu0  ;;  %v938_v28 = vpop.f32.mrb[22].mxu1 }
 0x797   :  { %v2150_v31 = vpop.f32.mrb[11].mxu0  ;;  %v2156_v33 = vpop.f32.mrb[23].mxu1  ;;  %v941_v34 = vsel %vm698_vm4, %v890_v23, -inf  ;;  %v944_v35 = vsel %vm698_vm4, %v936_v24, -inf }
 0x798   :  { %942 = vmax.xlane.f32.xlu1 %v941_v34  ;;  %945 = vmax.xlane.f32.xlu0 %v944_v35 }
 0x7a9   :  { %1067 = vrot.lane.b32.xlu1 %v1063_v38, %s2670_s7 }
 0x7ad   :  { %1069 = vrot.lane.b32.xlu1 %v1064_v39, %s2670_s7 }
 0x7ae   :  { %1084 = vrot.lane.b32.xlu0 %v3015_v12, %s2670_s7 }
 0x7b2   :  { %1079 = vrot.lane.b32.xlu0 %v3053_v49, %s2669_s4 }
 0x825   :  { %v946_v41 = vpop.xlane.xlu0 %945  ;;  %v943_v52 = vpop.xlane.xlu1 %942 }
 0x826   :  { %v948_v51 = vsub.f32 %v936_v24, %v946_v41  ;;  %v947_v54 = vsub.f32 %v890_v23, %v943_v52 }
 0x828   :  { %v951_v53 = vmul.f32 1.442695, %v948_v51  ;;  %v949_v55 = vmul.f32 1.442695, %v947_v54 }
 0x829   :  { %v1085_v47 = vpop.permute.xlu0 %1084  ;;  %v1068_v63 = vpop.permute.xlu1 %1067 }
 0x82a   :  { %v1088_v48 = vmul.f32 %v1085_v47, %v3044_v46  ;;  %v1087_v50 = vmul.f32 %v1085_v47, %v3034_v37  ;;  %2339 = vpow2.f32 %v951_v53  ;;  %v1073_v4 = vadd.f32 %v1068_v63, %v1058_v1 }
 0x82b   :  { %2341 = vpow2.f32 %v949_v55 }
 0x82c   :  { %1093 = vrot.lane.b32.xlu0 %v1088_v48, %s2655_s25  ;;  %1091 = vrot.lane.b32.xlu1 %v1087_v50, %s2655_s25  ;;  %v2028_v6 = vpack.c.bf16 %v1073_v4, %v1073_v4 }
 0x82d   :  { %v1070_v0 = vpop.permute.xlu1 %1069  ;;  %v1080_v10 = vpop.permute.xlu0 %1079 }
 0x82e   :  { %v1074_v5 = vadd.f32 %v1070_v0, %v1059_v3  ;;  %v1082_v11 = vmul.f32 %v1080_v10, %v3034_v37  ;;  %v1083_v58 = vmul.f32 %v1080_v10, %v3044_v46 }
 0x830   :  { %v2030_v7 = vpack.c.bf16 %v1074_v5, %v1074_v5 }
 0x834   :  { %v2340_v56 = vpop.eup %2339 }
 0x835   :  { %v956_v57 = vsel %vm698_vm4, %v2340_v56, 0.0  ;;  %v2342_v60 = vpop.eup %2341 }
 0x836   :  { %v953_v61 = vsel %vm698_vm4, %v2342_v60, 0.0 }
 0x84b   :  { %957 = vadd.xlane.f32.xlu0 %v956_v57 }
 0x850   :  { %954 = vadd.xlane.f32.xlu1 %v953_v61 }
 0x861   :  { %1107 = vrot.lane.b32.xlu0 %v2028_v6, %s2674_s13  ;;  %1159 = vrot.lane.b32.xlu1 %v2030_v7, %s2674_s13 }
 0x89e   :  { %v1092_v2 = vpop.permute.xlu1 %1091  ;;  %v1094_v13 = vpop.permute.xlu0 %1093 }
 0x89f   :  { %v1097_v14 = vadd.f32 %v1092_v2, %v1082_v11  ;;  %v1098_v40 = vadd.f32 %v1094_v13, %v1083_v58 }
 0x8a1   :  { %v2027_v16 = vpack.c.bf16 %v1097_v14, %v1097_v14  ;;  %v2029_v17 = vpack.c.bf16 %v1098_v40, %v1098_v40 }
 0x8a3   :  { %1104 = vrot.lane.b32.xlu1 %v2027_v16, %s2670_s7  ;;  %1156 = vrot.lane.b32.xlu0 %v2029_v17, %s2670_s7 }
 0x8d8   :  { %v958_v45 = vpop.xlane.xlu0 %957 }
 0x8d9   :  { %2343 = vrcp.f32 %v958_v45 }
 0x8dc   :  { %v1108_v25 = vpop.permute.xlu0 %1107 }
 0x8dd   :  { %v955_v44 = vpop.xlane.xlu1 %954  ;;  %v3178_v27 = vsel %vm605_vm2, %v1108_v25, 0 }
 0x8de   :  { %2345 = vrcp.f32 %v955_v44 }
 0x8e1   :  { %v1160_v20 = vpop.permute.xlu1 %1159 }
 0x8e2   :  { %v3170_v23 = vsel %vm605_vm2, %v1160_v20, 0 }
 0x8e3   :  { %v2344_v18 = vpop.eup %2343 }
 0x8e4   :  { %v962_v19 = vmul.f32 %v2344_v18, %v2340_v56 }
 0x8e6   :  { %v964_v21 = vpack.c.bf16 %v962_v19, %v962_v19 }
 0x8e8   :  { %v2346_v22 = vpop.eup %2345  ;;  %2166 = vmatmul.mubr.msk.bf16.vlgmr.msra.gmra.mrb[24].mxu1 %vm698_vm4, %v964_v21 }
 0x8e9   :  { %v961_v24 = vmul.f32 %v2346_v22, %v2342_v60  ;;  %2176 = vmatpush3.bf16.xpose.msra.mxu1 %v3170_v23  ;;  %2177 = vmatprep.mubr.msk.bf16.mxu1 %vm2667_vm1, %v2666_v15 }
 0x8ea   :  { %2187 = vmatprep.subr.bf16.mxu1 %v2666_v15 }
 0x8eb   :  { %v963_v26 = vpack.c.bf16 %v961_v24, %v961_v24 }
 0x8ed   :  { %2160 = vmatmul.mubr.msk.bf16.vlgmr.msra.gmra.mrb[12].mxu0 %vm698_vm4, %v963_v26 }
 0x8ee   :  { %2170 = vmatpush3.bf16.xpose.msra.mxu0 %v3178_v27  ;;  %2171 = vmatprep.mubr.msk.bf16.mxu0 %vm2667_vm1, %v2666_v15 }
 0x8ef   :  { %2181 = vmatprep.subr.bf16.mxu0 %v2666_v15 }
 0x915   :  { %v1105_v28 = vpop.permute.xlu1 %1104  ;;  %v1157_v31 = vpop.permute.xlu0 %1156 }
 0x916   :  { %2172 = vmatmul.mubr.msk.bf16.vlgmr.msra.gmra.mrb[16].mxu0 %vm605_vm2, %v1105_v28  ;;  %2178 = vmatmul.mubr.msk.bf16.vlgmr.msra.gmra.mrb[28].mxu1 %vm605_vm2, %v1157_v31 }
 0x917   :  { %2189 = vmatprep.mubr.msk.bf16.mxu1 %vm2667_vm1, %v2666_v15  ;;  %2183 = vmatprep.mubr.msk.bf16.mxu0 %vm2667_vm1, %v2666_v15 }
 0x9bb   :  { %v3191_v33 = vpop.f32.mrb[24].mxu1 }
 0x9bc   :  { %v2167_v34 = vpop.f32.mrb[25].mxu1 }
 0x9bd   :  { %v1048_v35 = vpop.f32.mrb[26].mxu1 }
 0x9be   :  { %v2168_v36 = vpop.f32.mrb[27].mxu1 }
 0x9c0   :  { %v3193_v38 = vpop.f32.mrb[12].mxu0 }
 0x9c1   :  { %v1051_v39 = vpack.c.bf16 %v3191_v33, %v3193_v38  ;;  %v2161_v41 = vpop.f32.mrb[13].mxu0 }
 0x9c2   :  { %v1005_v47 = vpop.f32.mrb[14].mxu0 }
 0x9c3   :  { %v2162_v48 = vpop.f32.mrb[15].mxu0 }
 0x9e9   :  { %v1149_v50 = vpop.f32.mrb[16].mxu0  ;;  %v1201_v51 = vpop.f32.mrb[28].mxu1 }
 0x9ea   :  { %v1150_v52 = vadd.f32 %v1149_v50, %v3080_v9  ;;  %v1202_v53 = vadd.f32 %v1201_v51, %v3080_v9  ;;  %v2173_v54 = vpop.f32.mrb[17].mxu0  ;;  %v2179_v55 = vpop.f32.mrb[29].mxu1 }
 0x9eb   :  { %v1152_v56 = vpop.f32.mrb[18].mxu0  ;;  %v1204_v57 = vpop.f32.mrb[30].mxu1 }
 0x9ec   :  { %v2174_v60 = vpop.f32.mrb[19].mxu0  ;;  %v2180_v61 = vpop.f32.mrb[31].mxu1  ;;  %v1207_v63 = vsel %vm698_vm4, %v1150_v52, -inf  ;;  %v1210_v0 = vsel %vm698_vm4, %v1202_v53, -inf }
 0x9ed   :  { %1208 = vmax.xlane.f32.xlu1 %v1207_v63  ;;  %1211 = vmax.xlane.f32.xlu0 %v1210_v0 }
 0x9fe   :  { %1334 = vrot.lane.b32.xlu1 %v3053_v49, %s2675_s21 }
 0xa03   :  { %1339 = vrot.lane.b32.xlu0 %v3015_v12, %s2674_s13 }
 0xa7a   :  { %v1212_v1 = vpop.xlane.xlu0 %1211  ;;  %v1209_v7 = vpop.xlane.xlu1 %1208 }
 0xa7b   :  { %v1214_v6 = vsub.f32 %v1202_v53, %v1212_v1  ;;  %v1213_v11 = vsub.f32 %v1150_v52, %v1209_v7 }
 0xa7d   :  { %v1217_v10 = vmul.f32 1.442695, %v1214_v6  ;;  %v1215_v58 = vmul.f32 1.442695, %v1213_v11 }
 0xa7e   :  { %v1340_v3 = vpop.permute.xlu0 %1339  ;;  %v1335_v14 = vpop.permute.xlu1 %1334 }
 0xa7f   :  { %v1343_v4 = vmul.f32 %v1340_v3, %v3044_v46  ;;  %v1342_v5 = vmul.f32 %v1340_v3, %v3034_v37  ;;  %2347 = vpow2.f32 %v1217_v10  ;;  %v1338_v40 = vmul.f32 %v1335_v14, %v3044_v46 }
 0xa80   :  { %2349 = vpow2.f32 %v1215_v58  ;;  %v1337_v16 = vmul.f32 %v1335_v14, %v3034_v37 }
 0xa81   :  { %1348 = vrot.lane.b32.xlu0 %v1343_v4, %s2655_s25  ;;  %1346 = vrot.lane.b32.xlu1 %v1342_v5, %s2655_s25 }
 0xa89   :  { %v2348_v49 = vpop.eup %2347 }
 0xa8a   :  { %v1222_v12 = vsel %vm698_vm4, %v2348_v49, 0.0  ;;  %v2350_v2 = vpop.eup %2349 }
 0xa8b   :  { %v1219_v13 = vsel %vm698_vm4, %v2350_v2, 0.0 }
 0xaa0   :  { %1223 = vadd.xlane.f32.xlu0 %v1222_v12 }
 0xaa5   :  { %1220 = vadd.xlane.f32.xlu1 %v1219_v13 }
 0xab6   :  { %1231 = vrot.lane.b32.xlu0 %v3098_v42, %s2675_s21  ;;  %1279 = vrot.lane.b32.xlu1 %v3102_v43, %s2675_s21 }
 0xaf3   :  { %v1349_v17 = vpop.permute.xlu0 %1348  ;;  %v1347_v44 = vpop.permute.xlu1 %1346 }
 0xaf4   :  { %v1353_v45 = vadd.f32 %v1349_v17, %v1338_v40  ;;  %v1352_v18 = vadd.f32 %v1347_v44, %v1337_v16 }
 0xaf6   :  { %v2032_v19 = vpack.c.bf16 %v1353_v45, %v1353_v45  ;;  %v2031_v20 = vpack.c.bf16 %v1352_v18, %v1352_v18 }
 0xaf8   :  { %1405 = vrot.lane.b32.xlu0 %v2032_v19, %s2672_s16  ;;  %1359 = vrot.lane.b32.xlu1 %v2031_v20, %s2672_s16  ;;  %v2295_v19 = vld [vmem:[#allocation15] sm:$0xff]   ;;  %v2296_v20 = vld [vmem:[#allocation15 + $0x8] sm:$0xff]  }
 0xb2d   :  { %v1224_v21 = vpop.xlane.xlu0 %1223 }
 0xb2e   :  { %2351 = vrcp.f32 %v1224_v21  ;;  %v2297_v21 = vld [vmem:[#allocation15 + $0x10] sm:$0xff]  }
 0xb31   :  { %v1232_v42 = vpop.permute.xlu0 %1231 }
 0xb32   :  { %v1237_v43 = vsel %vm729_vm5, %v1232_v42, 0  ;;  %v1221_v22 = vpop.xlane.xlu1 %1220  ;;  %v2298_v42 = vld [vmem:[#allocation15 + $0x18] sm:$0xff]  }
 0xb33   :  { %2182 = vmatpush3.bf16.msra.mxu0 %v1237_v43  ;;  %2353 = vrcp.f32 %v1221_v22 }
 0xb34   :  { %2193 = vmatprep.subr.bf16.mxu0 %v2666_v15 }
 0xb36   :  { %v1280_v37 = vpop.permute.xlu1 %1279 }
 0xb37   :  { %v1285_v24 = vsel %vm729_vm5, %v1280_v37, 0 }
 0xb38   :  { %v2352_v46 = vpop.eup %2351  ;;  %2188 = vmatpush3.bf16.msra.mxu1 %v1285_v24 }
 0xb39   :  { %v1228_v25 = vmul.f32 %v2352_v46, %v2348_v49  ;;  %2199 = vmatprep.subr.bf16.mxu1 %v2666_v15 }
 0xb3b   :  { %v1230_v26 = vpack.c.bf16 %v1228_v25, %v1228_v25 }
 0xb3d   :  { %2190 = vmatmul.mubr.msk.bf16.vlgmr.msra.gmra.mrb[32].mxu1 %vm698_vm4, %v1230_v26  ;;  %v2354_v28 = vpop.eup %2353 }
 0xb3e   :  { %2201 = vmatprep.mubr.msk.bf16.mxu1 %vm2667_vm1, %v2666_v15  ;;  %v1227_v31 = vmul.f32 %v2354_v28, %v2350_v2 }
 0xb40   :  { %v1229_v34 = vpack.c.bf16 %v1227_v31, %v1227_v31 }
 0xb41   :  { %2200 = vmatpush3.bf16.xpose.msra.mxu1 %v3170_v23 }
 0xb42   :  { %2184 = vmatmul.mubr.msk.bf16.vlgmr.msra.gmra.mrb[20].mxu0 %vm698_vm4, %v1229_v34  ;;  %2211 = vmatprep.subr.bf16.mxu1 %v2666_v15 }
 0xb43   :  { %2194 = vmatpush3.bf16.xpose.msra.mxu0 %v3178_v27  ;;  %2195 = vmatprep.mubr.msk.bf16.mxu0 %vm2667_vm1, %v2666_v15 }
 0xb44   :  { %2205 = vmatprep.subr.bf16.mxu0 %v2666_v15 }
 0xb6a   :  { %v1406_v35 = vpop.permute.xlu0 %1405  ;;  %v1360_v36 = vpop.permute.xlu1 %1359 }
 0xb6b   :  { %2202 = vmatmul.mubr.msk.bf16.vlgmr.msra.gmra.mrb[36].mxu1 %vm605_vm2, %v1406_v35  ;;  %2196 = vmatmul.mubr.msk.bf16.vlgmr.msra.gmra.mrb[24].mxu0 %vm605_vm2, %v1360_v36  ;;  %v1992_v35 = vld [vmem:[#allocation17] ss:$0 sm:$0xff] }
 0xb6c   :  { %2212 = vmatpush3.bf16.msra.mxu1 %v1285_v24  ;;  %2206 = vmatpush3.bf16.msra.mxu0 %v1237_v43 }
 0xb6d   :  { %2207 = vmatprep.mubr.msk.bf16.mxu0 %vm2667_vm1, %v2666_v15  ;;  %2213 = vmatprep.mubr.msk.bf16.mxu1 %vm2667_vm1, %v2666_v15 }
 0xb6e   :  { %2217 = vmatprep.subr.bf16.mxu0 %v2666_v15 }
 0xc10   :  { %v1321_v23 = vpop.f32.mrb[32].mxu1 }
 0xc11   :  { %v2191_v27 = vpop.f32.mrb[33].mxu1 }
 0xc12   :  { %v1324_v41 = vpop.f32.mrb[34].mxu1 }
 0xc13   :  { %v2192_v47 = vpop.f32.mrb[35].mxu1 }
 0xc15   :  { %v1273_v48 = vpop.f32.mrb[20].mxu0 }
 0xc16   :  { %v1327_v50 = vpack.c.bf16 %v1321_v23, %v1273_v48  ;;  %v2185_v51 = vpop.f32.mrb[21].mxu0 }
 0xc17   :  { %v1276_v52 = vpop.f32.mrb[22].mxu0 }
 0xc18   :  { %v2186_v53 = vpop.f32.mrb[23].mxu0 }
 0xc3e   :  { %v1444_v54 = vpop.f32.mrb[36].mxu1  ;;  %v1398_v55 = vpop.f32.mrb[24].mxu0 }
 0xc3f   :  { %v1445_v56 = vadd.f32 %v1444_v54, %v3080_v9  ;;  %v2203_v57 = vpop.f32.mrb[37].mxu1  ;;  %v1399_v60 = vadd.f32 %v1398_v55, %v3080_v9  ;;  %v2197_v61 = vpop.f32.mrb[25].mxu0 }
 0xc40   :  { %v1447_v63 = vpop.f32.mrb[38].mxu1  ;;  %v1401_v0 = vpop.f32.mrb[26].mxu0  ;;  %v2302_v57 = vld [vmem:[%s3369_s12 + $0x10] ss:$8 sps:$4 sm:$0xff]   ;;  %v2305_v61 = vld [vmem:[%s3369_s12 + $0x20] ss:$8 sps:$4 sm:$0xff]  }
 0xc41   :  { %v2204_v1 = vpop.f32.mrb[39].mxu1  ;;  %v1453_v3 = vsel %vm698_vm4, %v1445_v56, -inf  ;;  %v2198_v4 = vpop.f32.mrb[27].mxu0  ;;  %v1450_v5 = vsel %vm698_vm4, %v1399_v60, -inf  ;;  %v2310_v63 = vld [vmem:[%s3369_s12 + $0x34] ss:$8 sps:$4 sm:$0xff]  }
 0xc42   :  { %1454 = vmax.xlane.f32.xlu0 %v1453_v3  ;;  %1451 = vmax.xlane.f32.xlu1 %v1450_v5  ;;  %v2308_v0 = vld [vmem:[%s3369_s12 + $0x30] ss:$8 sps:$4 sm:$0xff]  }
 0xc53   :  { %1053 = vrot.lane.b32.xlu1 %v1051_v39, %s2673_s1 }
 0xccf   :  { %v1455_v6 = vpop.xlane.xlu0 %1454  ;;  %v1452_v7 = vpop.xlane.xlu1 %1451 }
 0xcd0   :  { %v1457_v10 = vsub.f32 %v1445_v56, %v1455_v6  ;;  %v1456_v9 = vsub.f32 %v1399_v60, %v1452_v7  ;;  %v2304_v56 = vld [vmem:[%s3369_s12 + $0x14] ss:$8 sps:$4 sm:$0xff]   ;;  %v2307_v60 = vld [vmem:[%s3369_s12 + $0x24] ss:$8 sps:$4 sm:$0xff]  }
 0xcd2   :  { %v1458_v11 = vmul.f32 1.442695, %v1456_v9  ;;  %v1460_v58 = vmul.f32 1.442695, %v1457_v10 }
 0xcd3   :  { %v1054_v49 = vpop.permute.xlu1 %1053 }
 0xcd4   :  { %2355 = vpow2.f32 %v1458_v11  ;;  %1057 = vst.msk [vmem:[#allocation2] sm:$0xff] %vm1056_vm6, %v1054_v49 }
 0xcd5   :  { %2357 = vpow2.f32 %v1460_v58  ;;  %v1998_v58 = vld [vmem:[#allocation18] ss:$0 sm:$0xff] }
 0xcde   :  { %v2356_v12 = vpop.eup %2355 }
 0xcdf   :  { %v1462_v2 = vsel %vm698_vm4, %v2356_v12, 0.0  ;;  %v2358_v13 = vpop.eup %2357 }
 0xce0   :  { %1463 = vadd.xlane.f32.xlu0 %v1462_v2  ;;  %v1465_v14 = vsel %vm698_vm4, %v2358_v13, 0.0 }
 0xce4   :  { %1466 = vadd.xlane.f32.xlu0 %v1465_v14  ;;  %v2311_v14 = vld [vmem:[%s3371_s14] sm:$0xff]  }
 0xcfa   :  { %1329 = vrot.lane.b32.xlu0 %v1327_v50, %s2669_s4 }
 0xd6d   :  { %v1464_v33 = vpop.xlane.xlu0 %1463 }
 0xd6e   :  { %2359 = vrcp.f32 %v1464_v33  ;;  %v2312_v33 = vld [vmem:[%s3371_s14 + $0x8] sm:$0xff]  }
 0xd71   :  { %v1467_v38 = vpop.xlane.xlu0 %1466 }
 0xd72   :  { %2361 = vrcp.f32 %v1467_v38  ;;  %v2313_v38 = vld [vmem:[%s3371_s14 + $0x10] sm:$0xff]  }
 0xd75   :  { %v1330_v39 = vpop.permute.xlu0 %1329 }
 0xd76   :  { %1333 = vst.msk [vmem:[#allocation2] sm:$0xff] %vm1332_vm7, %v1330_v39  ;;  %v2314_v39 = vld [vmem:[%s3371_s14 + $0x18] sm:$0xff]  }
 0xd78   :  { %v2360_v40 = vpop.eup %2359 }
 0xd79   :  { %v1470_v16 = vmul.f32 %v2360_v40, %v2356_v12  ;;  %v2315_v40 = vld [vmem:[%s3371_s14 + $0x20] sm:$0xff]  }
 0xd7b   :  { %v1472_v17 = vpack.c.bf16 %v1470_v16, %v1470_v16  ;;  %v2316_v16 = vld [vmem:[%s3371_s14 + $0x28] sm:$0xff]  }
 0xd7c   :  { %v2362_v45 = vpop.eup %2361 }
 0xd7d   :  { %v1471_v44 = vmul.f32 %v2362_v45, %v2358_v13  ;;  %2208 = vmatmul.mubr.msk.bf16.vlgmr.msra.gmra.mrb[28].mxu0 %vm698_vm4, %v1472_v17  ;;  %v2317_v17 = vld [vmem:[%s3371_s14 + $0x30] sm:$0xff]   ;;  %v2318_v45 = vld [vmem:[%s3371_s14 + $0x38] sm:$0xff]  }
 0xd7e   :  { %2225 = vmatprep.mubr.msk.bf16.mxu0 %vm2667_vm1, %v2666_v15  ;;  %2218 = vmatpush3.bf16.msra.mxu0 %v2295_v19 }
 0xd7f   :  { %v1473_v18 = vpack.c.bf16 %v1471_v44, %v1471_v44  ;;  %2219 = vmatprep.subr.bf16.mxu0 %v2666_v15  ;;  %v1687_v44 = vld [vmem:[#allocation20] sm:$0x3] }
 0xd81   :  { %2214 = vmatmul.mubr.msk.bf16.vlgmr.msra.gmra.mrb[40].mxu1 %vm698_vm4, %v1473_v18  ;;  %v1692_v18 = vrot.slane %v1687_v44, %v452_v30 }
 0xd82   :  { %1774 = vmatprep.mubr.bf16.mxu1 %v2668_v8  ;;  %2220 = vmatpush3.bf16.msra.mxu0 %v2296_v20 }
 0xd83   :  { %2221 = vmatprep.subr.bf16.mxu0 %v2666_v15 }
 0xd86   :  { %2222 = vmatpush3.bf16.msra.mxu0 %v2297_v21 }
 0xd87   :  { %2223 = vmatprep.subr.bf16.mxu0 %v2666_v15 }
 0xd8a   :  { %2224 = vmatpush3.bf16.msra.mxu0 %v2298_v42 }
 0xd8b   :  { %2229 = vmatprep.subr.bf16.mxu0 %v2666_v15 }
 0xe50   :  { %v1511_v43 = vpop.f32.mrb[28].mxu0 }
 0xe51   :  { %v2209_v22 = vpop.f32.mrb[29].mxu0 }
 0xe52   :  { %v1514_v37 = vpop.f32.mrb[30].mxu0 }
 0xe53   :  { %v2210_v8 = vpop.f32.mrb[31].mxu0 }
 0xe54   :  { %v1554_v46 = vpop.f32.mrb[40].mxu1 }
 0xe55   :  { %v1560_v24 = vpack.c.bf16 %v1554_v46, %v1511_v43  ;;  %v2215_v25 = vpop.f32.mrb[41].mxu1 }
 0xe56   :  { %v1557_v26 = vpop.f32.mrb[42].mxu1 }
 0xe57   :  { %1562 = vrot.lane.b32.xlu1 %v1560_v24, %s2675_s21  ;;  %v2216_v28 = vpop.f32.mrb[43].mxu1  ;;  %v1696_v26 = vrot.slane %v1687_v44, %v456_v32 }
 0xec9   :  { %v1563_v31 = vpop.permute.xlu1 %1562 }
 0xeca   :  { %1566 = vst.msk [vmem:[#allocation2] sm:$0xff] %vm1565_vm8, %v1563_v31 }
 0xed1   :  { %v1567_v34 = vld [vmem:[#allocation2] sm:$0xff] }
 0xed2   :  { %2226 = vmatmul.mubr.msk.bf16.vlgmr.msra.gmra.mrb[32].mxu0 %vm209_vm0, %v1567_v34 }
 0xed3   :  { %2245 = vmatprep.mubr.msk.bf16.mxu0 %vm2667_vm1, %v2666_v15  ;;  %2230 = vmatpush3.bf16.msra.mxu0 %v2311_v14 }
 0xed4   :  { %2231 = vmatprep.subr.bf16.mxu0 %v2666_v15 }
 0xed7   :  { %2232 = vmatpush3.bf16.msra.mxu0 %v2312_v33 }
 0xed8   :  { %2233 = vmatprep.subr.bf16.mxu0 %v2666_v15 }
 0xedb   :  { %2234 = vmatpush3.bf16.msra.mxu0 %v2313_v38 }
 0xedc   :  { %2235 = vmatprep.subr.bf16.mxu0 %v2666_v15 }
 0xedf   :  { %2236 = vmatpush3.bf16.msra.mxu0 %v2314_v39 }
 0xee0   :  { %2237 = vmatprep.subr.bf16.mxu0 %v2666_v15 }
 0xee3   :  { %2238 = vmatpush3.bf16.msra.mxu0 %v2315_v40 }
 0xee4   :  { %2239 = vmatprep.subr.bf16.mxu0 %v2666_v15 }
 0xee7   :  { %2240 = vmatpush3.bf16.msra.mxu0 %v2316_v16 }
 0xee8   :  { %2241 = vmatprep.subr.bf16.mxu0 %v2666_v15 }
 0xeeb   :  { %2242 = vmatpush3.bf16.msra.mxu0 %v2317_v17 }
 0xeec   :  { %2243 = vmatprep.subr.bf16.mxu0 %v2666_v15 }
 0xeef   :  { %2244 = vmatpush3.bf16.msra.mxu0 %v2318_v45 }
 0xfa5   :  { %v1644_v36 = vpop.f32.mrb[32].mxu0 }
 0xfa6   :  { %v1645_v23 = vadd.f32 %v1992_v35, %v1644_v36  ;;  %v2227_v27 = vpop.f32.mrb[33].mxu0 }
 0xfa7   :  { %v1647_v41 = vpop.f32.mrb[34].mxu0 }
 0xfa8   :  { %v3265_v47 = vadd.f32 %v1645_v23, %v2976_v59  ;;  %v1648_v48 = vadd.f32 %v1992_v35, %v1647_v41  ;;  %v2228_v50 = vpop.f32.mrb[35].mxu0  ;;  %v2301_v59 = vld [vmem:[%s3369_s12 + $0x4] ss:$8 sps:$4 sm:$0xff]  }
 0xfa9   :  { %1742 = vmatprep.subr.bf16.mxu1 %v2301_v59 }
 0xfaa   :  { %v3268_v51 = vadd.f32 %v1648_v48, %v2978_v62  ;;  %v1654_v52 = vmul.f32 %v3265_v47, %v3265_v47  ;;  %v2299_v62 = vld [vmem:[%s3369_s12] ss:$8 sps:$4 sm:$0xff]  }
 0xfab   :  { %1743 = vmatpush1.bf16.msra.mxu1 %v2299_v62  ;;  %v2010_v48 = vld [vmem:[%s3372_s15] ss:$0 sm:$0xff] }
 0xfac   :  { %v1656_v53 = vsel %vm209_vm0, %v1654_v52, 0.0  ;;  %v1655_v54 = vmul.f32 %v3268_v51, %v3268_v51  ;;  %1744 = vmatprep.subr.bf16.mxu1 %v2304_v56 }
 0xfad   :  { %1657 = vadd.xlane.f32.xlu1 %v1656_v53 }
 0xfae   :  { %v1659_v55 = vsel %vm209_vm0, %v1655_v54, 0.0 }
 0xfaf   :  { %1660 = vadd.xlane.f32.xlu0 %v1659_v55  ;;  %1745 = vmatpush1.bf16.msra.mxu1 %v2302_v57 }
 0xfb0   :  { %1746 = vmatprep.subr.bf16.mxu1 %v2307_v60 }
 0xfb3   :  { %1747 = vmatpush1.bf16.msra.mxu1 %v2305_v61 }
 0xfb4   :  { %1748 = vmatprep.subr.bf16.mxu1 %v2310_v63 }
 0xfb7   :  { %1749 = vmatpush1.bf16.msra.mxu1 %v2308_v0 }
0x103a   :  { %v1658_v1 = vpop.xlane.xlu1 %1657 }
0x103b   :  { %v1662_v3 = vmul.f32 0.015625, %v1658_v1 }
0x103c   :  { %v1661_v4 = vpop.xlane.xlu0 %1660 }
0x103d   :  { %v1664_v5 = vadd.f32 1e-08, %v1662_v3  ;;  %v1663_v6 = vmul.f32 0.015625, %v1661_v4 }
0x103f   :  { %2363 = vrsqrt.f32 %v1664_v5  ;;  %v1665_v7 = vadd.f32 1e-08, %v1663_v6 }
0x1041   :  { %2365 = vrsqrt.f32 %v1665_v7 }
0x1049   :  { %v2364_v10 = vpop.eup %2363 }
0x104a   :  { %v1668_v9 = vmul.f32 %v2364_v10, %v3265_v47 }
0x104b   :  { %v2366_v11 = vpop.eup %2365 }
0x104c   :  { %v1669_v49 = vmul.f32 %v2366_v11, %v3268_v51  ;;  %v1676_v12 = vmul.f32 %v1998_v58, %v1668_v9 }
0x104e   :  { %v1677_v2 = vmul.f32 %v1998_v58, %v1669_v49 }
0x1050   :  { %v1678_v13 = vpack.c.bf16 %v1677_v2, %v1676_v12 }
0x1052   :  { %2007 = vmatmul.mubr.msk.bf16.vlgmr.msra.gmra.mrb[44].mxu1 %vm209_vm0, %v1678_v13 }
0x1125   :  { %v1776_v19 = vpop.f32.mrb[44].mxu1 }
0x1126   :  { %v1777_v20 = vadd.f32 %v1776_v19, %v1692_v18  ;;  %v1778_v21 = vpop.f32.mrb[45].mxu1 }
0x1127   :  { %v1780_v42 = vpop.f32.mrb[46].mxu1  ;;  %v1779_v31 = vadd.f32 %v1778_v21, %v1696_v26 }
0x1128   :  { %v2008_v43 = vmul.f32 -1.442695, %v1777_v20  ;;  %v1781_v22 = vadd.f32 %v1780_v42, %v1692_v18  ;;  %v1782_v37 = vpop.f32.mrb[47].mxu1 }
0x1129   :  { %v1783_v23 = vadd.f32 %v1782_v37, %v1696_v26 }
0x112a   :  { %2367 = vpow2.f32 %v2008_v43  ;;  %v2009_v8 = vmul.f32 -1.442695, %v1781_v22 }
0x112c   :  { %2369 = vpow2.f32 %v2009_v8 }
0x1134   :  { %v2368_v15 = vpop.eup %2367 }
0x1135   :  { %v1791_v46 = vadd.f32 1.0, %v2368_v15 }
0x1136   :  { %v2370_v24 = vpop.eup %2369 }
0x1137   :  { %2371 = vrcp.f32 %v1791_v46  ;;  %v1792_v25 = vadd.f32 1.0, %v2370_v24 }
0x1139   :  { %2373 = vrcp.f32 %v1792_v25 }
0x1141   :  { %v2372_v30 = vpop.eup %2371 }
0x1142   :  { %v1797_v28 = vmul.f32 %v2372_v30, %v1777_v20 }
0x1143   :  { %v2374_v34 = vpop.eup %2373 }
0x1144   :  { %v1799_v35 = vmul.f32 %v1797_v28, %v1779_v31  ;;  %v1798_v36 = vmul.f32 %v2374_v34, %v1781_v22 }
0x1146   :  { %v1800_v27 = vmul.f32 %v1798_v36, %v1783_v23 }
0x1148   :  { %v1801_v41 = vpack.c.bf16 %v1800_v27, %v1799_v35 }
0x114a   :  { %2246 = vmatmul.mubr.bf16.vlgmr.msra.gmra.mrb[36].mxu0 %v1801_v41 }
0x121d   :  { %v1907_v50 = vpop.f32.mrb[36].mxu0 }
0x121e   :  { %v1908_v52 = vadd.f32 %v2010_v48, %v1907_v50  ;;  %v2247_v53 = vpop.f32.mrb[37].mxu0 }
0x121f   :  { %v1910_v54 = vpop.f32.mrb[38].mxu0 }
0x1220   :  { %v1914_v29 = vadd.f32 %v1908_v52, %v3265_v47  ;;  %v1911_v32 = vadd.f32 %v2010_v48, %v1910_v54  ;;  %v2248_v55 = vpop.f32.mrb[39].mxu0 }
0x1222   :  { %1916 = vst.msk [vmem:[#allocation21] sm:$0xff] %vm209_vm0, %v1914_v29  ;;  %v1915_v59 = vadd.f32 %v1911_v32, %v3268_v51 }
0x1224   :  { %1917 = vst.msk [vmem:[#allocation21 + $0x8] sm:$0xff] %vm209_vm0, %v1915_v59 }
0x1225   :  { %2628 = shalt.err (!%p2625_p8)
}
0x1226   :  { %s3386_s30 = sld [smem:[#allocation32_spill]] }
0x122c   :  { %s2629_s8 = scalar_lea.hbm %s3386_s30, 256 }
0x122d   :  { %p2630_p9 = scmp.ne.s32.totalorder %s3386_s30, %s2629_s8  ;;  %p2633_p10 = scmp.lt.u32.totalorder %s2629_s8, %s3386_s30 }
0x122f   :  { %p2635_p11 = pnand %p2633_p10, %p2630_p9 }
0x1231   :  { %2638 = shalt.err (!%p2635_p11)
}
0x1232   :  { %s2677_s0 = smov 128   ;;  %s2678_s20 = smov 8  }
0x1233   :  { %1929 = dma.vmem_to_hbm [thread:$0]  %s1924_s3, 256, %s3386_s30, [#allocation5], %s2677_s0, %s2677_s0, %s2678_s20  }
0x1234   :  { %2651 = dma.done.wait [#allocation5], 256  }
0x1235   :  { %2652 = vsyncadd [#allocation5], 4294967040 }
0x1236   :  { %1933 = vsyncpa [#allocation4], 1 }
0x1237   :  { %1934 = vsyncpa [#allocation7], 1 }
0x1238   :  { %1935 = vsyncpa [#allocation10], 1 }
0x1239   :  { %1936 = vsyncpa [#allocation13], 1 }
0x123a   :  { %1937 = vsyncpa [#allocation16], 1 }
0x123b   :  { %1938 = vsyncpa [#allocation19], 1 }
0x123c   :  { %1939 = vsyncpa [#allocation5], 1 }

</bundles_post_ra>
